<compile_context>
chip_gen: v7x
topology: tpu7x:2x2x1
jax: 0.10.0
libtpu: 0.0.40
codegen_flags: <defaults>
</compile_context>

<pallas_src>
import math

import jax
import jax.numpy as jnp
from jax.experimental import pallas as pl
from jax.experimental.pallas import tpu as pltpu

LN_EPS = 1e-5                      # torch.nn.LayerNorm default
_INV_SQRT2 = 0.7071067811865476    # 1/sqrt(2) for the exact (erf) GELU

_MiB = 1024 * 1024
# bf16 W1+W2 bytes below this -> drop the hidden grid axis, keep weights resident.
_RESIDENT_WEIGHT_LIMIT = 28 * _MiB
# If double-buffering the resident weights would cost more than this, request
# single buffering (pl.Buffered(1)) so the resident variant still fits v7x 64 MiB/TC.
_DOUBLE_BUFFER_LIMIT = 20 * _MiB
_VMEM_LIMIT = 48 * _MiB            # headroom below v7x's 64 MiB/TC


def _round_up(x, m):
    return ((x + m - 1) // m) * m


def _layernorm_f32(x_ref, g_ref, b_ref):
    x = x_ref[...].astype(jnp.float32)
    mean = jnp.mean(x, axis=-1, keepdims=True)
    var = jnp.mean((x - mean) ** 2, axis=-1, keepdims=True)
    xn = (x - mean) * jax.lax.rsqrt(var + LN_EPS)
    return xn * g_ref[...] + b_ref[...]


def _gelu_erf(h):
    # exact erf-based GELU in f32, matching torch.nn.GELU() default
    return 0.5 * h * (1.0 + jax.lax.erf(h * _INV_SQRT2))


# ---------------------------------------------------------------------------
# Fast path: weights VMEM-resident, grid = (row_tiles,)
# ---------------------------------------------------------------------------
def ffn_kernel_resident(x_ref, g_ref, b_ref, w1_ref, b1_ref, w2_ref, b2_ref,
                        o_ref):
    xn = _layernorm_f32(x_ref, g_ref, b_ref)                       # (TM, D) f32
    h = jnp.dot(xn.astype(w1_ref.dtype), w1_ref[...],
                preferred_element_type=jnp.float32) + b1_ref[...]  # (TM, H) f32
    h = _gelu_erf(h)
    y = jnp.dot(h.astype(w2_ref.dtype), w2_ref[...],
                preferred_element_type=jnp.float32) + b2_ref[...]  # (TM, D) f32
    o_ref[...] = y.astype(o_ref.dtype)


# ---------------------------------------------------------------------------
# Fallback: hidden-tiled accumulator, grid = (row_tiles, hidden_tiles)
# (hidden axis last, "arbitrary")
# ---------------------------------------------------------------------------
def ffn_kernel_tiled(x_ref, g_ref, b_ref, w1_ref, b1_ref, w2_ref, b2_ref,
                     o_ref, xn_ref, acc_ref):
    j = pl.program_id(1)

    # Per-row-tile prologue: LayerNorm once, cache bf16 copy for the MXU,
    # zero the f32 accumulator.
    @pl.when(j == 0)
    def _():
        xn_ref[...] = _layernorm_f32(x_ref, g_ref, b_ref).astype(xn_ref.dtype)
        acc_ref[...] = jnp.zeros_like(acc_ref)

    # Hidden-dim tile j:  h_j = GELU(xn @ W1_j + b1_j);  acc += h_j @ W2_j
    h = jnp.dot(xn_ref[...], w1_ref[...],
                preferred_element_type=jnp.float32) + b1_ref[...]
    h = _gelu_erf(h)
    acc_ref[...] += jnp.dot(h.astype(w2_ref.dtype), w2_ref[...],
                            preferred_element_type=jnp.float32)

    # Epilogue: output bias + single lane-dense store of the row tile.
    @pl.when(j == pl.num_programs(1) - 1)
    def _():
        o_ref[...] = (acc_ref[...] + b2_ref[...]).astype(o_ref.dtype)


# ---------------------------------------------------------------------------
# Tile selection helpers
# ---------------------------------------------------------------------------
def _choose_tm(R, tm_max):
    """Row tile: as large as requested; keep the number of row tiles even when
    >1 so the 'parallel' row axis splits across both v7x TensorCores."""
    tm = min(tm_max, _round_up(R, 8))
    n = -(-R // tm)
    if n > 1 and n % 2 == 1:
        n += 1
        tm = _round_up(-(-R // n), 8)
    return tm


def _choose_tj(H, tj_max):
    """Hidden tile: prefer a 256-multiple that divides H (no per-call weight
    padding; 256-granularity feeds the v6e/v7x 2x256x256 MXU well)."""
    tj_cap = max(256, min(tj_max, H))
    for tj in range(tj_cap - tj_cap % 256, 0, -256):
        if H % tj == 0:
            return tj, H
    # Fallback for odd hidden sizes: 128-multiple tile + hidden padding.
    tj = max(128, (min(tj_cap, _round_up(H, 128)) // 128) * 128)
    return tj, _round_up(H, tj)


# ---------------------------------------------------------------------------
# One-time parameter preparation (hoisted out of the per-call path)
# ---------------------------------------------------------------------------
def prepare_params(ln_g, ln_b, w1, b1, w2, b2, *, weight_dtype=jnp.bfloat16):
    """Convert torch-layout FeedForward parameters once.

    torch layouts:  ln_g/ln_b: (dim,)   w1: (hidden, dim)   b1: (hidden,)
                    w2: (dim, hidden)   b2: (dim,)
    Weights are transposed to (in, out) and cast to bf16 here (once per model),
    elementwise params stay f32 as (1, n) rows.
    """
    return {
        "ln_g": jnp.asarray(ln_g, jnp.float32).reshape(1, -1),
        "ln_b": jnp.asarray(ln_b, jnp.float32).reshape(1, -1),
        "w1": jnp.asarray(w1, jnp.float32).T.astype(weight_dtype),
        "b1": jnp.asarray(b1, jnp.float32).reshape(1, -1),
        "w2": jnp.asarray(w2, jnp.float32).T.astype(weight_dtype),
        "b2": jnp.asarray(b2, jnp.float32).reshape(1, -1),
    }


# ---------------------------------------------------------------------------
# Wrapper
# ---------------------------------------------------------------------------
def feedforward(x, params, *, tm=512, tj=1024, weight_resident=None,
                vmem_limit_bytes=_VMEM_LIMIT):
    """y = Linear2(GELU(Linear1(LayerNorm(x)))); x: (..., dim).

    `params` as produced by prepare_params(): w1 (dim, hidden), w2 (hidden, dim)
    in bf16; ln_g/ln_b/b1/b2 as (1, n) float32 rows.
    """
    *lead, D = x.shape
    R = math.prod(lead)
    x2 = x.reshape(R, D)

    ln_g, ln_b = params["ln_g"], params["ln_b"]
    w1, b1 = params["w1"], params["b1"]
    w2, b2 = params["w2"], params["b2"]
    H = w1.shape[1]

    weight_bytes = w1.size * w1.dtype.itemsize + w2.size * w2.dtype.itemsize
    if weight_resident is None:
        weight_resident = weight_bytes <= _RESIDENT_WEIGHT_LIMIT

    tm = _choose_tm(R, tm)
    Rp = _round_up(R, tm)
    if Rp != R:
        # Padded rows are exact: they are LayerNorm'd in isolation, never mix
        # with real rows, and are sliced away below.
        x2 = jnp.pad(x2, ((0, Rp - R), (0, 0)))

    out_dtype = x.dtype
    dim_bytes = x2.size * x2.dtype.itemsize + Rp * D * jnp.dtype(out_dtype).itemsize
    param_bytes = sum(p.size * p.dtype.itemsize for p in (ln_g, ln_b, b1, b2))

    if weight_resident:
        # ---- fast path: W1/W2 stay in VMEM, streamed from HBM exactly once ----
        single_buffer = 2 * weight_bytes > _DOUBLE_BUFFER_LIMIT
        if single_buffer:
            # Constant-index weights need no double buffer; halves resident
            # weight VMEM so large models still fit v7x's 64 MiB/TC.
            w1_spec = pl.BlockSpec((D, H), lambda i: (0, 0),
                                   pipeline_mode=pl.Buffered(1))
            w2_spec = pl.BlockSpec((H, D), lambda i: (0, 0),
                                   pipeline_mode=pl.Buffered(1))
        else:
            w1_spec = pl.BlockSpec((D, H), lambda i: (0, 0))
            w2_spec = pl.BlockSpec((H, D), lambda i: (0, 0))

        cost = pl.CostEstimate(
            flops=4 * Rp * D * H,
            transcendentals=Rp * H,
            bytes_accessed=dim_bytes + weight_bytes + param_bytes,
        )

        out = pl.pallas_call(
            ffn_kernel_resident,
            out_shape=jax.ShapeDtypeStruct((Rp, D), out_dtype),
            grid_spec=pltpu.PrefetchScalarGridSpec(
                num_scalar_prefetch=0,
                grid=(Rp // tm,),
                in_specs=[
                    pl.BlockSpec((tm, D), lambda i: (i, 0)),   # x rows
                    pl.BlockSpec((1, D), lambda i: (0, 0)),    # LN gamma
                    pl.BlockSpec((1, D), lambda i: (0, 0)),    # LN beta
                    w1_spec,                                   # W1 (D, H) resident
                    pl.BlockSpec((1, H), lambda i: (0, 0)),    # b1
                    w2_spec,                                   # W2 (H, D) resident
                    pl.BlockSpec((1, D), lambda i: (0, 0)),    # b2
                ],
                out_specs=pl.BlockSpec((tm, D), lambda i: (i, 0)),
            ),
            compiler_params=pltpu.CompilerParams(
                dimension_semantics=("parallel",),
                vmem_limit_bytes=vmem_limit_bytes,
            ),
            cost_estimate=cost,
        )(x2, ln_g, ln_b, w1, b1, w2, b2)

    else:
        # ---- large-weight fallback: hidden-tiled accumulator ----
        tj, Hp = _choose_tj(H, tj)
        if Hp != H:
            # TODO(synk): for models whose hidden dim has no 128-aligned tiling,
            # pre-pad the weights once in prepare_params instead of per call.
            w1 = jnp.pad(w1, ((0, 0), (0, Hp - H)))
            b1 = jnp.pad(b1, ((0, 0), (0, Hp - H)))
            w2 = jnp.pad(w2, ((0, Hp - H), (0, 0)))

        grid = (Rp // tm, Hp // tj)
        cost = pl.CostEstimate(
            flops=4 * Rp * D * Hp,
            transcendentals=Rp * Hp,
            bytes_accessed=dim_bytes + grid[0] * weight_bytes + param_bytes,
        )

        out = pl.pallas_call(
            ffn_kernel_tiled,
            out_shape=jax.ShapeDtypeStruct((Rp, D), out_dtype),
            grid_spec=pltpu.PrefetchScalarGridSpec(
                num_scalar_prefetch=0,
                grid=grid,
                in_specs=[
                    pl.BlockSpec((tm, D), lambda i, j: (i, 0)),   # x rows
                    pl.BlockSpec((1, D), lambda i, j: (0, 0)),    # LN gamma
                    pl.BlockSpec((1, D), lambda i, j: (0, 0)),    # LN beta
                    pl.BlockSpec((D, tj), lambda i, j: (0, j)),   # W1 hidden tile
                    pl.BlockSpec((1, tj), lambda i, j: (0, j)),   # b1 hidden tile
                    pl.BlockSpec((tj, D), lambda i, j: (j, 0)),   # W2 hidden tile
                    pl.BlockSpec((1, D), lambda i, j: (0, 0)),    # b2
                ],
                out_specs=pl.BlockSpec((tm, D), lambda i, j: (i, 0)),
                scratch_shapes=[
                    pltpu.VMEM((tm, D), jnp.bfloat16),   # cached LayerNorm(x)
                    pltpu.VMEM((tm, D), jnp.float32),    # f32 accumulator
                ],
            ),
            compiler_params=pltpu.CompilerParams(
                dimension_semantics=("parallel", "arbitrary"),
                vmem_limit_bytes=vmem_limit_bytes,
            ),
            cost_estimate=cost,
        )(x2, ln_g, ln_b, w1, b1, w2, b2)

    return out[:R].reshape(*lead, D)


# ---------------------------------------------------------------------------
# Pure-JAX reference with identical numerics (bf16 dot operands, f32 accum)
# ---------------------------------------------------------------------------
def reference_forward(x, p):
    xf = x.astype(jnp.float32)
    mean = jnp.mean(xf, axis=-1, keepdims=True)
    var = jnp.mean((xf - mean) ** 2, axis=-1, keepdims=True)
    xn = (xf - mean) * jax.lax.rsqrt(var + LN_EPS) * p["ln_g"] + p["ln_b"]
    h = jnp.dot(xn.astype(p["w1"].dtype), p["w1"],
                preferred_element_type=jnp.float32) + p["b1"]
    h = 0.5 * h * (1.0 + jax.lax.erf(h * _INV_SQRT2))
    y = jnp.dot(h.astype(p["w2"].dtype), p["w2"],
                preferred_element_type=jnp.float32) + p["b2"]
    return y.astype(x.dtype)


# ---------------------------------------------------------------------------
# Deterministic test
# ---------------------------------------------------------------------------
if __name__ == "__main__":
    # FeedForward(dim=128, hidden_dim=512); dropout=0.0 -> nn.Dropout is identity.
    B, N, dim, hidden = 4, 60, 128, 512

    key = jax.random.PRNGKey(0)
    kx, k1, k2, k3, k4, k5, k6 = jax.random.split(key, 7)
    x = jax.random.normal(kx, (B, N, dim), jnp.float32)

    # torch-layout params (LayerNorm gamma/beta, nn.Linear (out,in) weights),
    # converted once by prepare_params (transpose + bf16 cast hoisted here).
    params = prepare_params(
        ln_g=1.0 + 0.1 * jax.random.normal(k1, (dim,), jnp.float32),
        ln_b=0.1 * jax.random.normal(k2, (dim,), jnp.float32),
        w1=0.05 * jax.random.normal(k3, (hidden, dim), jnp.float32),
        b1=0.02 * jax.random.normal(k4, (hidden,), jnp.float32),
        w2=0.05 * jax.random.normal(k5, (dim, hidden), jnp.float32),
        b2=0.02 * jax.random.normal(k6, (dim,), jnp.float32),
    )

    ref = jax.block_until_ready(reference_forward(x, params))

    # Fast path: weights VMEM-resident, single row-tiled grid axis.
    out = jax.block_until_ready(feedforward(x, params))
    assert out.shape == x.shape
    err = jnp.max(jnp.abs(out - ref))
    assert jnp.allclose(out, ref, atol=5e-3, rtol=5e-3), f"resident path err={err}"

    # Large-weight fallback: hidden-tiled accumulator path (forced with small
    # tiles so both grid axes + row padding are exercised).
    out2 = jax.block_until_ready(
        feedforward(x, params, tm=128, tj=256, weight_resident=False))
    err2 = jnp.max(jnp.abs(out2 - ref))
    assert jnp.allclose(out2, ref, atol=5e-3, rtol=5e-3), f"tiled path err={err2}"

    print("KERNEL_OK")
</pallas_src>

<mosaic_0001>
module attributes {stable_mosaic.version = 11 : i64} {
  func.func @ffn_kernel_resident(%arg0: i32, %arg1: memref<240x128xf32, #tpu.memory_space<vmem>>, %arg2: memref<1x128xf32, #tpu.memory_space<vmem>>, %arg3: memref<1x128xf32, #tpu.memory_space<vmem>>, %arg4: memref<128x512xbf16, #tpu.memory_space<vmem>>, %arg5: memref<1x512xf32, #tpu.memory_space<vmem>>, %arg6: memref<512x128xbf16, #tpu.memory_space<vmem>>, %arg7: memref<1x128xf32, #tpu.memory_space<vmem>>, %arg8: memref<240x128xf32, #tpu.memory_space<vmem>>) attributes {dimension_semantics = [#tpu.dimension_semantics<parallel>], iteration_bounds = array<i64: 1>, scalar_prefetch = 0 : i64, scratch_operands = 0 : i64, tpu.core_type = #tpu.core_type<tc>, window_params = [{transform_indices = @transform_0, window_bounds = array<i64: 240, 128>}, {pipeline_mode = #tpu.pipeline_mode<synchronous>, transform_indices = @transform_1, window_bounds = array<i64: 1, 128>}, {pipeline_mode = #tpu.pipeline_mode<synchronous>, transform_indices = @transform_2, window_bounds = array<i64: 1, 128>}, {pipeline_mode = #tpu.pipeline_mode<synchronous>, transform_indices = @transform_3, window_bounds = array<i64: 128, 512>}, {pipeline_mode = #tpu.pipeline_mode<synchronous>, transform_indices = @transform_4, window_bounds = array<i64: 1, 512>}, {pipeline_mode = #tpu.pipeline_mode<synchronous>, transform_indices = @transform_5, window_bounds = array<i64: 512, 128>}, {pipeline_mode = #tpu.pipeline_mode<synchronous>, transform_indices = @transform_6, window_bounds = array<i64: 1, 128>}, {transform_indices = @transform_7, window_bounds = array<i64: 240, 128>}]} {
    %c0 = arith.constant 0 : index
    %c0_0 = arith.constant 0 : index
    %0 = vector.load %arg1[%c0, %c0_0] : memref<240x128xf32, #tpu.memory_space<vmem>>, vector<240x128xf32>
    %cst = arith.constant dense<0.000000e+00> : vector<240xf32>
    %1 = vector.multi_reduction <add>, %0, %cst [1] : vector<240x128xf32> to vector<240xf32>
    %2 = vector.shape_cast %1 : vector<240xf32> to vector<240x1xf32>
    %cst_1 = arith.constant 1.280000e+02 : f32
    %3 = vector.broadcast %cst_1 : f32 to vector<240x1xf32>
    %4 = arith.divf %2, %3 : vector<240x1xf32>
    %5 = vector.broadcast %4 : vector<240x1xf32> to vector<240x128xf32>
    %6 = arith.subf %0, %5 : vector<240x128xf32>
    %7 = arith.mulf %6, %6 : vector<240x128xf32>
    %cst_2 = arith.constant dense<0.000000e+00> : vector<240xf32>
    %8 = vector.multi_reduction <add>, %7, %cst_2 [1] : vector<240x128xf32> to vector<240xf32>
    %9 = vector.shape_cast %8 : vector<240xf32> to vector<240x1xf32>
    %cst_3 = arith.constant 1.280000e+02 : f32
    %10 = vector.broadcast %cst_3 : f32 to vector<240x1xf32>
    %11 = arith.divf %9, %10 : vector<240x1xf32>
    %12 = vector.broadcast %4 : vector<240x1xf32> to vector<240x128xf32>
    %13 = arith.subf %0, %12 : vector<240x128xf32>
    %cst_4 = arith.constant 9.99999974E-6 : f32
    %14 = vector.broadcast %cst_4 : f32 to vector<240x1xf32>
    %15 = arith.addf %11, %14 : vector<240x1xf32>
    %16 = math.rsqrt %15 : vector<240x1xf32>
    %17 = vector.broadcast %16 : vector<240x1xf32> to vector<240x128xf32>
    %18 = arith.mulf %13, %17 : vector<240x128xf32>
    %c0_5 = arith.constant 0 : index
    %c0_6 = arith.constant 0 : index
    %19 = vector.load %arg2[%c0_5, %c0_6] : memref<1x128xf32, #tpu.memory_space<vmem>>, vector<1x128xf32>
    %20 = vector.broadcast %19 : vector<1x128xf32> to vector<240x128xf32>
    %21 = arith.mulf %18, %20 : vector<240x128xf32>
    %c0_7 = arith.constant 0 : index
    %c0_8 = arith.constant 0 : index
    %22 = vector.load %arg3[%c0_7, %c0_8] : memref<1x128xf32, #tpu.memory_space<vmem>>, vector<1x128xf32>
    %23 = vector.broadcast %22 : vector<1x128xf32> to vector<240x128xf32>
    %24 = arith.addf %21, %23 : vector<240x128xf32>
    %25 = arith.truncf %24 : vector<240x128xf32> to vector<240x128xbf16>
    %c0_9 = arith.constant 0 : index
    %c0_10 = arith.constant 0 : index
    %26 = vector.load %arg4[%c0_9, %c0_10] : memref<128x512xbf16, #tpu.memory_space<vmem>>, vector<128x512xbf16>
    %cst_11 = arith.constant dense<0.000000e+00> : vector<240x512xf32>
    %27 = tpu.matmul %25, %26, %cst_11 {dimension_numbers = #tpu.dot_dimension_numbers<[1], [0], [0], [1], [0, 0, 1, 1], [], []>} : vector<240x128xbf16>, vector<128x512xbf16>, vector<240x512xf32> -> vector<240x512xf32>
    %c0_12 = arith.constant 0 : index
    %c0_13 = arith.constant 0 : index
    %28 = vector.load %arg5[%c0_12, %c0_13] : memref<1x512xf32, #tpu.memory_space<vmem>>, vector<1x512xf32>
    %29 = vector.broadcast %28 : vector<1x512xf32> to vector<240x512xf32>
    %30 = arith.addf %27, %29 : vector<240x512xf32>
    %cst_14 = arith.constant 5.000000e-01 : f32
    %31 = vector.broadcast %cst_14 : f32 to vector<240x512xf32>
    %32 = arith.mulf %31, %30 : vector<240x512xf32>
    %cst_15 = arith.constant 0.707106769 : f32
    %33 = vector.broadcast %cst_15 : f32 to vector<240x512xf32>
    %34 = arith.mulf %30, %33 : vector<240x512xf32>
    %35 = math.erf %34 : vector<240x512xf32>
    %cst_16 = arith.constant 1.000000e+00 : f32
    %36 = vector.broadcast %cst_16 : f32 to vector<240x512xf32>
    %37 = arith.addf %36, %35 : vector<240x512xf32>
    %38 = arith.mulf %32, %37 : vector<240x512xf32>
    %39 = arith.truncf %38 : vector<240x512xf32> to vector<240x512xbf16>
    %c0_17 = arith.constant 0 : index
    %c0_18 = arith.constant 0 : index
    %40 = vector.load %arg6[%c0_17, %c0_18] : memref<512x128xbf16, #tpu.memory_space<vmem>>, vector<512x128xbf16>
    %cst_19 = arith.constant dense<0.000000e+00> : vector<240x128xf32>
    %41 = tpu.matmul %39, %40, %cst_19 {dimension_numbers = #tpu.dot_dimension_numbers<[1], [0], [0], [1], [0, 0, 1, 1], [], []>} : vector<240x512xbf16>, vector<512x128xbf16>, vector<240x128xf32> -> vector<240x128xf32>
    %c0_20 = arith.constant 0 : index
    %c0_21 = arith.constant 0 : index
    %42 = vector.load %arg7[%c0_20, %c0_21] : memref<1x128xf32, #tpu.memory_space<vmem>>, vector<1x128xf32>
    %43 = vector.broadcast %42 : vector<1x128xf32> to vector<240x128xf32>
    %44 = arith.addf %41, %43 : vector<240x128xf32>
    %c0_22 = arith.constant 0 : index
    %c0_23 = arith.constant 0 : index
    %45 = vector.load %arg8[%c0_22, %c0_23] : memref<240x128xf32, #tpu.memory_space<vmem>>, vector<240x128xf32>
    tpu.vector_store %arg8[%c0_22, %c0_23], %44 {strides = array<i32>} : memref<240x128xf32, #tpu.memory_space<vmem>>, vector<240x128xf32>,
    return
  }
  func.func @transform_0(%arg0: i32) -> (i32, i32) {
    %c0_i32 = arith.constant 0 : i32
    %c0_i32_0 = arith.constant 0 : i32
    return %arg0, %c0_i32 : i32, i32
  }
  func.func @transform_1(%arg0: i32) -> (i32, i32) {
    %c0_i32 = arith.constant 0 : i32
    %c0_i32_0 = arith.constant 0 : i32
    %c0_i32_1 = arith.constant 0 : i32
    return %c0_i32, %c0_i32_0 : i32, i32
  }
  func.func @transform_2(%arg0: i32) -> (i32, i32) {
    %c0_i32 = arith.constant 0 : i32
    %c0_i32_0 = arith.constant 0 : i32
    %c0_i32_1 = arith.constant 0 : i32
    return %c0_i32, %c0_i32_0 : i32, i32
  }
  func.func @transform_3(%arg0: i32) -> (i32, i32) {
    %c0_i32 = arith.constant 0 : i32
    %c0_i32_0 = arith.constant 0 : i32
    %c0_i32_1 = arith.constant 0 : i32
    return %c0_i32, %c0_i32_0 : i32, i32
  }
  func.func @transform_4(%arg0: i32) -> (i32, i32) {
    %c0_i32 = arith.constant 0 : i32
    %c0_i32_0 = arith.constant 0 : i32
    %c0_i32_1 = arith.constant 0 : i32
    return %c0_i32, %c0_i32_0 : i32, i32
  }
  func.func @transform_5(%arg0: i32) -> (i32, i32) {
    %c0_i32 = arith.constant 0 : i32
    %c0_i32_0 = arith.constant 0 : i32
    %c0_i32_1 = arith.constant 0 : i32
    return %c0_i32, %c0_i32_0 : i32, i32
  }
  func.func @transform_6(%arg0: i32) -> (i32, i32) {
    %c0_i32 = arith.constant 0 : i32
    %c0_i32_0 = arith.constant 0 : i32
    %c0_i32_1 = arith.constant 0 : i32
    return %c0_i32, %c0_i32_0 : i32, i32
  }
  func.func @transform_7(%arg0: i32) -> (i32, i32) {
    %c0_i32 = arith.constant 0 : i32
    %c0_i32_0 = arith.constant 0 : i32
    return %arg0, %c0_i32 : i32, i32
  }
}

</mosaic_0001>

<bundles_post_ra>
// kernel: tpu_custom_call.1
= control target key start
LH: loop header
LB: loop body
LE: loop exit
PB: predicated region body
PF: predicated region fallthrough
CT: control target
= control target key end

     0   :  { %12 = vsyncpa [#allocation3], 0  ;;  %s4512_s0 = inlined_call_operand.hbm [shape: f32[240,128], index: 0, kind: input, shape index: {}]   ;;  %s4513_s1 = inlined_call_operand.vmem [shape: f32[1,128], index: 1, kind: input, shape index: {}]   ;;  %s4514_s2 = inlined_call_operand.vmem [shape: f32[1,128], index: 2, kind: input, shape index: {}]   ;;  %s4515_s3 = inlined_call_operand.hbm [shape: bf16[128,512], index: 3, kind: input, shape index: {}]   ;;  %s4516_s4 = inlined_call_operand.vmem [shape: f32[1,512], index: 4, kind: input, shape index: {}]   ;;  %s4517_s5 = inlined_call_operand.hbm [shape: bf16[512,128], index: 5, kind: input, shape index: {}]   ;;  %s4518_s6 = inlined_call_operand.vmem [shape: f32[1,128], index: 6, kind: input, shape index: {}]   ;;  %s4519_s7 = inlined_call_operand.hbm [shape: f32[240,128], index: 7, kind: output, shape index: {}]  }
   0x1   :  { %13 = vsyncpa [#allocation6], 0 }
   0x2   :  { %14 = vsyncpa [#allocation4], 0  ;;  %s3140_s24 = smov [#allocation5]   ;;  %s3046_s28 = scalar_lea.hbm %s4515_s3, 4096 }
   0x3   :  { %s36_s25 = sshll.u32 %s3140_s24, 4  ;;  %p3047_p0 = scmp.ne.s32.totalorder %s4515_s3, %s3046_s28  ;;  %s37_s25 = int_to_ptr.vmem [resolvable:$true] %s36_s25 }
   0x4   :  { %p3050_p1 = scmp.lt.u32.totalorder %s3046_s28, %s4515_s3 }
   0x6   :  { %p3052_p2 = pnand %p3050_p1, %p3047_p0 }
   0x8   :  { %3055 = shalt.err (!%p3052_p2)
}
   0x9   :  { %s3056_s10 = scalar_lea.vmem %s37_s25, 4096  ;;  %p3061_p4 = scmp.lt.s32.totalorder %s37_s25, %s37_s25 }
   0xa   :  { %p3057_p3 = scmp.ne.s32.totalorder %s37_s25, %s3056_s10  ;;  %p3062_p5 = scmp.lt.s32.totalorder %s3056_s10, %s3056_s10 }
   0xc   :  { %p3063_p6 = por %p3062_p5, %p3061_p4 }
   0xe   :  { %p3064_p7 = pnand %p3063_p6, %p3057_p3 }
  0x10   :  { %3067 = shalt.err (!%p3064_p7)
}
  0x11   :  { %s3141_s11 = smov 256   ;;  %s3142_s12 = smov 16  }
  0x12   :  { %42 = dma.hbm_to_vmem [thread:$0]  %s4515_s3, 4096, %s37_s25, [#allocation6], %s3141_s11, %s3141_s11, %s3142_s12  }
  0x13   :  { %s3143_s15 = smov [#allocation2]   ;;  %s3068_s19 = scalar_lea.hbm %s4512_s0, 3840 }
  0x14   :  { %s20_s16 = sshll.u32 %s3143_s15, 4  ;;  %p3069_p8 = scmp.ne.s32.totalorder %s4512_s0, %s3068_s19  ;;  %s21_s16 = int_to_ptr.vmem [resolvable:$true] %s20_s16 }
  0x15   :  { %p3072_p9 = scmp.lt.u32.totalorder %s3068_s19, %s4512_s0 }
  0x17   :  { %p3074_p10 = pnand %p3072_p9, %p3069_p8 }
  0x19   :  { %3077 = shalt.err (!%p3074_p10)
}
  0x1a   :  { %s3078_s24 = scalar_lea.vmem %s21_s16, 3840  ;;  %p3083_p12 = scmp.lt.s32.totalorder %s21_s16, %s21_s16 }
  0x1b   :  { %p3079_p11 = scmp.ne.s32.totalorder %s21_s16, %s3078_s24  ;;  %p3084_p13 = scmp.lt.s32.totalorder %s3078_s24, %s3078_s24 }
  0x1d   :  { %p3085_p0 = por %p3084_p13, %p3083_p12 }
  0x1f   :  { %p3086_p1 = pnand %p3085_p0, %p3079_p11 }
  0x21   :  { %3089 = shalt.err (!%p3086_p1)
}
  0x22   :  { %s3144_s3 = smov 128   ;;  %s3145_s25 = smov 8  }
  0x23   :  { %26 = dma.hbm_to_vmem [thread:$0]  %s4512_s0, 3840, %s21_s16, [#allocation3], %s3144_s3, %s3144_s3, %s3145_s25  }
  0x24   :  { %s3146_s28 = smov [#allocation7]   ;;  %s3090_s9 = scalar_lea.hbm %s4517_s5, 4096 }
  0x25   :  { %s50_s29 = sshll.u32 %s3146_s28, 4  ;;  %p3091_p2 = scmp.ne.s32.totalorder %s4517_s5, %s3090_s9  ;;  %s51_s29 = int_to_ptr.vmem [resolvable:$true] %s50_s29 }
  0x26   :  { %p3094_p3 = scmp.lt.u32.totalorder %s3090_s9, %s4517_s5 }
  0x28   :  { %p3096_p4 = pnand %p3094_p3, %p3091_p2 }
  0x2a   :  { %3099 = shalt.err (!%p3096_p4)
}
  0x2b   :  { %s3100_s14 = scalar_lea.vmem %s51_s29, 4096  ;;  %p3105_p6 = scmp.lt.s32.totalorder %s51_s29, %s51_s29 }
  0x2c   :  { %p3101_p5 = scmp.ne.s32.totalorder %s51_s29, %s3100_s14  ;;  %p3106_p7 = scmp.lt.s32.totalorder %s3100_s14, %s3100_s14 }
  0x2e   :  { %p3107_p8 = por %p3106_p7, %p3105_p6 }
  0x30   :  { %p3108_p9 = pnand %p3107_p8, %p3101_p5 }
  0x32   :  { %3111 = shalt.err (!%p3108_p9)
}
  0x33   :  { %s3147_s0 = smov 64   ;;  %s3148_s15 = smov 4  }
  0x34   :  { %56 = dma.hbm_to_vmem [thread:$0]  %s4517_s5, 4096, %s51_s29, [#allocation6], %s3147_s0, %s3147_s0, %s3148_s15  }
  0x35   :  { %3134 = dma.done.wait [#allocation3], 3840  }
  0x36   :  { %3135 = vsyncadd [#allocation3], 4294963456 }
  0x37   :  { %3136 = dma.done.wait [#allocation6], 8192  }
  0x38   :  { %3137 = vsyncadd [#allocation6], 4294959104  ;;  %v69_v0 = vld [vmem:[#allocation2] sm:$0xff]  ;;  %v71_v1 = vld [vmem:[#allocation2 + $0x10] sm:$0xff] }
  0x39   :  { %99 = vadd.xlane.f32.xlu0 %v69_v0  ;;  %103 = vadd.xlane.f32.xlu1 %v71_v1  ;;  %v70_v2 = vld [vmem:[#allocation2 + $0x8] sm:$0xff]  ;;  %v3230_v3 = vld [vmem:[#allocation2 + $0x18] sm:$0xff]  ;;  %v3233_v4 = vld [vmem:[#allocation2 + $0x20] sm:$0xff] }
  0x3a   :  { %v3235_v5 = vld [vmem:[#allocation2 + $0x28] sm:$0xff]  ;;  %v3237_v6 = vld [vmem:[#allocation2 + $0x30] sm:$0xff]  ;;  %v3239_v7 = vld [vmem:[#allocation2 + $0x38] sm:$0xff] }
  0x3b   :  { %v3243_v8 = vld [vmem:[#allocation2 + $0x40] sm:$0xff]  ;;  %v3245_v9 = vld [vmem:[#allocation2 + $0x48] sm:$0xff]  ;;  %v3249_v10 = vld [vmem:[#allocation2 + $0x50] sm:$0xff] }
  0x3c   :  { %v3251_v11 = vld [vmem:[#allocation2 + $0x58] sm:$0xff]  ;;  %v3255_v12 = vld [vmem:[#allocation2 + $0x60] sm:$0xff]  ;;  %v3259_v13 = vld [vmem:[#allocation2 + $0x68] sm:$0xff] }
  0x3d   :  { %101 = vadd.xlane.f32.xlu0 %v70_v2  ;;  %105 = vadd.xlane.f32.xlu1 %v3230_v3  ;;  %v3261_v14 = vld [vmem:[#allocation2 + $0x70] sm:$0xff]  ;;  %v3263_v15 = vld [vmem:[#allocation2 + $0x78] sm:$0xff]  ;;  %v3267_v16 = vld [vmem:[#allocation2 + $0x80] sm:$0xff] }
  0x3e   :  { %v3271_v17 = vld [vmem:[#allocation2 + $0x88] sm:$0xff]  ;;  %v3273_v18 = vld [vmem:[#allocation2 + $0x90] sm:$0xff]  ;;  %v3277_v19 = vld [vmem:[#allocation2 + $0x98] sm:$0xff] }
  0x3f   :  { %v2666_v20 = vld [vmem:[#allocation5 + $0x4] ss:$16 sps:$4 sm:$0xff]   ;;  %v2668_v21 = vld [vmem:[#allocation5 + $0xc] ss:$16 sps:$4 sm:$0xff]   ;;  %v2670_v22 = vld [vmem:[#allocation5] ss:$16 sps:$4 sm:$0xff]  }
  0x40   :  { %v2671_v23 = vld [vmem:[#allocation5 + $0x8] ss:$16 sps:$4 sm:$0xff]   ;;  %v2672_v24 = vld [vmem:[#allocation5 + $0x24] ss:$16 sps:$4 sm:$0xff]   ;;  %v2674_v25 = vld [vmem:[#allocation5 + $0x2c] ss:$16 sps:$4 sm:$0xff]   ;;  %733 = vmatprep.subr.bf16.mxu0 %v2666_v20  ;;  %916 = vmatprep.subr.bf16.mxu1 %v2668_v21 }
  0x41   :  { %107 = vadd.xlane.f32.xlu0 %v3233_v4  ;;  %109 = vadd.xlane.f32.xlu1 %v3235_v5  ;;  %v3289_v38 = vld [vmem:[#allocation2 + $0xa0] sm:$0xff]  ;;  %v3299_v44 = vld [vmem:[#allocation2 + $0xa8] sm:$0xff]  ;;  %v3307_v49 = vld [vmem:[#allocation2 + $0xb0] sm:$0xff] }
  0x42   :  { %734 = vmatpush1.bf16.msra.mxu0 %v2670_v22  ;;  %917 = vmatpush1.bf16.msra.mxu1 %v2671_v23  ;;  %v2676_v54 = vld [vmem:[#allocation5 + $0x20] ss:$16 sps:$4 sm:$0xff]   ;;  %v2677_v55 = vld [vmem:[#allocation5 + $0x28] ss:$16 sps:$4 sm:$0xff]   ;;  %v2678_v59 = vld [vmem:[#allocation5 + $0x44] ss:$16 sps:$4 sm:$0xff]  }
  0x43   :  { %735 = vmatprep.subr.bf16.mxu0 %v2672_v24  ;;  %918 = vmatprep.subr.bf16.mxu1 %v2674_v25  ;;  %v3315_v56 = vld [vmem:[#allocation2 + $0xb8] sm:$0xff]  ;;  %v2688_v23 = vld [vmem:[#allocation5 + $0x60] ss:$16 sps:$4 sm:$0xff]   ;;  %v3331_v25 = vld [vmem:[#allocation2 + $0xc8] sm:$0xff] }
  0x44   :  { %v2680_v60 = vld [vmem:[#allocation5 + $0x4c] ss:$16 sps:$4 sm:$0xff]   ;;  %v2689_v24 = vld [vmem:[#allocation5 + $0x68] ss:$16 sps:$4 sm:$0xff]  }
  0x45   :  { %111 = vadd.xlane.f32.xlu0 %v3237_v6  ;;  %113 = vadd.xlane.f32.xlu1 %v3239_v7  ;;  %v2686_v20 = vld [vmem:[#allocation5 + $0x6c] ss:$16 sps:$4 sm:$0xff]  }
  0x46   :  { %736 = vmatpush1.bf16.msra.mxu0 %v2676_v54  ;;  %919 = vmatpush1.bf16.msra.mxu1 %v2677_v55  ;;  %v2704_v54 = vld [vmem:[#allocation5 + $0xcc] ss:$16 sps:$4 sm:$0xff]  }
  0x47   :  { %737 = vmatprep.subr.bf16.mxu0 %v2678_v59  ;;  %920 = vmatprep.subr.bf16.mxu1 %v2680_v60  ;;  %v2706_v59 = vld [vmem:[#allocation5 + $0xc0] ss:$16 sps:$4 sm:$0xff]   ;;  %v2707_v60 = vld [vmem:[#allocation5 + $0xc8] ss:$16 sps:$4 sm:$0xff]  }
  0x49   :  { %115 = vadd.xlane.f32.xlu0 %v3243_v8  ;;  %117 = vadd.xlane.f32.xlu1 %v3245_v9 }
  0x4d   :  { %119 = vadd.xlane.f32.xlu0 %v3249_v10  ;;  %121 = vadd.xlane.f32.xlu1 %v3251_v11 }
  0x51   :  { %123 = vadd.xlane.f32.xlu0 %v3255_v12  ;;  %125 = vadd.xlane.f32.xlu1 %v3259_v13 }
  0x55   :  { %127 = vadd.xlane.f32.xlu0 %v3261_v14  ;;  %129 = vadd.xlane.f32.xlu1 %v3263_v15 }
  0x59   :  { %131 = vadd.xlane.f32.xlu0 %v3267_v16  ;;  %133 = vadd.xlane.f32.xlu1 %v3271_v17 }
  0x5d   :  { %135 = vadd.xlane.f32.xlu0 %v3273_v18  ;;  %137 = vadd.xlane.f32.xlu1 %v3277_v19 }
  0xc6   :  { %v100_v26 = vpop.xlane.xlu0 %99  ;;  %v104_v27 = vpop.xlane.xlu1 %103 }
  0xc7   :  { %v160_v28 = vmul.f32 0.0078125, %v100_v26  ;;  %v162_v30 = vmul.f32 0.0078125, %v104_v27 }
  0xc9   :  { %v3281_v29 = vsub.f32 %v69_v0, %v160_v28  ;;  %v3287_v36 = vsub.f32 %v71_v1, %v162_v30  ;;  %v2682_v0 = vld [vmem:[#allocation5 + $0x40] ss:$16 sps:$4 sm:$0xff]   ;;  %v2683_v1 = vld [vmem:[#allocation5 + $0x48] ss:$16 sps:$4 sm:$0xff]   ;;  %v2690_v28 = vld [vmem:[#allocation5 + $0x84] ss:$16 sps:$4 sm:$0xff]  }
  0xca   :  { %v102_v31 = vpop.xlane.xlu0 %101  ;;  %v106_v32 = vpop.xlane.xlu1 %105  ;;  %738 = vmatpush1.bf16.msra.mxu0 %v2682_v0  ;;  %921 = vmatpush1.bf16.msra.mxu1 %v2683_v1  ;;  %v2692_v30 = vld [vmem:[#allocation5 + $0x8c] ss:$16 sps:$4 sm:$0xff]  }
  0xcb   :  { %v161_v33 = vmul.f32 0.0078125, %v102_v31  ;;  %v220_v34 = vmul.f32 %v3281_v29, %v3281_v29  ;;  %v163_v37 = vmul.f32 0.0078125, %v106_v32  ;;  %v222_v42 = vmul.f32 %v3287_v36, %v3287_v36  ;;  %922 = vmatprep.subr.bf16.mxu1 %v2686_v20 }
  0xcd   :  { %v3285_v35 = vsub.f32 %v70_v2, %v161_v33  ;;  %250 = vadd.xlane.f32.xlu0 %v220_v34  ;;  %v3295_v41 = vsub.f32 %v3230_v3, %v163_v37  ;;  %v3323_v2 = vld [vmem:[#allocation2 + $0xc0] sm:$0xff]  ;;  %v2695_v34 = vld [vmem:[#allocation5 + $0x88] ss:$16 sps:$4 sm:$0xff]   ;;  %v3339_v37 = vld [vmem:[#allocation2 + $0xd0] sm:$0xff] }
  0xce   :  { %v108_v39 = vpop.xlane.xlu0 %107  ;;  %v110_v45 = vpop.xlane.xlu1 %109  ;;  %923 = vmatpush1.bf16.msra.mxu1 %v2689_v24  ;;  %v2694_v33 = vld [vmem:[#allocation5 + $0x80] ss:$16 sps:$4 sm:$0xff]   ;;  %v3366_v24 = vld [vmem:[#allocation2 + $0xe8] sm:$0xff] }
  0xcf   :  { %v221_v40 = vmul.f32 %v3285_v35, %v3285_v35  ;;  %v164_v43 = vmul.f32 0.0078125, %v108_v39  ;;  %v223_v47 = vmul.f32 %v3295_v41, %v3295_v41  ;;  %v165_v48 = vmul.f32 0.0078125, %v110_v45  ;;  %924 = vmatprep.subr.bf16.mxu1 %v2692_v30 }
  0xd1   :  { %139 = vadd.xlane.f32.xlu0 %v3289_v38  ;;  %252 = vadd.xlane.f32.xlu1 %v221_v40  ;;  %v3303_v46 = vsub.f32 %v3233_v4, %v164_v43  ;;  %v3311_v51 = vsub.f32 %v3235_v5, %v165_v48  ;;  %v2684_v5 = vld [vmem:[#allocation5 + $0x64] ss:$16 sps:$4 sm:$0xff]   ;;  %v2701_v48 = vld [vmem:[#allocation5 + $0xa8] ss:$16 sps:$4 sm:$0xff]  }
  0xd2   :  { %v112_v50 = vpop.xlane.xlu0 %111  ;;  %v114_v57 = vpop.xlane.xlu1 %113  ;;  %739 = vmatprep.subr.bf16.mxu0 %v2684_v5  ;;  %925 = vmatpush1.bf16.msra.mxu1 %v2695_v34  ;;  %v2696_v40 = vld [vmem:[#allocation5 + $0xa4] ss:$16 sps:$4 sm:$0xff]  }
  0xd3   :  { %v224_v52 = vmul.f32 %v3303_v46, %v3303_v46  ;;  %v166_v53 = vmul.f32 0.0078125, %v112_v50  ;;  %v225_v62 = vmul.f32 %v3311_v51, %v3311_v51  ;;  %v167_v63 = vmul.f32 0.0078125, %v114_v57  ;;  %740 = vmatpush1.bf16.msra.mxu0 %v2688_v23  ;;  %v3347_v50 = vld [vmem:[#allocation2 + $0xd8] sm:$0xff] }
  0xd4   :  { %741 = vmatprep.subr.bf16.mxu0 %v2690_v28  ;;  %v2713_v23 = vld [vmem:[#allocation5 + $0xe8] ss:$16 sps:$4 sm:$0xff]  }
  0xd5   :  { %254 = vadd.xlane.f32.xlu0 %v222_v42  ;;  %141 = vadd.xlane.f32.xlu1 %v3299_v44  ;;  %v3319_v61 = vsub.f32 %v3237_v6, %v166_v53  ;;  %v3327_v6 = vsub.f32 %v3239_v7, %v167_v63  ;;  %v2698_v42 = vld [vmem:[#allocation5 + $0xac] ss:$16 sps:$4 sm:$0xff]   ;;  %v2702_v53 = vld [vmem:[#allocation5 + $0xc4] ss:$16 sps:$4 sm:$0xff]  }
  0xd6   :  { %v116_v58 = vpop.xlane.xlu0 %115  ;;  %v118_v3 = vpop.xlane.xlu1 %117  ;;  %926 = vmatprep.subr.bf16.mxu1 %v2698_v42 }
  0xd7   :  { %v226_v21 = vmul.f32 %v3319_v61, %v3319_v61  ;;  %v168_v22 = vmul.f32 0.0078125, %v116_v58  ;;  %v227_v31 = vmul.f32 %v3327_v6, %v3327_v6  ;;  %v169_v32 = vmul.f32 0.0078125, %v118_v3  ;;  %742 = vmatpush1.bf16.msra.mxu0 %v2694_v33  ;;  %927 = vmatpush1.bf16.msra.mxu1 %v2701_v48  ;;  %v2708_v3 = vld [vmem:[#allocation5 + $0xe4] ss:$16 sps:$4 sm:$0xff]  }
  0xd8   :  { %743 = vmatprep.subr.bf16.mxu0 %v2696_v40  ;;  %928 = vmatprep.subr.bf16.mxu1 %v2704_v54  ;;  %v3149_v33 = vmov 0  }
  0xd9   :  { %143 = vadd.xlane.f32.xlu0 %v3307_v49  ;;  %256 = vadd.xlane.f32.xlu1 %v223_v47  ;;  %v3335_v7 = vsub.f32 %v3243_v8, %v168_v22  ;;  %v3343_v8 = vsub.f32 %v3245_v9, %v169_v32  ;;  %v2700_v47 = vld [vmem:[#allocation5 + $0xa0] ss:$16 sps:$4 sm:$0xff]  }
  0xda   :  { %v120_v4 = vpop.xlane.xlu0 %119  ;;  %v122_v26 = vpop.xlane.xlu1 %121  ;;  %v2712_v22 = vld [vmem:[#allocation5 + $0xe0] ss:$16 sps:$4 sm:$0xff]   ;;  %765 = vmatprep.mubr.bf16.mxu0 %v3149_v33  ;;  %948 = vmatprep.mubr.bf16.mxu1 %v3149_v33 }
  0xdb   :  { %v228_v43 = vmul.f32 %v3335_v7, %v3335_v7  ;;  %v170_v45 = vmul.f32 0.0078125, %v120_v4  ;;  %744 = vmatpush1.bf16.msra.mxu0 %v2700_v47  ;;  %v229_v55 = vmul.f32 %v3343_v8, %v3343_v8  ;;  %v171_v57 = vmul.f32 0.0078125, %v122_v26  ;;  %929 = vmatpush1.bf16.msra.mxu1 %v2707_v60  ;;  %v2710_v4 = vld [vmem:[#allocation5 + $0xec] ss:$16 sps:$4 sm:$0xff]  }
  0xdc   :  { %745 = vmatprep.subr.bf16.mxu0 %v2702_v53  ;;  %930 = vmatprep.subr.bf16.mxu1 %v2710_v4 }
  0xdd   :  { %145 = vadd.xlane.f32.xlu1 %v3315_v56  ;;  %258 = vadd.xlane.f32.xlu0 %v224_v52  ;;  %v3351_v9 = vsub.f32 %v3249_v10, %v170_v45  ;;  %v3359_v10 = vsub.f32 %v3251_v11, %v171_v57 }
  0xde   :  { %v124_v27 = vpop.xlane.xlu0 %123  ;;  %v126_v39 = vpop.xlane.xlu1 %125 }
  0xdf   :  { %v172_v58 = vmul.f32 0.0078125, %v124_v27  ;;  %746 = vmatpush1.bf16.msra.mxu0 %v2706_v59  ;;  %v173_v0 = vmul.f32 0.0078125, %v126_v39  ;;  %v230_v20 = vmul.f32 %v3351_v9, %v3351_v9  ;;  %931 = vmatpush1.bf16.msra.mxu1 %v2713_v23  ;;  %v231_v28 = vmul.f32 %v3359_v10, %v3359_v10 }
  0xe0   :  { %747 = vmatprep.subr.bf16.mxu0 %v2708_v3 }
  0xe1   :  { %260 = vadd.xlane.f32.xlu1 %v225_v62  ;;  %147 = vadd.xlane.f32.xlu0 %v3323_v2  ;;  %v3355_v62 = vld [vmem:[#allocation2 + $0xe0] sm:$0xff]  ;;  %v3362_v5 = vsub.f32 %v3255_v12, %v172_v58  ;;  %v3369_v26 = vsub.f32 %v3259_v13, %v173_v0 }
  0xe2   :  { %v128_v52 = vpop.xlane.xlu0 %127  ;;  %v130_v63 = vpop.xlane.xlu1 %129 }
  0xe3   :  { %748 = vmatpush1.bf16.msra.mxu0 %v2712_v22  ;;  %v175_v11 = vmul.f32 0.0078125, %v130_v63  ;;  %v232_v30 = vmul.f32 %v3362_v5, %v3362_v5 }
  0xe5   :  { %149 = vadd.xlane.f32.xlu1 %v3331_v25  ;;  %262 = vadd.xlane.f32.xlu0 %v226_v21  ;;  %v174_v21 = vmul.f32 0.0078125, %v128_v52  ;;  %v3382_v13 = vsub.f32 %v3263_v15, %v175_v11 }
  0xe6   :  { %v132_v1 = vpop.xlane.xlu0 %131  ;;  %v134_v27 = vpop.xlane.xlu1 %133 }
  0xe7   :  { %v3373_v12 = vsub.f32 %v3261_v14, %v174_v21  ;;  %v233_v14 = vmul.f32 %v3369_v26, %v3369_v26  ;;  %v177_v40 = vmul.f32 0.0078125, %v134_v27  ;;  %v235_v45 = vmul.f32 %v3382_v13, %v3382_v13 }
  0xe9   :  { %264 = vadd.xlane.f32.xlu1 %v227_v31  ;;  %151 = vadd.xlane.f32.xlu0 %v3339_v37  ;;  %v176_v31 = vmul.f32 0.0078125, %v132_v1  ;;  %v234_v39 = vmul.f32 %v3373_v12, %v3373_v12  ;;  %v3394_v15 = vsub.f32 %v3271_v17, %v177_v40 }
  0xea   :  { %v136_v32 = vpop.xlane.xlu0 %135 }
  0xeb   :  { %v3387_v34 = vsub.f32 %v3267_v16, %v176_v31  ;;  %v178_v42 = vmul.f32 0.0078125, %v136_v32  ;;  %v237_v53 = vmul.f32 %v3394_v15, %v3394_v15 }
  0xed   :  { %153 = vadd.xlane.f32.xlu1 %v3347_v50  ;;  %266 = vadd.xlane.f32.xlu0 %v228_v43  ;;  %v138_v43 = vpop.xlane.xlu1 %137  ;;  %v3397_v47 = vsub.f32 %v3273_v18, %v178_v42  ;;  %v236_v16 = vmul.f32 %v3387_v34, %v3387_v34 }
  0xee   :  { %v179_v48 = vmul.f32 0.0078125, %v138_v43 }
  0xef   :  { %v238_v54 = vmul.f32 %v3397_v47, %v3397_v47 }
  0xf0   :  { %v3402_v52 = vsub.f32 %v3277_v19, %v179_v48 }
  0xf1   :  { %268 = vadd.xlane.f32.xlu1 %v229_v55  ;;  %155 = vadd.xlane.f32.xlu0 %v3355_v62 }
  0xf2   :  { %v239_v17 = vmul.f32 %v3402_v52, %v3402_v52 }
  0xf5   :  { %157 = vadd.xlane.f32.xlu1 %v3366_v24  ;;  %270 = vadd.xlane.f32.xlu0 %v230_v20 }
  0xf9   :  { %272 = vadd.xlane.f32.xlu1 %v231_v28  ;;  %274 = vadd.xlane.f32.xlu0 %v232_v30 }
  0xfd   :  { %276 = vadd.xlane.f32.xlu1 %v233_v14  ;;  %278 = vadd.xlane.f32.xlu0 %v234_v39 }
 0x101   :  { %280 = vadd.xlane.f32.xlu1 %v235_v45  ;;  %282 = vadd.xlane.f32.xlu0 %v236_v16  ;;  %v3429_v16 = vld [vmem:[%s4513_s1] ss:$0 sm:$0xff] }
 0x105   :  { %284 = vadd.xlane.f32.xlu1 %v237_v53  ;;  %286 = vadd.xlane.f32.xlu0 %v238_v54 }
 0x109   :  { %288 = vadd.xlane.f32.xlu1 %v239_v17 }
 0x15a   :  { %v251_v18 = vpop.xlane.xlu0 %250 }
 0x15b   :  { %v310_v55 = vmul.f32 0.0078125, %v251_v18 }
 0x15d   :  { %v340_v57 = vadd.f32 1e-05, %v310_v55 }
 0x15e   :  { %v253_v58 = vpop.xlane.xlu1 %252  ;;  %v140_v59 = vpop.xlane.xlu0 %139 }
 0x15f   :  { %2746 = vrsqrt.f32 %v340_v57  ;;  %v311_v19 = vmul.f32 0.0078125, %v253_v58  ;;  %v180_v60 = vmul.f32 0.0078125, %v140_v59  ;;  %v3441_v59 = vld [vmem:[%s4514_s2] ss:$0 sm:$0xff] }
 0x161   :  { %v341_v63 = vadd.f32 1e-05, %v311_v19  ;;  %v3411_v0 = vsub.f32 %v3289_v38, %v180_v60 }
 0x162   :  { %v142_v1 = vpop.xlane.xlu1 %141  ;;  %v255_v3 = vpop.xlane.xlu0 %254 }
 0x163   :  { %2748 = vrsqrt.f32 %v341_v63  ;;  %v181_v4 = vmul.f32 0.0078125, %v142_v1  ;;  %v312_v20 = vmul.f32 0.0078125, %v255_v3  ;;  %v240_v21 = vmul.f32 %v3411_v0, %v3411_v0 }
 0x165   :  { %v3416_v22 = vsub.f32 %v3299_v44, %v181_v4  ;;  %v342_v23 = vadd.f32 1e-05, %v312_v20  ;;  %290 = vadd.xlane.f32.xlu0 %v240_v21 }
 0x166   :  { %v257_v11 = vpop.xlane.xlu1 %256  ;;  %v144_v27 = vpop.xlane.xlu0 %143 }
 0x167   :  { %2750 = vrsqrt.f32 %v342_v23  ;;  %v313_v28 = vmul.f32 0.0078125, %v257_v11  ;;  %v182_v30 = vmul.f32 0.0078125, %v144_v27  ;;  %v241_v38 = vmul.f32 %v3416_v22, %v3416_v22 }
 0x169   :  { %v2747_v31 = vpop.eup %2746  ;;  %v343_v32 = vadd.f32 1e-05, %v313_v28  ;;  %v3421_v14 = vsub.f32 %v3307_v49, %v182_v30  ;;  %292 = vadd.xlane.f32.xlu1 %v241_v38 }
 0x16a   :  { %v146_v39 = vpop.xlane.xlu1 %145  ;;  %v259_v40 = vpop.xlane.xlu0 %258  ;;  %v400_v44 = vmul.f32 %v2747_v31, %v3281_v29 }
 0x16b   :  { %2752 = vrsqrt.f32 %v343_v32  ;;  %v183_v42 = vmul.f32 0.0078125, %v146_v39  ;;  %v314_v43 = vmul.f32 0.0078125, %v259_v40  ;;  %v242_v45 = vmul.f32 %v3421_v14, %v3421_v14 }
 0x16c   :  { %v437_v18 = vmul.f32 %v3429_v16, %v400_v44 }
 0x16d   :  { %v2749_v48 = vpop.eup %2748  ;;  %v3432_v49 = vsub.f32 %v3315_v56, %v183_v42  ;;  %v344_v53 = vadd.f32 1e-05, %v314_v43  ;;  %294 = vadd.xlane.f32.xlu0 %v242_v45 }
 0x16e   :  { %v261_v54 = vpop.xlane.xlu1 %260  ;;  %v148_v17 = vpop.xlane.xlu0 %147  ;;  %v401_v29 = vmul.f32 %v2749_v48, %v3285_v35  ;;  %v474_v3 = vadd.f32 %v3441_v59, %v437_v18 }
 0x16f   :  { %2754 = vrsqrt.f32 %v344_v53  ;;  %v315_v55 = vmul.f32 0.0078125, %v261_v54  ;;  %v184_v57 = vmul.f32 0.0078125, %v148_v17  ;;  %v243_v58 = vmul.f32 %v3432_v49, %v3432_v49 }
 0x170   :  { %v438_v56 = vmul.f32 %v3429_v16, %v401_v29 }
 0x171   :  { %v2751_v19 = vpop.eup %2750  ;;  %v345_v60 = vadd.f32 1e-05, %v315_v55  ;;  %v3445_v63 = vsub.f32 %v3323_v2, %v184_v57  ;;  %296 = vadd.xlane.f32.xlu1 %v243_v58 }
 0x172   :  { %v150_v35 = vpop.xlane.xlu1 %149  ;;  %v263_v1 = vpop.xlane.xlu0 %262  ;;  %v475_v4 = vadd.f32 %v3441_v59, %v438_v56  ;;  %v402_v20 = vmul.f32 %v2751_v19, %v3287_v36 }
 0x173   :  { %2756 = vrsqrt.f32 %v345_v60  ;;  %v185_v21 = vmul.f32 0.0078125, %v150_v35  ;;  %v316_v23 = vmul.f32 0.0078125, %v263_v1  ;;  %v244_v11 = vmul.f32 %v3445_v63, %v3445_v63 }
 0x174   :  { %v504_v27 = vpack.c.bf16 %v475_v4, %v474_v3  ;;  %v439_v36 = vmul.f32 %v3429_v16, %v402_v20 }
 0x175   :  { %v2753_v28 = vpop.eup %2752  ;;  %v3453_v2 = vsub.f32 %v3331_v25, %v185_v21  ;;  %v346_v30 = vadd.f32 1e-05, %v316_v23  ;;  %298 = vadd.xlane.f32.xlu0 %v244_v11 }
 0x176   :  { %v265_v38 = vpop.xlane.xlu1 %264  ;;  %766 = vmatmul.mubr.bf16.vlgmr.msra.gmra.mrb[0].mxu0 %v504_v27  ;;  %949 = vmatmul.mubr.bf16.vlgmr.msra.gmra.mrb[0].mxu1 %v504_v27  ;;  %v152_v31 = vpop.xlane.xlu0 %151  ;;  %v403_v32 = vmul.f32 %v2753_v28, %v3295_v41  ;;  %v476_v53 = vadd.f32 %v3441_v59, %v439_v36 }
 0x177   :  { %2758 = vrsqrt.f32 %v346_v30  ;;  %v317_v39 = vmul.f32 0.0078125, %v265_v38  ;;  %v186_v40 = vmul.f32 0.0078125, %v152_v31  ;;  %v245_v44 = vmul.f32 %v3453_v2, %v3453_v2  ;;  %775 = vmatprep.mubr.bf16.mxu0 %v3149_v33  ;;  %958 = vmatprep.mubr.bf16.mxu1 %v3149_v33 }
 0x178   :  { %v440_v25 = vmul.f32 %v3429_v16, %v403_v32 }
 0x179   :  { %v2755_v42 = vpop.eup %2754  ;;  %v347_v43 = vadd.f32 1e-05, %v317_v39  ;;  %v3463_v45 = vsub.f32 %v3339_v37, %v186_v40  ;;  %300 = vadd.xlane.f32.xlu1 %v245_v44 }
 0x17a   :  { %v154_v41 = vpop.xlane.xlu1 %153  ;;  %v267_v48 = vpop.xlane.xlu0 %266  ;;  %v477_v54 = vadd.f32 %v3441_v59, %v440_v25  ;;  %v404_v17 = vmul.f32 %v2755_v42, %v3303_v46 }
 0x17b   :  { %2760 = vrsqrt.f32 %v347_v43  ;;  %v187_v29 = vmul.f32 0.0078125, %v154_v41  ;;  %v318_v18 = vmul.f32 0.0078125, %v267_v48  ;;  %v246_v55 = vmul.f32 %v3463_v45, %v3463_v45 }
 0x17c   :  { %v505_v57 = vpack.c.bf16 %v477_v54, %v476_v53  ;;  %v441_v46 = vmul.f32 %v3429_v16, %v404_v17 }
 0x17d   :  { %v2757_v58 = vpop.eup %2756  ;;  %v3471_v37 = vsub.f32 %v3347_v50, %v187_v29  ;;  %v348_v56 = vadd.f32 1e-05, %v318_v18  ;;  %302 = vadd.xlane.f32.xlu0 %v246_v55 }
 0x17e   :  { %v269_v19 = vpop.xlane.xlu1 %268  ;;  %776 = vmatmul.mubr.bf16.gmra.mrb[4].mxu0 %v505_v57  ;;  %959 = vmatmul.mubr.bf16.gmra.mrb[4].mxu1 %v505_v57  ;;  %v156_v60 = vpop.xlane.xlu0 %155  ;;  %v405_v35 = vmul.f32 %v2757_v58, %v3311_v51  ;;  %v478_v27 = vadd.f32 %v3441_v59, %v441_v46 }
 0x17f   :  { %2762 = vrsqrt.f32 %v348_v56  ;;  %v319_v1 = vmul.f32 0.0078125, %v269_v19  ;;  %v188_v3 = vmul.f32 0.0078125, %v156_v60  ;;  %v247_v4 = vmul.f32 %v3471_v37, %v3471_v37  ;;  %785 = vmatprep.mubr.bf16.mxu0 %v3149_v33  ;;  %968 = vmatprep.mubr.bf16.mxu1 %v3149_v33 }
 0x180   :  { %v442_v50 = vmul.f32 %v3429_v16, %v405_v35 }
 0x181   :  { %v2759_v20 = vpop.eup %2758  ;;  %v349_v21 = vadd.f32 1e-05, %v319_v1  ;;  %v3481_v23 = vsub.f32 %v3355_v62, %v188_v3  ;;  %304 = vadd.xlane.f32.xlu1 %v247_v4 }
 0x182   :  { %v158_v51 = vpop.xlane.xlu1 %157  ;;  %v271_v11 = vpop.xlane.xlu0 %270  ;;  %v479_v28 = vadd.f32 %v3441_v59, %v442_v50  ;;  %v406_v30 = vmul.f32 %v2759_v20, %v3319_v61 }
 0x183   :  { %2764 = vrsqrt.f32 %v349_v21  ;;  %v189_v38 = vmul.f32 0.0078125, %v158_v51  ;;  %v320_v31 = vmul.f32 0.0078125, %v271_v11  ;;  %v248_v32 = vmul.f32 %v3481_v23, %v3481_v23 }
 0x184   :  { %v506_v36 = vpack.c.bf16 %v479_v28, %v478_v27  ;;  %v443_v61 = vmul.f32 %v3429_v16, %v406_v30 }
 0x185   :  { %v2761_v39 = vpop.eup %2760  ;;  %v3489_v62 = vsub.f32 %v3366_v24, %v189_v38  ;;  %v350_v40 = vadd.f32 1e-05, %v320_v31  ;;  %306 = vadd.xlane.f32.xlu0 %v248_v32 }
 0x186   :  { %v273_v44 = vpop.xlane.xlu1 %272  ;;  %786 = vmatmul.mubr.bf16.gmra.mrb[8].mxu0 %v506_v36  ;;  %969 = vmatmul.mubr.bf16.gmra.mrb[8].mxu1 %v506_v36  ;;  %v275_v25 = vpop.xlane.xlu0 %274  ;;  %v407_v42 = vmul.f32 %v2761_v39, %v3327_v6  ;;  %v480_v18 = vadd.f32 %v3441_v59, %v443_v61 }
 0x187   :  { %2766 = vrsqrt.f32 %v350_v40  ;;  %v321_v43 = vmul.f32 0.0078125, %v273_v44  ;;  %v322_v41 = vmul.f32 0.0078125, %v275_v25  ;;  %v249_v48 = vmul.f32 %v3489_v62, %v3489_v62  ;;  %795 = vmatprep.mubr.bf16.mxu0 %v3149_v33  ;;  %978 = vmatprep.mubr.bf16.mxu1 %v3149_v33 }
 0x188   :  { %v444_v24 = vmul.f32 %v3429_v16, %v407_v42 }
 0x189   :  { %v2763_v53 = vpop.eup %2762  ;;  %v351_v54 = vadd.f32 1e-05, %v321_v43  ;;  %v352_v17 = vadd.f32 1e-05, %v322_v41  ;;  %308 = vadd.xlane.f32.xlu1 %v249_v48 }
 0x18a   :  { %v277_v29 = vpop.xlane.xlu1 %276  ;;  %v279_v6 = vpop.xlane.xlu0 %278  ;;  %v481_v55 = vadd.f32 %v3441_v59, %v444_v24  ;;  %v408_v57 = vmul.f32 %v2763_v53, %v3335_v7 }
 0x18b   :  { %2768 = vrsqrt.f32 %v351_v54  ;;  %v323_v58 = vmul.f32 0.0078125, %v277_v29  ;;  %v324_v35 = vmul.f32 0.0078125, %v279_v6 }
 0x18c   :  { %v507_v56 = vpack.c.bf16 %v481_v55, %v480_v18  ;;  %2770 = vrsqrt.f32 %v352_v17  ;;  %v445_v3 = vmul.f32 %v3429_v16, %v408_v57 }
 0x18d   :  { %v2765_v19 = vpop.eup %2764  ;;  %v353_v60 = vadd.f32 1e-05, %v323_v58  ;;  %v354_v20 = vadd.f32 1e-05, %v324_v35 }
 0x18e   :  { %v281_v46 = vpop.xlane.xlu1 %280  ;;  %796 = vmatmul.mubr.bf16.gmra.mrb[12].mxu0 %v507_v56  ;;  %979 = vmatmul.mubr.bf16.gmra.mrb[12].mxu1 %v507_v56  ;;  %v409_v1 = vmul.f32 %v2765_v19, %v3343_v8  ;;  %v283_v51 = vpop.xlane.xlu0 %282  ;;  %v482_v27 = vadd.f32 %v3441_v59, %v445_v3 }
 0x18f   :  { %2772 = vrsqrt.f32 %v353_v60  ;;  %v325_v4 = vmul.f32 0.0078125, %v281_v46  ;;  %805 = vmatprep.mubr.bf16.mxu0 %v3149_v33  ;;  %988 = vmatprep.mubr.bf16.mxu1 %v3149_v33  ;;  %v326_v32 = vmul.f32 0.0078125, %v283_v51 }
 0x190   :  { %v446_v7 = vmul.f32 %v3429_v16, %v409_v1 }
 0x191   :  { %v2767_v50 = vpop.eup %2766  ;;  %v355_v21 = vadd.f32 1e-05, %v325_v4  ;;  %v356_v61 = vadd.f32 1e-05, %v326_v32  ;;  %v2719_v32 = vld [vmem:[#allocation7 + $0x8] sm:$0xff]  }
 0x192   :  { %v285_v11 = vpop.xlane.xlu1 %284  ;;  %v483_v28 = vadd.f32 %v3441_v59, %v446_v7  ;;  %v410_v8 = vmul.f32 %v2767_v50, %v3351_v9  ;;  %v287_v43 = vpop.xlane.xlu0 %286 }
 0x193   :  { %2774 = vrsqrt.f32 %v355_v21  ;;  %v327_v30 = vmul.f32 0.0078125, %v285_v11  ;;  %v328_v6 = vmul.f32 0.0078125, %v287_v43  ;;  %v2714_v11 = vld [vmem:[#allocation7 + $0x40] sm:$0xff]   ;;  %v2723_v43 = vld [vmem:[#allocation7 + $0xd0] sm:$0xff]  }
 0x194   :  { %v508_v38 = vpack.c.bf16 %v483_v28, %v482_v27  ;;  %2776 = vrsqrt.f32 %v354_v20  ;;  %v447_v39 = vmul.f32 %v3429_v16, %v410_v8  ;;  %v2715_v27 = vld [vmem:[#allocation7] sm:$0xff]   ;;  %2443 = vmatprep.subr.bf16.mxu0 %v2714_v11 }
 0x195   :  { %v2769_v31 = vpop.eup %2768  ;;  %v357_v44 = vadd.f32 1e-05, %v327_v30  ;;  %v358_v58 = vadd.f32 1e-05, %v328_v6  ;;  %v2716_v28 = vld [vmem:[#allocation7 + $0xc0] sm:$0xff]   ;;  %v2718_v30 = vld [vmem:[#allocation7 + $0x48] sm:$0xff]   ;;  %2444 = vmatpush3.bf16.msra.mxu0 %v2715_v27 }
 0x196   :  { %806 = vmatmul.mubr.bf16.gmra.mrb[16].mxu0 %v508_v38  ;;  %989 = vmatmul.mubr.bf16.gmra.mrb[16].mxu1 %v508_v38  ;;  %v411_v36 = vmul.f32 %v2769_v31, %v3359_v10  ;;  %v2771_v40 = vpop.eup %2770  ;;  %v289_v25 = vpop.xlane.xlu1 %288  ;;  %v484_v41 = vadd.f32 %v3441_v59, %v447_v39  ;;  %v2720_v31 = vld [vmem:[#allocation7 + $0xc8] sm:$0xff]   ;;  %v2732_v6 = vld [vmem:[#allocation7 + $0x20] sm:$0xff]  }
 0x197   :  { %815 = vmatprep.mubr.bf16.mxu0 %v3149_v33  ;;  %998 = vmatprep.mubr.bf16.mxu1 %v3149_v33  ;;  %v412_v10 = vmul.f32 %v2771_v40, %v3362_v5  ;;  %2778 = vrsqrt.f32 %v357_v44  ;;  %v329_v53 = vmul.f32 0.0078125, %v289_v25 }
 0x198   :  { %v448_v9 = vmul.f32 %v3429_v16, %v411_v36  ;;  %2780 = vrsqrt.f32 %v356_v61  ;;  %2549 = vmatprep.subr.bf16.mxu1 %v2716_v28  ;;  %v2721_v36 = vld [vmem:[#allocation7 + $0x88] sm:$0xff]   ;;  %2445 = vmatprep.subr.bf16.mxu0 %v2718_v30  ;;  %v2722_v61 = vld [vmem:[#allocation7 + $0x50] sm:$0xff]  }
 0x199   :  { %v2773_v42 = vpop.eup %2772  ;;  %v449_v18 = vmul.f32 %v3429_v16, %v412_v10  ;;  %v359_v57 = vadd.f32 1e-05, %v329_v53  ;;  %2446 = vmatpush3.bf16.msra.mxu0 %v2719_v32  ;;  %v2726_v10 = vld [vmem:[#allocation7 + $0x58] sm:$0xff]  }
 0x19a   :  { %v485_v48 = vadd.f32 %v3441_v59, %v448_v9  ;;  %v413_v24 = vmul.f32 %v2773_v42, %v3369_v26  ;;  %2447 = vmatprep.subr.bf16.mxu0 %v2722_v61  ;;  %v2728_v53 = vld [vmem:[#allocation7 + $0x18] sm:$0xff]  }
 0x19b   :  { %v486_v56 = vadd.f32 %v3441_v59, %v449_v18  ;;  %2782 = vrsqrt.f32 %v359_v57  ;;  %v2733_v18 = vld [vmem:[#allocation7 + $0xa0] sm:$0xff]   ;;  %v2735_v57 = vld [vmem:[#allocation7 + $0xe8] sm:$0xff]  }
 0x19c   :  { %v509_v54 = vpack.c.bf16 %v485_v48, %v484_v41  ;;  %v450_v17 = vmul.f32 %v3429_v16, %v413_v24  ;;  %2784 = vrsqrt.f32 %v358_v58  ;;  %v2724_v41 = vld [vmem:[#allocation7 + $0x10] sm:$0xff]   ;;  %v2727_v24 = vld [vmem:[#allocation7 + $0xd8] sm:$0xff]  }
 0x19d   :  { %v2775_v29 = vpop.eup %2774  ;;  %v2725_v48 = vld [vmem:[#allocation7 + $0x90] sm:$0xff]   ;;  %2448 = vmatpush3.bf16.msra.mxu0 %v2724_v41 }
 0x19e   :  { %816 = vmatmul.mubr.bf16.gmra.mrb[20].mxu0 %v509_v54  ;;  %999 = vmatmul.mubr.bf16.gmra.mrb[20].mxu1 %v509_v54  ;;  %v2777_v55 = vpop.eup %2776  ;;  %v487_v5 = vadd.f32 %v3441_v59, %v450_v17  ;;  %v415_v26 = vmul.f32 %v2775_v29, %v3382_v13  ;;  %v2729_v54 = vld [vmem:[#allocation7 + $0x98] sm:$0xff]   ;;  %v2730_v17 = vld [vmem:[#allocation7 + $0x60] sm:$0xff]   ;;  %v2738_v58 = vld [vmem:[#allocation7 + $0x70] sm:$0xff]  }
 0x19f   :  { %825 = vmatprep.mubr.bf16.mxu0 %v3149_v33  ;;  %1008 = vmatprep.mubr.bf16.mxu1 %v3149_v33  ;;  %v414_v19 = vmul.f32 %v2777_v55, %v3373_v12  ;;  %v2731_v29 = vld [vmem:[#allocation7 + $0xe0] sm:$0xff]   ;;  %v2734_v55 = vld [vmem:[#allocation7 + $0x68] sm:$0xff]  }
 0x1a0   :  { %v510_v60 = vpack.c.bf16 %v487_v5, %v486_v56  ;;  %v452_v35 = vmul.f32 %v3429_v16, %v415_v26  ;;  %2449 = vmatprep.subr.bf16.mxu0 %v2726_v10  ;;  %v2736_v5 = vld [vmem:[#allocation7 + $0x28] sm:$0xff]   ;;  %v2739_v56 = vld [vmem:[#allocation7 + $0xf0] sm:$0xff]  }
 0x1a1   :  { %v2779_v46 = vpop.eup %2778  ;;  %v451_v1 = vmul.f32 %v3429_v16, %v414_v19  ;;  %2450 = vmatpush3.bf16.msra.mxu0 %v2728_v53  ;;  %v2737_v26 = vld [vmem:[#allocation7 + $0xa8] sm:$0xff]   ;;  %v2740_v19 = vld [vmem:[#allocation7 + $0x30] sm:$0xff]  }
 0x1a2   :  { %v2781_v3 = vpop.eup %2780  ;;  %v489_v13 = vadd.f32 %v3441_v59, %v452_v35  ;;  %v417_v4 = vmul.f32 %v2779_v46, %v3394_v15  ;;  %v2717_v15 = vld [vmem:[#allocation7 + $0x80] sm:$0xff]   ;;  %2451 = vmatprep.subr.bf16.mxu0 %v2730_v17  ;;  %v2742_v35 = vld [vmem:[#allocation7 + $0x78] sm:$0xff]  }
 0x1a3   :  { %v488_v12 = vadd.f32 %v3441_v59, %v451_v1  ;;  %v416_v7 = vmul.f32 %v2781_v3, %v3387_v34  ;;  %2550 = vmatpush3.bf16.msra.mxu1 %v2717_v15  ;;  %v2743_v46 = vld [vmem:[#allocation7 + $0xf8] sm:$0xff]  }
 0x1a4   :  { %v454_v20 = vmul.f32 %v3429_v16, %v417_v4  ;;  %2551 = vmatprep.subr.bf16.mxu1 %v2720_v31  ;;  %v2744_v1 = vld [vmem:[#allocation7 + $0x38] sm:$0xff]  }
 0x1a5   :  { %v511_v50 = vpack.c.bf16 %v489_v13, %v488_v12  ;;  %v2783_v21 = vpop.eup %2782  ;;  %v453_v51 = vmul.f32 %v3429_v16, %v416_v7  ;;  %2452 = vmatpush3.bf16.msra.mxu0 %v2732_v6  ;;  %v2745_v3 = vld [vmem:[#allocation7 + $0xb8] sm:$0xff]  }
 0x1a6   :  { %826 = vmatmul.mubr.bf16.gmra.mrb[24].mxu0 %v510_v60  ;;  %1009 = vmatmul.mubr.bf16.gmra.mrb[24].mxu1 %v510_v60  ;;  %v2785_v8 = vpop.eup %2784  ;;  %v491_v34 = vadd.f32 %v3441_v59, %v454_v20  ;;  %v419_v38 = vmul.f32 %v2783_v21, %v3402_v52  ;;  %v2741_v60 = vld [vmem:[#allocation7 + $0xb0] sm:$0xff]  }
 0x1a7   :  { %835 = vmatprep.mubr.bf16.mxu0 %v3149_v33  ;;  %1018 = vmatprep.mubr.bf16.mxu1 %v3149_v33  ;;  %v490_v39 = vadd.f32 %v3441_v59, %v453_v51  ;;  %v418_v40 = vmul.f32 %v2785_v8, %v3397_v47 }
 0x1a8   :  { %v456_v25 = vmul.f32 %v3429_v16, %v419_v38  ;;  %2552 = vmatpush3.bf16.msra.mxu1 %v2721_v36  ;;  %2453 = vmatprep.subr.bf16.mxu0 %v2734_v55 }
 0x1a9   :  { %v512_v44 = vpack.c.bf16 %v491_v34, %v490_v39  ;;  %v455_v52 = vmul.f32 %v3429_v16, %v418_v40  ;;  %2553 = vmatprep.subr.bf16.mxu1 %v2723_v43  ;;  %2454 = vmatpush3.bf16.msra.mxu0 %v2736_v5 }
 0x1aa   :  { %v493_v9 = vadd.f32 %v3441_v59, %v456_v25  ;;  %2455 = vmatprep.subr.bf16.mxu0 %v2738_v58 }
 0x1ab   :  { %v492_v42 = vadd.f32 %v3441_v59, %v455_v52 }
 0x1ac   :  { %2554 = vmatpush3.bf16.msra.mxu1 %v2725_v48 }
 0x1ad   :  { %v513_v47 = vpack.c.bf16 %v493_v9, %v492_v42  ;;  %2555 = vmatprep.subr.bf16.mxu1 %v2727_v24  ;;  %2456 = vmatpush3.bf16.msra.mxu0 %v2740_v19 }
 0x1ae   :  { %836 = vmatmul.mubr.bf16.gmra.mrb[28].mxu0 %v511_v50  ;;  %1019 = vmatmul.mubr.bf16.gmra.mrb[28].mxu1 %v511_v50 }
 0x1af   :  { %845 = vmatprep.mubr.bf16.mxu0 %v3149_v33  ;;  %1028 = vmatprep.mubr.bf16.mxu1 %v3149_v33 }
 0x1b0   :  { %2556 = vmatpush3.bf16.msra.mxu1 %v2729_v54  ;;  %2457 = vmatprep.subr.bf16.mxu0 %v2742_v35 }
 0x1b1   :  { %2557 = vmatprep.subr.bf16.mxu1 %v2731_v29  ;;  %2458 = vmatpush3.bf16.msra.mxu0 %v2744_v1 }
 0x1b4   :  { %2558 = vmatpush3.bf16.msra.mxu1 %v2733_v18 }
 0x1b5   :  { %2559 = vmatprep.subr.bf16.mxu1 %v2735_v57 }
 0x1b6   :  { %846 = vmatmul.mubr.bf16.gmra.mrb[32].mxu0 %v512_v44  ;;  %1029 = vmatmul.mubr.bf16.gmra.mrb[32].mxu1 %v512_v44 }
 0x1b7   :  { %855 = vmatprep.mubr.bf16.mxu0 %v3149_v33  ;;  %1038 = vmatprep.mubr.bf16.mxu1 %v3149_v33 }
 0x1b8   :  { %2560 = vmatpush3.bf16.msra.mxu1 %v2737_v26 }
 0x1b9   :  { %2561 = vmatprep.subr.bf16.mxu1 %v2739_v56 }
 0x1bc   :  { %2562 = vmatpush3.bf16.msra.mxu1 %v2741_v60 }
 0x1bd   :  { %2563 = vmatprep.subr.bf16.mxu1 %v2743_v46 }
 0x1be   :  { %856 = vmatmul.mubr.bf16.gmra.mrb[36].mxu0 %v513_v47  ;;  %1039 = vmatmul.mubr.bf16.gmra.mrb[36].mxu1 %v513_v47 }
 0x1bf   :  { %865 = vmatprep.mubr.bf16.mxu0 %v3149_v33  ;;  %1048 = vmatprep.mubr.bf16.mxu1 %v3149_v33 }
 0x1c0   :  { %2564 = vmatpush3.bf16.msra.mxu1 %v2745_v3 }
 0x1f2   :  { %v291_v13 = vpop.xlane.xlu0 %290 }
 0x1f3   :  { %v330_v4 = vmul.f32 0.0078125, %v291_v13 }
 0x1f5   :  { %v360_v12 = vadd.f32 1e-05, %v330_v4 }
 0x1f6   :  { %v293_v7 = vpop.xlane.xlu1 %292 }
 0x1f7   :  { %2786 = vrsqrt.f32 %v360_v12  ;;  %v331_v50 = vmul.f32 0.0078125, %v293_v7 }
 0x1f9   :  { %v361_v20 = vadd.f32 1e-05, %v331_v50 }
 0x1fa   :  { %v295_v21 = vpop.xlane.xlu0 %294 }
 0x1fb   :  { %2788 = vrsqrt.f32 %v361_v20  ;;  %v332_v51 = vmul.f32 0.0078125, %v295_v21 }
 0x1fd   :  { %v362_v11 = vadd.f32 1e-05, %v332_v51 }
 0x1fe   :  { %v297_v27 = vpop.xlane.xlu1 %296 }
 0x1ff   :  { %2790 = vrsqrt.f32 %v362_v11  ;;  %v333_v28 = vmul.f32 0.0078125, %v297_v27 }
 0x201   :  { %v2787_v8 = vpop.eup %2786  ;;  %v363_v15 = vadd.f32 1e-05, %v333_v28 }
 0x202   :  { %v299_v30 = vpop.xlane.xlu0 %298  ;;  %v420_v34 = vmul.f32 %v2787_v8, %v3411_v0 }
 0x203   :  { %2792 = vrsqrt.f32 %v363_v15  ;;  %v334_v38 = vmul.f32 0.0078125, %v299_v30 }
 0x204   :  { %v457_v40 = vmul.f32 %v3429_v16, %v420_v34 }
 0x205   :  { %v2789_v31 = vpop.eup %2788  ;;  %v364_v32 = vadd.f32 1e-05, %v334_v38 }
 0x206   :  { %v301_v36 = vpop.xlane.xlu1 %300  ;;  %v421_v39 = vmul.f32 %v2789_v31, %v3416_v22  ;;  %v494_v47 = vadd.f32 %v3441_v59, %v457_v40 }
 0x207   :  { %2794 = vrsqrt.f32 %v364_v32  ;;  %v335_v44 = vmul.f32 0.0078125, %v301_v36 }
 0x208   :  { %v458_v25 = vmul.f32 %v3429_v16, %v421_v39 }
 0x209   :  { %v2791_v52 = vpop.eup %2790  ;;  %v365_v9 = vadd.f32 1e-05, %v335_v44 }
 0x20a   :  { %v303_v42 = vpop.xlane.xlu0 %302  ;;  %v495_v0 = vadd.f32 %v3441_v59, %v458_v25  ;;  %v422_v61 = vmul.f32 %v2791_v52, %v3421_v14 }
 0x20b   :  { %2796 = vrsqrt.f32 %v365_v9  ;;  %v336_v43 = vmul.f32 0.0078125, %v303_v42 }
 0x20c   :  { %v514_v41 = vpack.c.bf16 %v495_v0, %v494_v47  ;;  %v459_v53 = vmul.f32 %v3429_v16, %v422_v61 }
 0x20d   :  { %v2793_v48 = vpop.eup %2792  ;;  %v366_v22 = vadd.f32 1e-05, %v336_v43 }
 0x20e   :  { %v305_v10 = vpop.xlane.xlu1 %304  ;;  %866 = vmatmul.mubr.bf16.gmra.mrb[40].mxu0 %v514_v41  ;;  %1049 = vmatmul.mubr.bf16.gmra.mrb[40].mxu1 %v514_v41  ;;  %v423_v24 = vmul.f32 %v2793_v48, %v3432_v49  ;;  %v496_v18 = vadd.f32 %v3441_v59, %v459_v53 }
 0x20f   :  { %2798 = vrsqrt.f32 %v366_v22  ;;  %v337_v54 = vmul.f32 0.0078125, %v305_v10  ;;  %875 = vmatprep.mubr.bf16.mxu0 %v3149_v33  ;;  %1058 = vmatprep.mubr.bf16.mxu1 %v3149_v33 }
 0x210   :  { %v460_v14 = vmul.f32 %v3429_v16, %v423_v24 }
 0x211   :  { %v2795_v17 = vpop.eup %2794  ;;  %v367_v29 = vadd.f32 1e-05, %v337_v54 }
 0x212   :  { %v307_v6 = vpop.xlane.xlu0 %306  ;;  %v497_v55 = vadd.f32 %v3441_v59, %v460_v14  ;;  %v424_v57 = vmul.f32 %v2795_v17, %v3445_v63 }
 0x213   :  { %2800 = vrsqrt.f32 %v367_v29  ;;  %v338_v49 = vmul.f32 0.0078125, %v307_v6 }
 0x214   :  { %v515_v5 = vpack.c.bf16 %v497_v55, %v496_v18  ;;  %v461_v60 = vmul.f32 %v3429_v16, %v424_v57 }
 0x215   :  { %v2797_v26 = vpop.eup %2796  ;;  %v368_v58 = vadd.f32 1e-05, %v338_v49 }
 0x216   :  { %v309_v56 = vpop.xlane.xlu1 %308  ;;  %876 = vmatmul.mubr.bf16.gmra.mrb[44].mxu0 %v515_v5  ;;  %1059 = vmatmul.mubr.bf16.gmra.mrb[44].mxu1 %v515_v5  ;;  %v425_v19 = vmul.f32 %v2797_v26, %v3453_v2  ;;  %v498_v3 = vadd.f32 %v3441_v59, %v461_v60 }
 0x217   :  { %2802 = vrsqrt.f32 %v368_v58  ;;  %v339_v35 = vmul.f32 0.0078125, %v309_v56  ;;  %885 = vmatprep.mubr.bf16.mxu0 %v3149_v33  ;;  %1068 = vmatprep.mubr.bf16.mxu1 %v3149_v33 }
 0x218   :  { %v462_v63 = vmul.f32 %v3429_v16, %v425_v19 }
 0x219   :  { %v2799_v46 = vpop.eup %2798  ;;  %v369_v1 = vadd.f32 1e-05, %v339_v35 }
 0x21a   :  { %v499_v13 = vadd.f32 %v3441_v59, %v462_v63  ;;  %v426_v4 = vmul.f32 %v2799_v46, %v3463_v45 }
 0x21b   :  { %2804 = vrsqrt.f32 %v369_v1 }
 0x21c   :  { %v516_v2 = vpack.c.bf16 %v499_v13, %v498_v3  ;;  %v463_v50 = vmul.f32 %v3429_v16, %v426_v4 }
 0x21d   :  { %v2801_v12 = vpop.eup %2800 }
 0x21e   :  { %886 = vmatmul.mubr.bf16.gmra.mrb[48].mxu0 %v516_v2  ;;  %1069 = vmatmul.mubr.bf16.gmra.mrb[48].mxu1 %v516_v2  ;;  %v427_v7 = vmul.f32 %v2801_v12, %v3471_v37  ;;  %v500_v51 = vadd.f32 %v3441_v59, %v463_v50 }
 0x21f   :  { %895 = vmatprep.mubr.bf16.mxu0 %v3149_v33  ;;  %1078 = vmatprep.mubr.bf16.mxu1 %v3149_v33 }
 0x220   :  { %v464_v20 = vmul.f32 %v3429_v16, %v427_v7 }
 0x221   :  { %v2803_v21 = vpop.eup %2802 }
 0x222   :  { %v501_v45 = vadd.f32 %v3441_v59, %v464_v20  ;;  %v428_v11 = vmul.f32 %v2803_v21, %v3481_v23  ;;  %v553_v23 = vlaneseq }
 0x224   :  { %v517_v27 = vpack.c.bf16 %v501_v45, %v500_v51  ;;  %v465_v8 = vmul.f32 %v3429_v16, %v428_v11  ;;  %v554_v31 = vshrl.u32 %v553_v23, 7 }
 0x225   :  { %v2805_v28 = vpop.eup %2804 }
 0x226   :  { %896 = vmatmul.mubr.bf16.gmra.mrb[52].mxu0 %v517_v27  ;;  %1079 = vmatmul.mubr.bf16.gmra.mrb[52].mxu1 %v517_v27  ;;  %v429_v37 = vmul.f32 %v2805_v28, %v3489_v62  ;;  %v502_v30 = vadd.f32 %v3441_v59, %v465_v8  ;;  %v555_v32 = vsub.s32 0, %v554_v31  ;;  %v563_v36 = vsub.s32 2, %v554_v31  ;;  %v551_v62 = vld [vmem:[%s4516_s4] sm:$0xf] }
 0x227   :  { %905 = vmatprep.mubr.bf16.mxu0 %v3149_v33  ;;  %1088 = vmatprep.mubr.bf16.mxu1 %v3149_v33  ;;  %v559_v39 = vsub.s32 1, %v554_v31  ;;  %v567_v40 = vsub.s32 3, %v554_v31 }
 0x228   :  { %v466_v15 = vmul.f32 %v3429_v16, %v429_v37  ;;  %v3591_v33 = vrot.slane %v551_v62, %v555_v32  ;;  %v3593_v16 = vrot.slane %v551_v62, %v563_v36 }
 0x229   :  { %v3595_v44 = vrot.slane %v551_v62, %v559_v39 }
 0x22a   :  { %v503_v34 = vadd.f32 %v3441_v59, %v466_v15  ;;  %v3597_v59 = vrot.slane %v551_v62, %v567_v40 }
 0x22c   :  { %v518_v38 = vpack.c.bf16 %v503_v34, %v502_v30 }
 0x22e   :  { %906 = vmatmul.mubr.bf16.gmra.mrb[56].mxu0 %v518_v38  ;;  %1089 = vmatmul.mubr.bf16.gmra.mrb[56].mxu1 %v518_v38 }
 0x249   :  { %v767_v25 = vpop.f32.mrb[0].mxu0  ;;  %v950_v52 = vpop.f32.mrb[0].mxu1 }
 0x24a   :  { %v768_v9 = vadd.f32 %v767_v25, %v3591_v33  ;;  %v951_v42 = vadd.f32 %v950_v52, %v3593_v16  ;;  %v769_v47 = vpop.f32.mrb[1].mxu0  ;;  %v952_v0 = vpop.f32.mrb[1].mxu1 }
 0x24b   :  { %v770_v61 = vadd.f32 %v769_v47, %v3595_v44  ;;  %v953_v43 = vadd.f32 %v952_v0, %v3597_v59  ;;  %v771_v41 = vpop.f32.mrb[2].mxu0  ;;  %v954_v48 = vpop.f32.mrb[2].mxu1 }
 0x24c   :  { %v1219_v22 = vmul.f32 0.70710677, %v768_v9  ;;  %v1221_v10 = vmul.f32 0.70710677, %v951_v42  ;;  %v772_v54 = vadd.f32 %v771_v41, %v3591_v33  ;;  %v955_v14 = vadd.f32 %v954_v48, %v3593_v16  ;;  %v773_v17 = vpop.f32.mrb[3].mxu0  ;;  %v956_v29 = vpop.f32.mrb[3].mxu1 }
 0x24d   :  { %v1220_v24 = vmul.f32 0.70710677, %v770_v61  ;;  %v1222_v53 = vmul.f32 0.70710677, %v953_v43  ;;  %v774_v6 = vadd.f32 %v773_v17, %v3595_v44  ;;  %v957_v18 = vadd.f32 %v956_v29, %v3597_v59 }
 0x24e   :  { %2806 = verf.f32 %v1219_v22  ;;  %v1223_v55 = vmul.f32 0.70710677, %v772_v54  ;;  %v1225_v57 = vmul.f32 0.70710677, %v955_v14  ;;  %v1099_v7 = vmul.f32 0.5, %v768_v9 }
 0x24f   :  { %2808 = verf.f32 %v1221_v10  ;;  %v1224_v49 = vmul.f32 0.70710677, %v774_v6  ;;  %v1226_v26 = vmul.f32 0.70710677, %v957_v18  ;;  %v1101_v27 = vmul.f32 0.5, %v951_v42 }
 0x250   :  { %2810 = verf.f32 %v1220_v24  ;;  %v1100_v28 = vmul.f32 0.5, %v770_v61  ;;  %v3614_v37 = vmul.f32 0.5, %v953_v43  ;;  %v1103_v8 = vmul.f32 0.5, %v772_v54 }
 0x251   :  { %2812 = verf.f32 %v1222_v53  ;;  %v777_v5 = vpop.f32.mrb[4].mxu0  ;;  %v960_v56 = vpop.f32.mrb[4].mxu1  ;;  %v1105_v34 = vmul.f32 0.5, %v955_v14  ;;  %v3616_v36 = vmul.f32 0.5, %v774_v6  ;;  %v3618_v62 = vmul.f32 0.5, %v957_v18 }
 0x252   :  { %2814 = verf.f32 %v1223_v55  ;;  %v778_v58 = vadd.f32 %v777_v5, %v3591_v33  ;;  %v779_v19 = vpop.f32.mrb[5].mxu0  ;;  %v961_v60 = vadd.f32 %v960_v56, %v3593_v16  ;;  %v962_v63 = vpop.f32.mrb[5].mxu1 }
 0x253   :  { %2816 = verf.f32 %v1225_v57  ;;  %v780_v35 = vadd.f32 %v779_v19, %v3595_v44  ;;  %v781_v46 = vpop.f32.mrb[6].mxu0  ;;  %v963_v3 = vadd.f32 %v962_v63, %v3597_v59  ;;  %v964_v13 = vpop.f32.mrb[6].mxu1 }
 0x254   :  { %2818 = verf.f32 %v1224_v49  ;;  %v1227_v1 = vmul.f32 0.70710677, %v778_v58  ;;  %v783_v4 = vpop.f32.mrb[7].mxu0  ;;  %v1229_v2 = vmul.f32 0.70710677, %v961_v60  ;;  %v966_v12 = vpop.f32.mrb[7].mxu1  ;;  %v782_v21 = vadd.f32 %v781_v46, %v3591_v33 }
 0x255   :  { %2820 = verf.f32 %v1226_v26  ;;  %v1228_v50 = vmul.f32 0.70710677, %v780_v35  ;;  %v1230_v20 = vmul.f32 0.70710677, %v963_v3  ;;  %v965_v51 = vadd.f32 %v964_v13, %v3593_v16 }
 0x256   :  { %2822 = verf.f32 %v1227_v1  ;;  %v784_v45 = vadd.f32 %v783_v4, %v3595_v44  ;;  %v1231_v38 = vmul.f32 0.70710677, %v782_v21  ;;  %v967_v40 = vadd.f32 %v966_v12, %v3597_v59 }
 0x257   :  { %2824 = verf.f32 %v1229_v2  ;;  %v1233_v39 = vmul.f32 0.70710677, %v965_v51  ;;  %v3621_v42 = vmul.f32 0.5, %v778_v58  ;;  %v3623_v41 = vmul.f32 0.5, %v961_v60 }
 0x258   :  { %v2807_v11 = vpop.eup %2806  ;;  %2826 = verf.f32 %v1228_v50  ;;  %v1232_v47 = vmul.f32 0.70710677, %v784_v45  ;;  %v3625_v48 = vmul.f32 0.5, %v780_v35  ;;  %v3627_v22 = vmul.f32 0.5, %v963_v3 }
 0x259   :  { %v2809_v15 = vpop.eup %2808  ;;  %v1459_v30 = vadd.f32 1.0, %v2807_v11  ;;  %v787_v23 = vpop.f32.mrb[8].mxu0  ;;  %2828 = verf.f32 %v1230_v20  ;;  %v3633_v29 = vmul.f32 0.5, %v782_v21  ;;  %v1234_v57 = vmul.f32 0.70710677, %v967_v40 }
 0x25a   :  { %v970_v31 = vpop.f32.mrb[8].mxu1  ;;  %v2811_v32 = vpop.eup %2810  ;;  %v1461_v9 = vadd.f32 1.0, %v2809_v15  ;;  %2830 = verf.f32 %v1231_v38  ;;  %v788_v49 = vadd.f32 %v787_v23, %v3591_v33  ;;  %v3648_v13 = vmul.f32 0.5, %v965_v51 }
 0x25b   :  { %v789_v25 = vpop.f32.mrb[9].mxu0  ;;  %v2813_v52 = vpop.eup %2812  ;;  %v3631_v54 = vmul.f32 %v1459_v30, %v1099_v7  ;;  %v1460_v14 = vadd.f32 1.0, %v2811_v32  ;;  %2832 = verf.f32 %v1233_v39  ;;  %v971_v56 = vadd.f32 %v970_v31, %v3593_v16 }
 0x25c   :  { %v972_v0 = vpop.f32.mrb[9].mxu1  ;;  %v791_v61 = vpop.f32.mrb[10].mxu0  ;;  %v3638_v26 = vmul.f32 %v1461_v9, %v1101_v27  ;;  %2834 = verf.f32 %v1232_v47  ;;  %v1462_v60 = vadd.f32 1.0, %v2813_v52  ;;  %v1235_v63 = vmul.f32 0.70710677, %v788_v49 }
 0x25d   :  { %v2815_v43 = vpop.eup %2814  ;;  %v974_v10 = vpop.f32.mrb[10].mxu1  ;;  %v790_v46 = vadd.f32 %v789_v25, %v3595_v44  ;;  %v3650_v4 = vmul.f32 0.5, %v784_v45  ;;  %v3652_v2 = vmul.f32 0.5, %v967_v40  ;;  %v3656_v50 = vmul.f32 %v1460_v14, %v1100_v28 }
 0x25e   :  { %v3629_v24 = vpop.f32.mrb[11].mxu0  ;;  %v2817_v53 = vpop.eup %2816  ;;  %v1463_v17 = vadd.f32 1.0, %v2815_v43  ;;  %2836 = verf.f32 %v1234_v57  ;;  %v1237_v15 = vmul.f32 0.70710677, %v971_v56  ;;  %v3669_v28 = vmul.f32 %v1462_v60, %v3614_v37 }
 0x25f   :  { %v3635_v6 = vpop.f32.mrb[11].mxu1  ;;  %v2819_v18 = vpop.eup %2818  ;;  %v1465_v55 = vadd.f32 1.0, %v2817_v53  ;;  %2838 = verf.f32 %v1235_v63  ;;  %v1236_v23 = vmul.f32 0.70710677, %v790_v46  ;;  %v973_v31 = vadd.f32 %v972_v0, %v3597_v59 }
 0x260   :  { %v2821_v5 = vpop.eup %2820  ;;  %v3640_v58 = vmul.f32 %v1463_v17, %v1103_v8  ;;  %v1464_v21 = vadd.f32 1.0, %v2819_v18  ;;  %v3676_v25 = vmul.f32 0.5, %v788_v49  ;;  %2840 = verf.f32 %v1237_v15 }
 0x261   :  { %v2823_v19 = vpop.eup %2822  ;;  %v3643_v35 = vmul.f32 %v1465_v55, %v1105_v34  ;;  %v797_v12 = vpop.f32.mrb[12].mxu0  ;;  %v1466_v8 = vadd.f32 1.0, %v2821_v5  ;;  %v792_v52 = vadd.f32 %v791_v61, %v3591_v33  ;;  %v975_v9 = vadd.f32 %v974_v10, %v3593_v16 }
 0x262   :  { %v2825_v1 = vpop.eup %2824  ;;  %v1699_v3 = vpack.c.bf16 %v3640_v58, %v3631_v54  ;;  %v3654_v7 = vpop.f32.mrb[12].mxu1  ;;  %v1467_v45 = vadd.f32 1.0, %v2823_v19  ;;  %v1584_v37 = vmul.f32 %v1464_v21, %v3616_v36  ;;  %v3681_v53 = vmul.f32 0.5, %v971_v56 }
 0x263   :  { %v1701_v20 = vpack.c.bf16 %v3643_v35, %v3638_v26  ;;  %v3660_v11 = vpop.f32.mrb[13].mxu0  ;;  %v3662_v27 = vpop.f32.mrb[13].mxu1  ;;  %v1469_v38 = vadd.f32 1.0, %v2825_v1  ;;  %2842 = verf.f32 %v1236_v23  ;;  %v1586_v0 = vmul.f32 %v1466_v8, %v3618_v62 }
 0x264   :  { %v2827_v51 = vpop.eup %2826  ;;  %v3664_v30 = vpop.f32.mrb[14].mxu0  ;;  %v3685_v14 = vmul.f32 %v1467_v45, %v3621_v42  ;;  %v1238_v17 = vmul.f32 0.70710677, %v973_v31  ;;  %v1239_v18 = vmul.f32 0.70710677, %v792_v52  ;;  %v3690_v10 = vmul.f32 0.5, %v790_v46 }
 0x265   :  { %v3666_v34 = vpop.f32.mrb[14].mxu1  ;;  %v3672_v32 = vpop.f32.mrb[15].mxu0  ;;  %v1468_v43 = vadd.f32 1.0, %v2827_v51  ;;  %v3688_v57 = vmul.f32 %v1469_v38, %v3623_v41  ;;  %v1241_v49 = vmul.f32 0.70710677, %v975_v9  ;;  %v794_v56 = vadd.f32 %v3629_v24, %v3595_v44 }
 0x266   :  { %v3674_v39 = vpop.f32.mrb[15].mxu1  ;;  %v2829_v40 = vpop.eup %2828  ;;  %2844 = verf.f32 %v1238_v17  ;;  %v977_v62 = vadd.f32 %v3635_v6, %v3597_v59  ;;  %v3703_v60 = vmul.f32 0.5, %v973_v31  ;;  %v798_v63 = vadd.f32 %v797_v12, %v3591_v33 }
 0x267   :  { %v2831_v47 = vpop.eup %2830  ;;  %v1470_v61 = vadd.f32 1.0, %v2829_v40  ;;  %v3701_v41 = vmul.f32 %v1468_v43, %v3625_v48  ;;  %2846 = verf.f32 %v1239_v18  ;;  %v3710_v21 = vmul.f32 0.5, %v792_v52 }
 0x268   :  { %v2833_v55 = vpop.eup %2832  ;;  %v1471_v5 = vadd.f32 1.0, %v2831_v47  ;;  %2848 = verf.f32 %v1241_v49  ;;  %v1240_v6 = vmul.f32 0.70710677, %v794_v56  ;;  %v1242_v38 = vmul.f32 0.70710677, %v977_v62 }
 0x269   :  { %v2835_v36 = vpop.eup %2834  ;;  %v3696_v42 = vpop.f32.mrb[16].mxu0  ;;  %v1473_v24 = vadd.f32 1.0, %v2833_v55  ;;  %v3717_v45 = vmul.f32 %v1470_v61, %v3627_v22  ;;  %v1243_v12 = vmul.f32 0.70710677, %v798_v63  ;;  %v981_v52 = vadd.f32 %v3654_v7, %v3593_v16 }
 0x26a   :  { %v3698_v19 = vpop.f32.mrb[16].mxu1  ;;  %v3706_v46 = vpop.f32.mrb[17].mxu0  ;;  %v1472_v15 = vadd.f32 1.0, %v2835_v36  ;;  %v3722_v40 = vmul.f32 %v1471_v5, %v3633_v29  ;;  %2850 = verf.f32 %v1240_v6  ;;  %v800_v47 = vadd.f32 %v3660_v11, %v3595_v44 }
 0x26b   :  { %v3708_v1 = vpop.f32.mrb[17].mxu1  ;;  %v3712_v51 = vpop.f32.mrb[18].mxu0  ;;  %2852 = verf.f32 %v1242_v38  ;;  %v983_v22 = vadd.f32 %v3662_v27, %v3597_v59  ;;  %v1700_v17 = vpack.c.bf16 %v1584_v37, %v3656_v50  ;;  %v1702_v18 = vpack.c.bf16 %v1586_v0, %v3669_v28 }
 0x26c   :  { %v3714_v8 = vpop.f32.mrb[18].mxu1  ;;  %v2837_v48 = vpop.eup %2836  ;;  %v3735_v29 = vmul.f32 %v1473_v24, %v3648_v13  ;;  %v3737_v49 = vmul.f32 0.5, %v975_v9  ;;  %v1245_v7 = vmul.f32 0.70710677, %v981_v52  ;;  %v3740_v11 = vmul.f32 %v1472_v15, %v3650_v4 }
 0x26d   :  { %v3719_v23 = vpop.f32.mrb[19].mxu0  ;;  %v2839_v31 = vpop.eup %2838  ;;  %v1474_v61 = vadd.f32 1.0, %v2837_v48  ;;  %2854 = verf.f32 %v1243_v12  ;;  %v1244_v6 = vmul.f32 0.70710677, %v800_v47  ;;  %2054 = vmatprep.mubr.bf16.mxu0 %v1700_v17  ;;  %2207 = vmatprep.mubr.bf16.mxu1 %v1702_v18  ;;  %v3742_v50 = vmul.f32 0.5, %v794_v56 }
 0x26e   :  { %v3728_v43 = vpop.f32.mrb[19].mxu1  ;;  %v2841_v55 = vpop.eup %2840  ;;  %v1475_v5 = vadd.f32 1.0, %v2839_v31  ;;  %v3744_v27 = vmul.f32 0.5, %v977_v62  ;;  %v1246_v28 = vmul.f32 0.70710677, %v983_v22  ;;  %v802_v13 = vadd.f32 %v3664_v30, %v3591_v33  ;;  %2055 = vmatmul.mubr.bf16.vlgmr.msra.gmra.mrb[60].mxu0 %v1699_v3  ;;  %2208 = vmatmul.mubr.bf16.vlgmr.msra.gmra.mrb[60].mxu1 %v1701_v20 }
 0x26f   :  { %v2843_v36 = vpop.eup %2842  ;;  %v1477_v37 = vadd.f32 1.0, %v2841_v55  ;;  %2856 = verf.f32 %v1245_v7  ;;  %v985_v0 = vadd.f32 %v3666_v34, %v3593_v16  ;;  %v804_v30 = vadd.f32 %v3672_v32, %v3595_v44 }
 0x270   :  { %v2845_v58 = vpop.eup %2844  ;;  %v3767_v26 = vmul.f32 %v1474_v61, %v3652_v2  ;;  %v1476_v35 = vadd.f32 1.0, %v2843_v36  ;;  %2858 = verf.f32 %v1244_v6  ;;  %v1247_v3 = vmul.f32 0.70710677, %v802_v13 }
 0x271   :  { %v3754_v4 = vpop.f32.mrb[20].mxu0  ;;  %v3756_v9 = vpop.f32.mrb[20].mxu1  ;;  %v3774_v34 = vmul.f32 %v1475_v5, %v3676_v25  ;;  %v3776_v32 = vmul.f32 0.5, %v798_v63  ;;  %2860 = verf.f32 %v1246_v28  ;;  %v1249_v48 = vmul.f32 0.70710677, %v985_v0 }
 0x272   :  { %v3762_v56 = vpop.f32.mrb[21].mxu0  ;;  %v3764_v54 = vpop.f32.mrb[21].mxu1  ;;  %v3780_v2 = vmul.f32 0.5, %v981_v52  ;;  %v3782_v12 = vmul.f32 0.5, %v800_v47  ;;  %v1248_v31 = vmul.f32 0.70710677, %v804_v30  ;;  %v987_v17 = vadd.f32 %v3674_v39, %v3597_v59 }
 0x273   :  { %v3769_v20 = vpop.f32.mrb[22].mxu0  ;;  %v3771_v62 = vpop.f32.mrb[22].mxu1  ;;  %v3789_v25 = vmul.f32 %v1477_v37, %v3681_v53  ;;  %v3791_v63 = vmul.f32 0.5, %v983_v22  ;;  %2862 = verf.f32 %v1247_v3  ;;  %v808_v55 = vadd.f32 %v3696_v42, %v3591_v33 }
 0x274   :  { %v2847_v24 = vpop.eup %2846  ;;  %v3778_v15 = vpop.f32.mrb[23].mxu0  ;;  %v3796_v52 = vmul.f32 %v1476_v35, %v3690_v10  ;;  %v1478_v47 = vadd.f32 1.0, %v2845_v58  ;;  %2864 = verf.f32 %v1249_v48  ;;  %v1250_v7 = vmul.f32 0.70710677, %v987_v17 }
 0x275   :  { %v2849_v38 = vpop.eup %2848  ;;  %v3786_v18 = vpop.f32.mrb[23].mxu1  ;;  %v1479_v39 = vadd.f32 1.0, %v2847_v24  ;;  %2866 = verf.f32 %v1248_v31  ;;  %v1251_v6 = vmul.f32 0.70710677, %v808_v55  ;;  %v991_v22 = vadd.f32 %v3698_v19, %v3593_v16 }
 0x276   :  { %v2851_v61 = vpop.eup %2850  ;;  %v1481_v5 = vadd.f32 1.0, %v2849_v38  ;;  %2868 = verf.f32 %v1250_v7  ;;  %v810_v42 = vadd.f32 %v3706_v46, %v3595_v44  ;;  %v3806_v35 = vmul.f32 0.5, %v802_v13 }
 0x277   :  { %v2853_v36 = vpop.eup %2852  ;;  %v1480_v53 = vadd.f32 1.0, %v2851_v61  ;;  %2870 = verf.f32 %v1251_v6  ;;  %v993_v3 = vadd.f32 %v3708_v1, %v3597_v59  ;;  %v3815_v19 = vmul.f32 %v1478_v47, %v3703_v60 }
 0x278   :  { %v2855_v37 = vpop.eup %2854  ;;  %v1482_v58 = vadd.f32 1.0, %v2853_v36  ;;  %v3817_v46 = vmul.f32 0.5, %v985_v0  ;;  %v3819_v38 = vmul.f32 0.5, %v804_v30  ;;  %v1253_v31 = vmul.f32 0.70710677, %v991_v22 }
 0x279   :  { %v3802_v28 = vpop.f32.mrb[24].mxu0  ;;  %v3804_v10 = vpop.f32.mrb[24].mxu1  ;;  %v3826_v36 = vmul.f32 %v1479_v39, %v3710_v21  ;;  %v3829_v1 = vmul.f32 %v1481_v5, %v3737_v49  ;;  %v3831_v6 = vmul.f32 0.5, %v987_v17  ;;  %v3833_v60 = vmul.f32 0.5, %v808_v55 }
 0x27a   :  { %v3810_v24 = vpop.f32.mrb[25].mxu0  ;;  %v3812_v48 = vpop.f32.mrb[25].mxu1  ;;  %v1704_v21 = vpack.c.bf16 %v3740_v11, %v3701_v41  ;;  %v3845_v49 = vmul.f32 %v1482_v58, %v3744_v27  ;;  %2872 = verf.f32 %v1253_v31  ;;  %v1254_v17 = vmul.f32 0.70710677, %v993_v3 }
 0x27b   :  { %4520 = vst [vmem:[#allocation12_spill] sm:$0xff] %v3812_v48  ;;  %v3821_v61 = vpop.f32.mrb[26].mxu0  ;;  %v3823_v13 = vpop.f32.mrb[26].mxu1  ;;  %v1252_v48 = vmul.f32 0.70710677, %v810_v42  ;;  %v1706_v55 = vpack.c.bf16 %v3767_v26, %v3717_v45  ;;  %v1703_v27 = vpack.c.bf16 %v3722_v40, %v3685_v14  ;;  %v1705_v45 = vpack.c.bf16 %v3735_v29, %v3688_v57 }
 0x27c   :  { %4521 = vst [vmem:[#allocation13_spill] sm:$0xff] %v3821_v61  ;;  %4522 = vst [vmem:[#allocation14_spill] sm:$0xff] %v3823_v13  ;;  %v2857_v7 = vpop.eup %2856  ;;  %v3835_v0 = vpop.f32.mrb[27].mxu0  ;;  %v3840_v61 = vmul.f32 %v1480_v53, %v3742_v50  ;;  %v1483_v13 = vadd.f32 1.0, %v2855_v37  ;;  %2062 = vmatprep.mubr.bf16.mxu0 %v1704_v21  ;;  %v812_v50 = vadd.f32 %v3712_v51, %v3591_v33  ;;  %v3855_v37 = vmul.f32 0.5, %v810_v42 }
 0x27d   :  { %v3837_v30 = vpop.f32.mrb[27].mxu1  ;;  %v2859_v47 = vpop.eup %2858  ;;  %v1485_v5 = vadd.f32 1.0, %v2857_v7  ;;  %v995_v53 = vadd.f32 %v3714_v8, %v3593_v16  ;;  %2215 = vmatprep.mubr.bf16.mxu1 %v1706_v55  ;;  %2874 = verf.f32 %v1252_v48  ;;  %v3866_v7 = vmul.f32 0.5, %v993_v3  ;;  %2063 = vmatmul.mubr.bf16.gmra.mrb[64].mxu0 %v1703_v27 }
 0x27e   :  { %4523 = vst [vmem:[#allocation15_spill] sm:$0xff] %v3837_v30  ;;  %v2861_v39 = vpop.eup %2860  ;;  %v3849_v30 = vmul.f32 0.5, %v991_v22  ;;  %v1484_v11 = vadd.f32 1.0, %v2859_v47  ;;  %v3862_v22 = vmul.f32 %v1483_v13, %v3776_v32  ;;  %v1255_v51 = vmul.f32 0.70710677, %v812_v50  ;;  %2216 = vmatmul.mubr.bf16.gmra.mrb[64].mxu1 %v1705_v45 }
 0x27f   :  { %v2863_v41 = vpop.eup %2862  ;;  %v1486_v58 = vadd.f32 1.0, %v2861_v39  ;;  %2876 = verf.f32 %v1254_v17  ;;  %v1257_v42 = vmul.f32 0.70710677, %v995_v53  ;;  %v814_v14 = vadd.f32 %v3719_v23, %v3595_v44 }
 0x280   :  { %v2865_v26 = vpop.eup %2864  ;;  %v3875_v32 = vmul.f32 %v1485_v5, %v3780_v2  ;;  %2878 = verf.f32 %v1255_v51  ;;  %v997_v3 = vadd.f32 %v3728_v43, %v3597_v59  ;;  %v818_v48 = vadd.f32 %v3754_v4, %v3591_v33 }
 0x281   :  { %v3864_v31 = vpop.f32.mrb[28].mxu0  ;;  %v2867_v8 = vpop.eup %2866  ;;  %v3886_v21 = vmul.f32 %v1484_v11, %v3782_v12  ;;  %v1487_v39 = vadd.f32 1.0, %v2863_v41  ;;  %v1489_v17 = vadd.f32 1.0, %v2865_v26  ;;  %2880 = verf.f32 %v1257_v42 }
 0x282   :  { %v3870_v57 = vpop.f32.mrb[28].mxu1  ;;  %v3872_v40 = vpop.f32.mrb[29].mxu0  ;;  %v3893_v43 = vmul.f32 %v1486_v58, %v3791_v63  ;;  %v1488_v5 = vadd.f32 1.0, %v2867_v8  ;;  %v1256_v4 = vmul.f32 0.70710677, %v814_v14  ;;  %v1001_v12 = vadd.f32 %v3756_v9, %v3593_v16 }
 0x283   :  { %v2869_v29 = vpop.eup %2868  ;;  %v3881_v13 = vpop.f32.mrb[29].mxu1  ;;  %v1258_v27 = vmul.f32 0.70710677, %v997_v3  ;;  %v1259_v11 = vmul.f32 0.70710677, %v818_v48  ;;  %v820_v26 = vadd.f32 %v3762_v56, %v3595_v44  ;;  %v1003_v63 = vadd.f32 %v3764_v54, %v3597_v59 }
 0x284   :  { %v3883_v47 = vpop.f32.mrb[30].mxu0  ;;  %v2871_v23 = vpop.eup %2870  ;;  %v1490_v45 = vadd.f32 1.0, %v2869_v29  ;;  %2882 = verf.f32 %v1256_v4  ;;  %v3906_v8 = vmul.f32 %v1487_v39, %v3806_v35  ;;  %v3911_v42 = vmul.f32 0.5, %v995_v53 }
 0x285   :  { %4524 = vst [vmem:[#allocation16_spill] sm:$0xff] %v3883_v47  ;;  %v3888_v2 = vpop.f32.mrb[30].mxu1  ;;  %v3890_v55 = vpop.f32.mrb[31].mxu0  ;;  %v1491_v51 = vadd.f32 1.0, %v2871_v23  ;;  %v3895_v47 = vmul.f32 0.5, %v812_v50  ;;  %v3909_v50 = vmul.f32 %v1489_v17, %v3817_v46  ;;  %v3914_v29 = vmul.f32 %v1488_v5, %v3819_v38 }
 0x286   :  { %v3899_v41 = vpop.f32.mrb[31].mxu1  ;;  %v2873_v58 = vpop.eup %2872  ;;  %v1261_v9 = vmul.f32 0.70710677, %v1001_v12  ;;  %v3916_v23 = vmul.f32 0.5, %v814_v14  ;;  %2884 = verf.f32 %v1258_v27  ;;  %v1260_v56 = vmul.f32 0.70710677, %v820_v26 }
 0x287   :  { %v3923_v35 = vmul.f32 %v1490_v45, %v3831_v6  ;;  %v3926_v46 = vmul.f32 %v1491_v51, %v3833_v60  ;;  %v3928_v53 = vmul.f32 0.5, %v997_v3  ;;  %v3930_v39 = vmul.f32 0.5, %v818_v48  ;;  %v2875_v17 = vpop.eup %2874 }
 0x288   :  { %v1493_v5 = vadd.f32 1.0, %v2873_v58  ;;  %2886 = verf.f32 %v1259_v11  ;;  %v1262_v27 = vmul.f32 0.70710677, %v1003_v63  ;;  %v1710_v3 = vpack.c.bf16 %v3845_v49, %v3815_v19 }
 0x289   :  { %v3918_v4 = vpop.f32.mrb[32].mxu0  ;;  %v3920_v54 = vpop.f32.mrb[32].mxu1  ;;  %2888 = verf.f32 %v1261_v9  ;;  %v822_v48 = vadd.f32 %v3769_v20, %v3591_v33  ;;  %v1005_v51 = vadd.f32 %v3771_v62, %v3593_v16  ;;  %v1709_v9 = vpack.c.bf16 %v3829_v1, %v3789_v25 }
 0x28a   :  { %4525 = vst [vmem:[#allocation17_spill] sm:$0xff] %v3920_v54  ;;  %v3932_v38 = vpop.f32.mrb[33].mxu0  ;;  %v3934_v14 = vpop.f32.mrb[33].mxu1  ;;  %v1708_v54 = vpack.c.bf16 %v3840_v61, %v3796_v52  ;;  %2890 = verf.f32 %v1260_v56  ;;  %v1707_v61 = vpack.c.bf16 %v3826_v36, %v3774_v34  ;;  %v824_v19 = vadd.f32 %v3778_v15, %v3595_v44  ;;  %2223 = vmatprep.mubr.bf16.mxu1 %v1710_v3 }
 0x28b   :  { %v3938_v6 = vpop.f32.mrb[34].mxu0  ;;  %v3940_v45 = vpop.f32.mrb[34].mxu1  ;;  %v1492_v49 = vadd.f32 1.0, %v2875_v17  ;;  %2892 = verf.f32 %v1262_v27  ;;  %v1263_v62 = vmul.f32 0.70710677, %v822_v48  ;;  %2224 = vmatmul.mubr.bf16.gmra.mrb[68].mxu1 %v1709_v9  ;;  %v3963_v36 = vmul.f32 %v1493_v5, %v3849_v30 }
 0x28c   :  { %4526 = vst [vmem:[#allocation18_spill] sm:$0xff] %v3940_v45  ;;  %v2877_v60 = vpop.eup %2876  ;;  %v3948_v11 = vpop.f32.mrb[35].mxu0  ;;  %2070 = vmatprep.mubr.bf16.mxu0 %v1708_v54  ;;  %v3958_v45 = vmul.f32 0.5, %v1001_v12  ;;  %v1265_v56 = vmul.f32 0.70710677, %v1005_v51  ;;  %v1007_v15 = vadd.f32 %v3786_v18, %v3597_v59  ;;  %v828_v25 = vadd.f32 %v3802_v28, %v3591_v33 }
 0x28d   :  { %4527 = vst [vmem:[#allocation19_spill] sm:$0xff] %v3948_v11  ;;  %v3950_v58 = vpop.f32.mrb[35].mxu1  ;;  %v2879_v52 = vpop.eup %2878  ;;  %v3960_v11 = vmul.f32 0.5, %v820_v26  ;;  %2071 = vmatmul.mubr.bf16.gmra.mrb[68].mxu0 %v1707_v61  ;;  %v1264_v34 = vmul.f32 0.70710677, %v824_v19  ;;  %2894 = verf.f32 %v1263_v62  ;;  %v1011_v26 = vadd.f32 %v3804_v10, %v3593_v16 }
 0x28e   :  { %4528 = vst [vmem:[#allocation20_spill] sm:$0xff] %v3950_v58  ;;  %v2881_v20 = vpop.eup %2880  ;;  %v1494_v58 = vadd.f32 1.0, %v2877_v60  ;;  %v1495_v12 = vadd.f32 1.0, %v2879_v52  ;;  %2896 = verf.f32 %v1265_v56  ;;  %v3976_v30 = vmul.f32 %v1492_v49, %v3855_v37 }
 0x28f   :  { %v2883_v1 = vpop.eup %2882  ;;  %v1497_v54 = vadd.f32 1.0, %v2881_v20  ;;  %v3978_v5 = vmul.f32 0.5, %v1003_v63  ;;  %v1266_v18 = vmul.f32 0.70710677, %v1007_v15  ;;  %v830_v28 = vadd.f32 %v3810_v24, %v3595_v44 }
 0x290   :  { %v2885_v52 = vpop.eup %2884  ;;  %v3987_v10 = vmul.f32 %v1494_v58, %v3866_v7  ;;  %v3989_v61 = vmul.f32 0.5, %v822_v48  ;;  %2898 = verf.f32 %v1264_v34  ;;  %v1267_v9 = vmul.f32 0.70710677, %v828_v25 }
 0x291   :  { %v3971_v17 = vpop.f32.mrb[36].mxu0  ;;  %v3973_v27 = vpop.f32.mrb[36].mxu1  ;;  %v1496_v63 = vadd.f32 1.0, %v2883_v1  ;;  %v3993_v20 = vmul.f32 0.5, %v1005_v51  ;;  %2900 = verf.f32 %v1266_v18  ;;  %v1269_v49 = vmul.f32 0.70710677, %v1011_v26 }
 0x292   :  { %v3982_v60 = vpop.f32.mrb[37].mxu0  ;;  %v3984_v3 = vpop.f32.mrb[37].mxu1  ;;  %v4003_v7 = vmul.f32 %v1497_v54, %v3911_v42  ;;  %v4005_v48 = vmul.f32 0.5, %v824_v19  ;;  %2902 = verf.f32 %v1267_v9  ;;  %v1498_v34 = vadd.f32 1.0, %v2885_v52 }
 0x293   :  { %4529 = vst [vmem:[#allocation21_spill] sm:$0xff] %v3984_v3  ;;  %v3991_v37 = vpop.f32.mrb[38].mxu0  ;;  %v3995_v24 = vpop.f32.mrb[38].mxu1  ;;  %v4000_v3 = vmul.f32 %v1495_v12, %v3895_v47  ;;  %v4009_v1 = vmul.f32 0.5, %v1007_v15  ;;  %2904 = verf.f32 %v1269_v49  ;;  %v1268_v18 = vmul.f32 0.70710677, %v830_v28 }
 0x294   :  { %4530 = vst [vmem:[#allocation22_spill] sm:$0xff] %v3991_v37  ;;  %4531 = vst [vmem:[#allocation23_spill] sm:$0xff] %v3995_v24  ;;  %v3997_v62 = vpop.f32.mrb[39].mxu0  ;;  %v2887_v56 = vpop.eup %2886  ;;  %v4534_v47 = vld [vmem:[#allocation12_spill] sm:$0xff]  ;;  %v1712_v42 = vpack.c.bf16 %v3914_v29, %v3886_v21  ;;  %v1714_v19 = vpack.c.bf16 %v3923_v35, %v3893_v43  ;;  %v4020_v9 = vmul.f32 %v1496_v63, %v3916_v23  ;;  %v4022_v52 = vmul.f32 0.5, %v1011_v26  ;;  %v4535_v49 = vld [vmem:[#allocation13_spill] sm:$0xff] }
 0x295   :  { %4532 = vst [vmem:[#allocation24_spill] sm:$0xff] %v3997_v62  ;;  %v4007_v58 = vpop.f32.mrb[39].mxu1  ;;  %v2889_v51 = vpop.eup %2888  ;;  %v4011_v62 = vmul.f32 0.5, %v828_v25  ;;  %v1013_v12 = vadd.f32 %v4534_v47, %v3597_v59  ;;  %v1499_v15 = vadd.f32 1.0, %v2887_v56  ;;  %v832_v25 = vadd.f32 %v4535_v49, %v3591_v33  ;;  %v4536_v47 = vld [vmem:[#allocation14_spill] sm:$0xff] }
 0x296   :  { %4533 = vst [vmem:[#allocation25_spill] sm:$0xff] %v4007_v58  ;;  %v2891_v24 = vpop.eup %2890  ;;  %v1501_v58 = vadd.f32 1.0, %v2889_v51  ;;  %2078 = vmatprep.mubr.bf16.mxu0 %v1712_v42  ;;  %2231 = vmatprep.mubr.bf16.mxu1 %v1714_v19  ;;  %v1015_v21 = vadd.f32 %v4536_v47, %v3593_v16  ;;  %v1711_v43 = vpack.c.bf16 %v3906_v8, %v3862_v22  ;;  %2906 = verf.f32 %v1268_v18  ;;  %v4537_v8 = vld [vmem:[#allocation15_spill] sm:$0xff] }
 0x297   :  { %v2893_v54 = vpop.eup %2892  ;;  %v1270_v37 = vmul.f32 0.70710677, %v1013_v12  ;;  %v1500_v35 = vadd.f32 1.0, %v2891_v24  ;;  %v1271_v23 = vmul.f32 0.70710677, %v832_v25  ;;  %v1713_v26 = vpack.c.bf16 %v3909_v50, %v3875_v32 }
 0x298   :  { %v2895_v29 = vpop.eup %2894  ;;  %v1618_v56 = vmul.f32 %v1498_v34, %v3928_v53  ;;  %v1502_v51 = vadd.f32 1.0, %v2893_v54  ;;  %v1273_v42 = vmul.f32 0.70710677, %v1015_v21  ;;  %2079 = vmatmul.mubr.bf16.gmra.mrb[72].mxu0 %v1711_v43  ;;  %v834_v22 = vadd.f32 %v3835_v0, %v3595_v44 }
 0x299   :  { %v2897_v63 = vpop.eup %2896  ;;  %2908 = verf.f32 %v1270_v37  ;;  %v1503_v19 = vadd.f32 1.0, %v2895_v29  ;;  %2232 = vmatmul.mubr.bf16.gmra.mrb[72].mxu1 %v1713_v26  ;;  %v1017_v24 = vadd.f32 %v4537_v8, %v3597_v59  ;;  %v4037_v47 = vmul.f32 0.5, %v830_v28  ;;  %v4538_v8 = vld [vmem:[#allocation16_spill] sm:$0xff] }
 0x29a   :  { %2910 = verf.f32 %v1271_v23  ;;  %v2899_v18 = vpop.eup %2898  ;;  %v1505_v49 = vadd.f32 1.0, %v2897_v63  ;;  %v838_v32 = vadd.f32 %v3864_v31, %v3591_v33  ;;  %v4042_v53 = vmul.f32 %v1499_v15, %v3930_v39 }
 0x29b   :  { %2912 = verf.f32 %v1273_v42  ;;  %v2901_v50 = vpop.eup %2900  ;;  %v4045_v37 = vmul.f32 %v1501_v58, %v3958_v45  ;;  %v4048_v0 = vmul.f32 %v1500_v35, %v3960_v11  ;;  %v1272_v34 = vmul.f32 0.70710677, %v834_v22 }
 0x29c   :  { %v2903_v54 = vpop.eup %2902  ;;  %v4051_v43 = vmul.f32 %v1502_v51, %v3978_v5  ;;  %v4053_v28 = vmul.f32 0.5, %v1013_v12  ;;  %v4055_v29 = vmul.f32 0.5, %v832_v25  ;;  %v1274_v31 = vmul.f32 0.70710677, %v1017_v24 }
 0x29d   :  { %v2905_v23 = vpop.eup %2904  ;;  %v4058_v39 = vmul.f32 %v1503_v19, %v3989_v61  ;;  %v4060_v15 = vmul.f32 0.5, %v1015_v21  ;;  %v1275_v45 = vmul.f32 0.70710677, %v838_v32  ;;  %v1021_v11 = vadd.f32 %v3870_v57, %v3593_v16 }
 0x29e   :  { %v4065_v58 = vmul.f32 %v1505_v49, %v3993_v20  ;;  %v1504_v5 = vadd.f32 1.0, %v2899_v18  ;;  %2914 = verf.f32 %v1272_v34  ;;  %v840_v12 = vadd.f32 %v3872_v40, %v3595_v44 }
 0x29f   :  { %v1506_v25 = vadd.f32 1.0, %v2901_v50  ;;  %v4069_v35 = vmul.f32 0.5, %v834_v22  ;;  %2916 = verf.f32 %v1274_v31  ;;  %v1277_v61 = vmul.f32 0.70710677, %v1021_v11 }
 0x2a0   :  { %v1507_v26 = vadd.f32 1.0, %v2903_v54  ;;  %v1509_v21 = vadd.f32 1.0, %v2905_v23  ;;  %2918 = verf.f32 %v1275_v45  ;;  %v1276_v63 = vmul.f32 0.70710677, %v840_v12  ;;  %v2907_v51 = vpop.eup %2906 }
 0x2a1   :  { %2920 = verf.f32 %v1277_v61  ;;  %v1023_v57 = vadd.f32 %v3881_v13, %v3597_v59  ;;  %v1716_v20 = vpack.c.bf16 %v4020_v9, %v3976_v30  ;;  %v1718_v42 = vpack.c.bf16 %v1618_v56, %v3987_v10 }
 0x2a2   :  { %v4077_v19 = vmul.f32 %v1504_v5, %v4005_v48  ;;  %v4079_v22 = vmul.f32 0.5, %v1017_v24  ;;  %v842_v18 = vadd.f32 %v4538_v8, %v3591_v33  ;;  %v1025_v49 = vadd.f32 %v3888_v2, %v3593_v16 }
 0x2a3   :  { %v2909_v40 = vpop.eup %2908  ;;  %v4086_v13 = vmul.f32 %v1506_v25, %v4009_v1  ;;  %v4088_v34 = vmul.f32 0.5, %v838_v32  ;;  %v1278_v30 = vmul.f32 0.70710677, %v1023_v57  ;;  %2086 = vmatprep.mubr.bf16.mxu0 %v1716_v20  ;;  %2239 = vmatprep.mubr.bf16.mxu1 %v1718_v42  ;;  %v1715_v10 = vpack.c.bf16 %v4000_v3, %v3926_v46  ;;  %v4539_v25 = vld [vmem:[#allocation17_spill] sm:$0xff] }
 0x2a4   :  { %v2911_v50 = vpop.eup %2910  ;;  %v4093_v9 = vmul.f32 %v1507_v26, %v4011_v62  ;;  %v4096_v56 = vmul.f32 %v1509_v21, %v4022_v52  ;;  %v4098_v2 = vmul.f32 0.5, %v1021_v11  ;;  %v1279_v24 = vmul.f32 0.70710677, %v842_v18 }
 0x2a5   :  { %v2913_v48 = vpop.eup %2912  ;;  %v1508_v1 = vadd.f32 1.0, %v2907_v51  ;;  %v1510_v54 = vadd.f32 1.0, %v2909_v40  ;;  %2922 = verf.f32 %v1276_v63  ;;  %v1281_v32 = vmul.f32 0.70710677, %v1025_v49  ;;  %2087 = vmatmul.mubr.bf16.gmra.mrb[76].mxu0 %v1715_v10 }
 0x2a6   :  { %v1511_v31 = vadd.f32 1.0, %v2911_v50  ;;  %2924 = verf.f32 %v1278_v30  ;;  %v1717_v46 = vpack.c.bf16 %v4003_v7, %v3963_v36  ;;  %v844_v3 = vadd.f32 %v3890_v55, %v3595_v44 }
 0x2a7   :  { %v1513_v62 = vadd.f32 1.0, %v2913_v48  ;;  %2926 = verf.f32 %v1279_v24  ;;  %v1027_v52 = vadd.f32 %v3899_v41, %v3597_v59  ;;  %v848_v23 = vadd.f32 %v3918_v4, %v3591_v33 }
 0x2a8   :  { %v2915_v45 = vpop.eup %2914  ;;  %v4108_v11 = vmul.f32 0.5, %v840_v12  ;;  %2928 = verf.f32 %v1281_v32  ;;  %2240 = vmatmul.mubr.bf16.gmra.mrb[76].mxu1 %v1717_v46  ;;  %v1280_v5 = vmul.f32 0.70710677, %v844_v3  ;;  %v1031_v36 = vadd.f32 %v4539_v25, %v3593_v16 }
 0x2a9   :  { %v2917_v7 = vpop.eup %2916  ;;  %v4113_v55 = vmul.f32 %v1508_v1, %v4037_v47  ;;  %v4115_v61 = vmul.f32 0.5, %v1023_v57  ;;  %v4117_v26 = vmul.f32 0.5, %v842_v18  ;;  %v1282_v41 = vmul.f32 0.70710677, %v1027_v52 }
 0x2aa   :  { %v2919_v21 = vpop.eup %2918  ;;  %v4120_v4 = vmul.f32 %v1510_v54, %v4053_v28  ;;  %v4122_v12 = vmul.f32 0.5, %v1025_v49  ;;  %2930 = verf.f32 %v1280_v5  ;;  %v1283_v63 = vmul.f32 0.70710677, %v848_v23 }
 0x2ab   :  { %v2921_v51 = vpop.eup %2920  ;;  %v4125_v20 = vmul.f32 %v1511_v31, %v4055_v29  ;;  %v4128_v47 = vmul.f32 %v1513_v62, %v4060_v15  ;;  %2932 = verf.f32 %v1282_v41  ;;  %v1285_v57 = vmul.f32 0.70710677, %v1031_v36 }
 0x2ac   :  { %v1512_v42 = vadd.f32 1.0, %v2915_v45  ;;  %v4130_v40 = vmul.f32 0.5, %v844_v3  ;;  %2934 = verf.f32 %v1283_v63  ;;  %v850_v28 = vadd.f32 %v3932_v38, %v3595_v44 }
 0x2ad   :  { %v1514_v8 = vadd.f32 1.0, %v2917_v7  ;;  %v4134_v18 = vmul.f32 0.5, %v1027_v52  ;;  %v1033_v49 = vadd.f32 %v3934_v14, %v3597_v59  ;;  %v1720_v29 = vpack.c.bf16 %v4077_v19, %v4048_v0  ;;  %v4540_v0 = vld [vmem:[#allocation18_spill] sm:$0xff] }
 0x2ae   :  { %v1515_v15 = vadd.f32 1.0, %v2919_v21  ;;  %v1517_v50 = vadd.f32 1.0, %v2921_v51  ;;  %v1284_v30 = vmul.f32 0.70710677, %v850_v28  ;;  %v1722_v10 = vpack.c.bf16 %v4086_v13, %v4051_v43 }
 0x2af   :  { %v2923_v48 = vpop.eup %2922  ;;  %v4142_v24 = vmul.f32 0.5, %v848_v23  ;;  %2936 = verf.f32 %v1285_v57  ;;  %v1286_v38 = vmul.f32 0.70710677, %v1033_v49  ;;  %2094 = vmatprep.mubr.bf16.mxu0 %v1720_v29  ;;  %v852_v1 = vadd.f32 %v3938_v6, %v3591_v33 }
 0x2b0   :  { %v2925_v54 = vpop.eup %2924  ;;  %v1632_v14 = vmul.f32 %v1512_v42, %v4069_v35  ;;  %2938 = verf.f32 %v1284_v30  ;;  %2247 = vmatprep.mubr.bf16.mxu1 %v1722_v10  ;;  %v1035_v19 = vadd.f32 %v4540_v0, %v3593_v16  ;;  %v1719_v43 = vpack.c.bf16 %v4058_v39, %v4042_v53  ;;  %v4541_v39 = vld [vmem:[#allocation19_spill] sm:$0xff] }
 0x2b1   :  { %v2927_v13 = vpop.eup %2926  ;;  %v1634_v32 = vmul.f32 %v1514_v8, %v4079_v22  ;;  %v4152_v31 = vmul.f32 0.5, %v1031_v36  ;;  %2940 = verf.f32 %v1286_v38  ;;  %v1287_v46 = vmul.f32 0.70710677, %v852_v1 }
 0x2b2   :  { %v2929_v3 = vpop.eup %2928  ;;  %v4155_v6 = vmul.f32 %v1515_v15, %v4088_v34  ;;  %v4158_v35 = vmul.f32 %v1517_v50, %v4098_v2  ;;  %v1516_v62 = vadd.f32 1.0, %v2923_v48  ;;  %v1289_v52 = vmul.f32 0.70710677, %v1035_v19  ;;  %2095 = vmatmul.mubr.bf16.gmra.mrb[80].mxu0 %v1719_v43  ;;  %v4542_v34 = vld [vmem:[#allocation20_spill] sm:$0xff] }
 0x2b3   :  { %v1518_v23 = vadd.f32 1.0, %v2925_v54  ;;  %2942 = verf.f32 %v1287_v46  ;;  %v1721_v53 = vpack.c.bf16 %v4065_v58, %v4045_v37  ;;  %v854_v22 = vadd.f32 %v4541_v39, %v3595_v44 }
 0x2b4   :  { %v2931_v45 = vpop.eup %2930  ;;  %v1519_v5 = vadd.f32 1.0, %v2927_v13  ;;  %2944 = verf.f32 %v1289_v52  ;;  %v1037_v25 = vadd.f32 %v4542_v34, %v3597_v59  ;;  %v4168_v2 = vadd.f32 %v3971_v17, %v3591_v33  ;;  %v4546_v34 = vld [vmem:[#allocation24_spill] sm:$0xff] }
 0x2b5   :  { %v2933_v36 = vpop.eup %2932  ;;  %v1521_v7 = vadd.f32 1.0, %v2929_v3  ;;  %v4170_v41 = vmul.f32 0.5, %v850_v28  ;;  %2248 = vmatmul.mubr.bf16.gmra.mrb[80].mxu1 %v1721_v53  ;;  %v1288_v21 = vmul.f32 0.70710677, %v854_v22  ;;  %v4174_v37 = vadd.f32 %v3973_v27, %v3593_v16  ;;  %v4544_v3 = vld [vmem:[#allocation22_spill] sm:$0xff] }
 0x2b6   :  { %v2935_v58 = vpop.eup %2934  ;;  %v4177_v63 = vmul.f32 %v1516_v62, %v4108_v11  ;;  %v4179_v51 = vmul.f32 0.5, %v1033_v49  ;;  %v1167_v57 = vmul.f32 0.5, %v852_v1  ;;  %v1290_v42 = vmul.f32 0.70710677, %v1037_v25 }
 0x2b7   :  { %v4182_v17 = vmul.f32 %v1518_v23, %v4115_v61  ;;  %v1520_v8 = vadd.f32 1.0, %v2931_v45  ;;  %v1522_v28 = vadd.f32 1.0, %v2933_v36  ;;  %2946 = verf.f32 %v1288_v21  ;;  %v4547_v36 = vld [vmem:[#allocation25_spill] sm:$0xff] }
 0x2b8   :  { %v4185_v29 = vmul.f32 %v1519_v5, %v4117_v26  ;;  %v1169_v15 = vmul.f32 0.5, %v1035_v19  ;;  %2948 = verf.f32 %v1290_v42  ;;  %v1291_v27 = vmul.f32 0.70710677, %v4168_v2  ;;  %v4543_v26 = vld [vmem:[#allocation21_spill] sm:$0xff] }
 0x2b9   :  { %v2937_v50 = vpop.eup %2936  ;;  %v4189_v11 = vmul.f32 %v1521_v7, %v4122_v12  ;;  %v1523_v49 = vadd.f32 1.0, %v2935_v58  ;;  %v1293_v30 = vmul.f32 0.70710677, %v4174_v37  ;;  %v4194_v61 = vadd.f32 %v3982_v60, %v3595_v44 }
 0x2ba   :  { %v2939_v10 = vpop.eup %2938  ;;  %v1168_v48 = vmul.f32 0.5, %v854_v22  ;;  %v4198_v38 = vadd.f32 %v4543_v26, %v3597_v59  ;;  %v1724_v1 = vpack.c.bf16 %v1632_v14, %v4113_v55  ;;  %v1726_v54 = vpack.c.bf16 %v1634_v32, %v4120_v4 }
 0x2bb   :  { %v2941_v0 = vpop.eup %2940  ;;  %v1640_v12 = vmul.f32 %v1520_v8, %v4130_v40  ;;  %v1642_v19 = vmul.f32 %v1522_v28, %v4134_v18  ;;  %v1170_v43 = vmul.f32 0.5, %v1037_v25  ;;  %v1292_v13 = vmul.f32 0.70710677, %v4194_v61  ;;  %v4545_v40 = vld [vmem:[#allocation23_spill] sm:$0xff] }
 0x2bc   :  { %v1525_v60 = vadd.f32 1.0, %v2937_v50  ;;  %2950 = verf.f32 %v1291_v27  ;;  %v1294_v46 = vmul.f32 0.70710677, %v4198_v38  ;;  %2102 = vmatprep.mubr.bf16.mxu0 %v1724_v1  ;;  %2255 = vmatprep.mubr.bf16.mxu1 %v1726_v54  ;;  %v862_v62 = vadd.f32 %v4544_v3, %v3591_v33 }
 0x2bd   :  { %v2943_v55 = vpop.eup %2942  ;;  %v4209_v4 = vmul.f32 %v1523_v49, %v4142_v24  ;;  %2952 = verf.f32 %v1293_v30  ;;  %v1045_v18 = vadd.f32 %v4545_v40, %v3593_v16  ;;  %v1723_v14 = vpack.c.bf16 %v4125_v20, %v4093_v9 }
 0x2be   :  { %v2945_v32 = vpop.eup %2944  ;;  %v1524_v52 = vadd.f32 1.0, %v2939_v10  ;;  %v1526_v23 = vadd.f32 1.0, %v2941_v0  ;;  %v1527_v53 = vadd.f32 1.0, %v2943_v55  ;;  %2954 = verf.f32 %v1292_v13 }
 0x2bf   :  { %v1529_v39 = vadd.f32 1.0, %v2945_v32  ;;  %2956 = verf.f32 %v1294_v46  ;;  %v1295_v22 = vmul.f32 0.70710677, %v862_v62  ;;  %v1297_v45 = vmul.f32 0.70710677, %v1045_v18  ;;  %2103 = vmatmul.mubr.bf16.gmra.mrb[84].mxu0 %v1723_v14 }
 0x2c0   :  { %v1647_v5 = vmul.f32 %v1527_v53, %v1167_v57  ;;  %v1725_v24 = vpack.c.bf16 %v4128_v47, %v4096_v56  ;;  %v864_v25 = vadd.f32 %v4546_v34, %v3595_v44  ;;  %v1047_v9 = vadd.f32 %v4547_v36, %v3597_v59 }
 0x2c1   :  { %v2947_v20 = vpop.eup %2946  ;;  %v4221_v7 = vmul.f32 %v1529_v39, %v1169_v15  ;;  %2958 = verf.f32 %v1295_v22  ;;  %v1728_v21 = vpack.c.bf16 %v1640_v12, %v4177_v63  ;;  %v1730_v58 = vpack.c.bf16 %v1642_v19, %v4182_v17 }
 0x2c2   :  { %v2949_v42 = vpop.eup %2948  ;;  %v1645_v57 = vmul.f32 %v1525_v60, %v4152_v31  ;;  %v1528_v8 = vadd.f32 1.0, %v2947_v20  ;;  %2960 = verf.f32 %v1297_v45  ;;  %2256 = vmatmul.mubr.bf16.gmra.mrb[84].mxu1 %v1725_v24  ;;  %v1296_v56 = vmul.f32 0.70710677, %v864_v25 }
 0x2c3   :  { %v1644_v47 = vmul.f32 %v1524_v52, %v4170_v41  ;;  %v1530_v28 = vadd.f32 1.0, %v2949_v42  ;;  %v1298_v27 = vmul.f32 0.70710677, %v1047_v9  ;;  %2110 = vmatprep.mubr.bf16.mxu0 %v1728_v21  ;;  %2263 = vmatprep.mubr.bf16.mxu1 %v1730_v58  ;;  %v1727_v15 = vpack.c.bf16 %v4185_v29, %v4155_v6 }
 0x2c4   :  { %v1646_v63 = vmul.f32 %v1526_v23, %v4179_v51  ;;  %v1648_v50 = vmul.f32 %v1528_v8, %v1168_v48  ;;  %2962 = verf.f32 %v1296_v56  ;;  %v1729_v31 = vpack.c.bf16 %v4189_v11, %v4158_v35 }
 0x2c5   :  { %v1650_v17 = vmul.f32 %v1530_v28, %v1170_v43  ;;  %2964 = verf.f32 %v1298_v27  ;;  %v1731_v49 = vpack.c.bf16 %v1647_v5, %v4209_v4  ;;  %v1733_v41 = vpack.c.bf16 %v4221_v7, %v1645_v57 }
 0x2c6   :  { %v2951_v30 = vpop.eup %2950  ;;  %v1732_v10 = vpack.c.bf16 %v1648_v50, %v1644_v47  ;;  %v1171_v11 = vmul.f32 0.5, %v4168_v2  ;;  %v1175_v0 = vmul.f32 0.5, %v862_v62  ;;  %v1173_v19 = vmul.f32 0.5, %v4174_v37 }
 0x2c7   :  { %v2953_v26 = vpop.eup %2952  ;;  %2111 = vmatmul.mubr.bf16.gmra.mrb[88].mxu0 %v1727_v15  ;;  %v1734_v1 = vpack.c.bf16 %v1650_v17, %v1646_v63  ;;  %v1531_v51 = vadd.f32 1.0, %v2951_v30  ;;  %v1177_v13 = vmul.f32 0.5, %v1045_v18  ;;  %v1172_v55 = vmul.f32 0.5, %v4194_v61 }
 0x2c8   :  { %v2955_v54 = vpop.eup %2954  ;;  %2118 = vmatprep.mubr.bf16.mxu0 %v1732_v10  ;;  %v1533_v48 = vadd.f32 1.0, %v2953_v26  ;;  %v1176_v23 = vmul.f32 0.5, %v864_v25  ;;  %v1174_v2 = vmul.f32 0.5, %v4198_v38  ;;  %v1178_v62 = vmul.f32 0.5, %v1047_v9 }
 0x2c9   :  { %v2957_v6 = vpop.eup %2956  ;;  %v1532_v43 = vadd.f32 1.0, %v2955_v54  ;;  %v1651_v3 = vmul.f32 %v1531_v51, %v1171_v11 }
 0x2ca   :  { %2264 = vmatmul.mubr.bf16.gmra.mrb[88].mxu1 %v1729_v31  ;;  %v1534_v4 = vadd.f32 1.0, %v2957_v6  ;;  %v1653_v32 = vmul.f32 %v1533_v48, %v1173_v19 }
 0x2cb   :  { %v2959_v29 = vpop.eup %2958  ;;  %2271 = vmatprep.mubr.bf16.mxu1 %v1734_v1  ;;  %v1652_v22 = vmul.f32 %v1532_v43, %v1172_v55 }
 0x2cc   :  { %v2961_v35 = vpop.eup %2960  ;;  %v1535_v12 = vadd.f32 1.0, %v2959_v29  ;;  %v1654_v5 = vmul.f32 %v1534_v4, %v1174_v2 }
 0x2cd   :  { %v1537_v60 = vadd.f32 1.0, %v2961_v35 }
 0x2ce   :  { %v2963_v46 = vpop.eup %2962  ;;  %v1655_v40 = vmul.f32 %v1535_v12, %v1175_v0 }
 0x2cf   :  { %v2965_v14 = vpop.eup %2964  ;;  %v1657_v52 = vmul.f32 %v1537_v60, %v1177_v13  ;;  %v1536_v53 = vadd.f32 1.0, %v2963_v46  ;;  %2119 = vmatmul.mubr.bf16.gmra.mrb[92].mxu0 %v1731_v49 }
 0x2d0   :  { %v1538_v39 = vadd.f32 1.0, %v2965_v14  ;;  %v1735_v37 = vpack.c.bf16 %v1655_v40, %v1651_v3 }
 0x2d1   :  { %v1656_v18 = vmul.f32 %v1536_v53, %v1176_v23  ;;  %v1737_v45 = vpack.c.bf16 %v1657_v52, %v1653_v32 }
 0x2d2   :  { %v1658_v24 = vmul.f32 %v1538_v39, %v1178_v62  ;;  %2272 = vmatmul.mubr.bf16.gmra.mrb[92].mxu1 %v1733_v41 }
 0x2d3   :  { %v1736_v61 = vpack.c.bf16 %v1656_v18, %v1652_v22 }
 0x2d4   :  { %v1738_v34 = vpack.c.bf16 %v1658_v24, %v1654_v5 }
 0x2d5   :  { %2126 = vmatprep.mubr.bf16.mxu0 %v1736_v61 }
 0x2d6   :  { %2279 = vmatprep.mubr.bf16.mxu1 %v1738_v34 }
 0x2d7   :  { %2127 = vmatmul.mubr.bf16.gmra.mrb[96].mxu0 %v1735_v37 }
 0x2da   :  { %2280 = vmatmul.mubr.bf16.gmra.mrb[96].mxu1 %v1737_v45 }
 0x2e1   :  { %v867_v25 = vpop.f32.mrb[40].mxu0  ;;  %v1050_v36 = vpop.f32.mrb[40].mxu1 }
 0x2e2   :  { %v868_v20 = vadd.f32 %v867_v25, %v3591_v33  ;;  %v1051_v38 = vadd.f32 %v1050_v36, %v3593_v16  ;;  %v869_v9 = vpop.f32.mrb[41].mxu0  ;;  %v1052_v7 = vpop.f32.mrb[41].mxu1 }
 0x2e3   :  { %v870_v21 = vadd.f32 %v869_v9, %v3595_v44  ;;  %v1053_v58 = vadd.f32 %v1052_v7, %v3597_v59  ;;  %v871_v42 = vpop.f32.mrb[42].mxu0  ;;  %v1054_v57 = vpop.f32.mrb[42].mxu1 }
 0x2e4   :  { %v1299_v8 = vmul.f32 0.70710677, %v868_v20  ;;  %v1301_v56 = vmul.f32 0.70710677, %v1051_v38  ;;  %v872_v27 = vadd.f32 %v871_v42, %v3591_v33  ;;  %v1055_v15 = vadd.f32 %v1054_v57, %v3593_v16  ;;  %v873_v63 = vpop.f32.mrb[43].mxu0  ;;  %v1056_v50 = vpop.f32.mrb[43].mxu1 }
 0x2e5   :  { %v1300_v47 = vmul.f32 0.70710677, %v870_v21  ;;  %v1302_v28 = vmul.f32 0.70710677, %v1053_v58  ;;  %v874_v31 = vadd.f32 %v873_v63, %v3595_v44  ;;  %v1057_v17 = vadd.f32 %v1056_v50, %v3597_v59 }
 0x2e6   :  { %2966 = verf.f32 %v1299_v8  ;;  %v1303_v49 = vmul.f32 0.70710677, %v872_v27  ;;  %v1305_v41 = vmul.f32 0.70710677, %v1055_v15  ;;  %v1179_v60 = vmul.f32 0.5, %v868_v20 }
 0x2e7   :  { %2968 = verf.f32 %v1301_v56  ;;  %v1304_v30 = vmul.f32 0.70710677, %v874_v31  ;;  %v1306_v26 = vmul.f32 0.70710677, %v1057_v17  ;;  %v1181_v32 = vmul.f32 0.5, %v1051_v38 }
 0x2e8   :  { %2970 = verf.f32 %v1300_v47  ;;  %v1180_v52 = vmul.f32 0.5, %v870_v21  ;;  %v1182_v23 = vmul.f32 0.5, %v1053_v58  ;;  %v1183_v2 = vmul.f32 0.5, %v872_v27 }
 0x2e9   :  { %2972 = verf.f32 %v1302_v28  ;;  %v877_v10 = vpop.f32.mrb[44].mxu0  ;;  %v1060_v54 = vpop.f32.mrb[44].mxu1  ;;  %v1185_v62 = vmul.f32 0.5, %v1055_v15  ;;  %v4254_v5 = vmul.f32 0.5, %v874_v31  ;;  %v4256_v24 = vmul.f32 0.5, %v1057_v17 }
 0x2ea   :  { %2974 = verf.f32 %v1303_v49  ;;  %v878_v1 = vadd.f32 %v877_v10, %v3591_v33  ;;  %v879_v6 = vpop.f32.mrb[45].mxu0  ;;  %v1061_v51 = vadd.f32 %v1060_v54, %v3593_v16  ;;  %v1062_v48 = vpop.f32.mrb[45].mxu1 }
 0x2eb   :  { %2976 = verf.f32 %v1305_v41  ;;  %v880_v29 = vadd.f32 %v879_v6, %v3595_v44  ;;  %v881_v35 = vpop.f32.mrb[46].mxu0  ;;  %v1063_v0 = vadd.f32 %v1062_v48, %v3597_v59  ;;  %v1064_v12 = vpop.f32.mrb[46].mxu1 }
 0x2ec   :  { %2978 = verf.f32 %v1304_v30  ;;  %v1307_v11 = vmul.f32 0.70710677, %v878_v1  ;;  %v883_v19 = vpop.f32.mrb[47].mxu0  ;;  %v1309_v43 = vmul.f32 0.70710677, %v1061_v51  ;;  %v1066_v13 = vpop.f32.mrb[47].mxu1  ;;  %v882_v55 = vadd.f32 %v881_v35, %v3591_v33 }
 0x2ed   :  { %2980 = verf.f32 %v1306_v26  ;;  %v1308_v46 = vmul.f32 0.70710677, %v880_v29  ;;  %v1310_v3 = vmul.f32 0.70710677, %v1063_v0  ;;  %v1065_v4 = vadd.f32 %v1064_v12, %v3593_v16 }
 0x2ee   :  { %2982 = verf.f32 %v1307_v11  ;;  %v884_v40 = vadd.f32 %v883_v19, %v3595_v44  ;;  %v1311_v39 = vmul.f32 0.70710677, %v882_v55  ;;  %v1067_v37 = vadd.f32 %v1066_v13, %v3597_v59 }
 0x2ef   :  { %2984 = verf.f32 %v1309_v43  ;;  %v1313_v61 = vmul.f32 0.70710677, %v1065_v4  ;;  %v4258_v36 = vmul.f32 0.5, %v878_v1  ;;  %v4260_v20 = vmul.f32 0.5, %v1061_v51 }
 0x2f0   :  { %v2967_v14 = vpop.eup %2966  ;;  %2986 = verf.f32 %v1308_v46  ;;  %v1312_v38 = vmul.f32 0.70710677, %v884_v40  ;;  %v4262_v57 = vmul.f32 0.5, %v880_v29  ;;  %v1314_v15 = vmul.f32 0.70710677, %v1067_v37 }
 0x2f1   :  { %v2969_v53 = vpop.eup %2968  ;;  %v887_v22 = vpop.f32.mrb[48].mxu0  ;;  %2988 = verf.f32 %v1310_v3  ;;  %v1539_v58 = vadd.f32 1.0, %v2967_v14  ;;  %v4268_v10 = vmul.f32 0.5, %v1063_v0  ;;  %v4270_v26 = vmul.f32 0.5, %v882_v55 }
 0x2f2   :  { %v1070_v18 = vpop.f32.mrb[48].mxu1  ;;  %v2971_v45 = vpop.eup %2970  ;;  %2990 = verf.f32 %v1311_v39  ;;  %v1541_v42 = vadd.f32 1.0, %v2969_v53  ;;  %v888_v49 = vadd.f32 %v887_v22, %v3591_v33  ;;  %v4275_v51 = vmul.f32 0.5, %v1065_v4 }
 0x2f3   :  { %v889_v34 = vpop.f32.mrb[49].mxu0  ;;  %v2973_v25 = vpop.eup %2972  ;;  %2992 = verf.f32 %v1313_v61  ;;  %v1540_v28 = vadd.f32 1.0, %v2971_v45  ;;  %v1071_v41 = vadd.f32 %v1070_v18, %v3593_v16  ;;  %v4273_v6 = vmul.f32 %v1539_v58, %v1179_v60 }
 0x2f4   :  { %v1072_v9 = vpop.f32.mrb[49].mxu1  ;;  %v891_v7 = vpop.f32.mrb[50].mxu0  ;;  %v1542_v27 = vadd.f32 1.0, %v2973_v25  ;;  %2994 = verf.f32 %v1312_v38  ;;  %v890_v1 = vadd.f32 %v889_v34, %v3595_v44  ;;  %v4277_v29 = vmul.f32 0.5, %v884_v40 }
 0x2f5   :  { %v2975_v21 = vpop.eup %2974  ;;  %v1074_v8 = vpop.f32.mrb[50].mxu1  ;;  %2996 = verf.f32 %v1314_v15  ;;  %v1315_v48 = vmul.f32 0.70710677, %v888_v49  ;;  %v4279_v11 = vmul.f32 %v1541_v42, %v1181_v32  ;;  %v4281_v12 = vmul.f32 %v1540_v28, %v1180_v52 }
 0x2f6   :  { %v893_v56 = vpop.f32.mrb[51].mxu0  ;;  %v2977_v47 = vpop.eup %2976  ;;  %v1543_v31 = vadd.f32 1.0, %v2975_v21  ;;  %v4283_v0 = vmul.f32 0.5, %v1067_v37  ;;  %v1317_v19 = vmul.f32 0.70710677, %v1071_v41  ;;  %v4285_v3 = vmul.f32 %v1542_v27, %v1182_v23 }
 0x2f7   :  { %v4264_v63 = vpop.f32.mrb[51].mxu1  ;;  %v2979_v50 = vpop.eup %2978  ;;  %v1545_v17 = vadd.f32 1.0, %v2977_v47  ;;  %2998 = verf.f32 %v1315_v48  ;;  %v1316_v52 = vmul.f32 0.70710677, %v890_v1  ;;  %v1073_v23 = vadd.f32 %v1072_v9, %v3597_v59 }
 0x2f8   :  { %v2981_v30 = vpop.eup %2980  ;;  %v4287_v60 = vmul.f32 %v1543_v31, %v1183_v2  ;;  %v1544_v4 = vadd.f32 1.0, %v2979_v50  ;;  %3000 = verf.f32 %v1317_v19  ;;  %v892_v2 = vadd.f32 %v891_v7, %v3591_v33 }
 0x2f9   :  { %v2983_v54 = vpop.eup %2982  ;;  %v897_v43 = vpop.f32.mrb[52].mxu0  ;;  %v4289_v55 = vmul.f32 %v1545_v17, %v1185_v62  ;;  %v1546_v53 = vadd.f32 1.0, %v2981_v30  ;;  %3002 = verf.f32 %v1316_v52  ;;  %v1075_v25 = vadd.f32 %v1074_v8, %v3593_v16 }
 0x2fa   :  { %v2985_v35 = vpop.eup %2984  ;;  %v1080_v13 = vpop.f32.mrb[52].mxu1  ;;  %v1547_v32 = vadd.f32 1.0, %v2983_v54  ;;  %v894_v38 = vadd.f32 %v893_v56, %v3595_v44  ;;  %v4304_v58 = vmul.f32 %v1544_v4, %v4254_v5  ;;  %v4306_v42 = vmul.f32 0.5, %v888_v49 }
 0x2fb   :  { %v2987_v46 = vpop.eup %2986  ;;  %v899_v40 = vpop.f32.mrb[53].mxu0  ;;  %v1549_v18 = vadd.f32 1.0, %v2985_v35  ;;  %v4308_v9 = vmul.f32 0.5, %v1071_v41  ;;  %v1318_v7 = vmul.f32 0.70710677, %v1073_v23  ;;  %v4311_v28 = vmul.f32 %v1546_v53, %v4256_v24 }
 0x2fc   :  { %v1082_v14 = vpop.f32.mrb[53].mxu1  ;;  %v4291_v39 = vpop.f32.mrb[54].mxu0  ;;  %v1548_v34 = vadd.f32 1.0, %v2987_v46  ;;  %v4314_v27 = vmul.f32 %v1547_v32, %v4258_v36  ;;  %v4316_v15 = vmul.f32 0.5, %v890_v1  ;;  %v1319_v8 = vmul.f32 0.70710677, %v892_v2 }
 0x2fd   :  { %v4293_v37 = vpop.f32.mrb[54].mxu1  ;;  %v2989_v22 = vpop.eup %2988  ;;  %v4319_v56 = vmul.f32 %v1549_v18, %v4260_v20  ;;  %3004 = verf.f32 %v1318_v7  ;;  %v1321_v50 = vmul.f32 0.70710677, %v1075_v25  ;;  %v1320_v24 = vmul.f32 0.70710677, %v894_v38 }
 0x2fe   :  { %v4297_v62 = vpop.f32.mrb[55].mxu0  ;;  %v4299_v45 = vpop.f32.mrb[55].mxu1  ;;  %v1550_v5 = vadd.f32 1.0, %v2989_v22  ;;  %v4322_v17 = vmul.f32 %v1548_v34, %v4262_v57  ;;  %3006 = verf.f32 %v1319_v8  ;;  %v1077_v20 = vadd.f32 %v4264_v63, %v3597_v59 }
 0x2ff   :  { %v2991_v61 = vpop.eup %2990  ;;  %3008 = verf.f32 %v1321_v50  ;;  %v898_v57 = vadd.f32 %v897_v43, %v3591_v33  ;;  %v1081_v35 = vadd.f32 %v1080_v13, %v3593_v16  ;;  %v900_v19 = vadd.f32 %v899_v40, %v3595_v44 }
 0x300   :  { %v2993_v21 = vpop.eup %2992  ;;  %v1551_v49 = vadd.f32 1.0, %v2991_v61  ;;  %3010 = verf.f32 %v1320_v24  ;;  %v4342_v53 = vmul.f32 %v1550_v5, %v4268_v10  ;;  %v1322_v63 = vmul.f32 0.70710677, %v1077_v20 }
 0x301   :  { %v2995_v47 = vpop.eup %2994  ;;  %v4324_v41 = vpop.f32.mrb[56].mxu0  ;;  %v1553_v30 = vadd.f32 1.0, %v2993_v21  ;;  %v1083_v52 = vadd.f32 %v1082_v14, %v3597_v59  ;;  %v4349_v61 = vmul.f32 0.5, %v1073_v23  ;;  %v4351_v13 = vmul.f32 0.5, %v892_v2 }
 0x302   :  { %v2997_v31 = vpop.eup %2996  ;;  %v4326_v36 = vpop.f32.mrb[56].mxu1  ;;  %v1552_v1 = vadd.f32 1.0, %v2995_v47  ;;  %v4353_v40 = vmul.f32 0.5, %v1075_v25  ;;  %v1323_v34 = vmul.f32 0.70710677, %v898_v57  ;;  %v4356_v10 = vmul.f32 %v1551_v49, %v4270_v26 }
 0x303   :  { %v4330_v54 = vpop.f32.mrb[57].mxu0  ;;  %v4332_v48 = vpop.f32.mrb[57].mxu1  ;;  %v1554_v32 = vadd.f32 1.0, %v2997_v31  ;;  %v4359_v7 = vmul.f32 %v1553_v30, %v4275_v51  ;;  %3012 = verf.f32 %v1322_v63  ;;  %v1325_v14 = vmul.f32 0.70710677, %v1081_v35 }
 0x304   :  { %v4337_v46 = vpop.f32.mrb[58].mxu0  ;;  %v4339_v4 = vpop.f32.mrb[58].mxu1  ;;  %v4362_v8 = vmul.f32 %v1552_v1, %v4277_v29  ;;  %v4364_v23 = vmul.f32 0.5, %v894_v38  ;;  %3014 = verf.f32 %v1323_v34  ;;  %v1324_v2 = vmul.f32 0.70710677, %v900_v19 }
 0x305   :  { %v4345_v22 = vpop.f32.mrb[59].mxu0  ;;  %v4347_v18 = vpop.f32.mrb[59].mxu1  ;;  %v4367_v25 = vmul.f32 %v1554_v32, %v4283_v0  ;;  %3016 = verf.f32 %v1325_v14  ;;  %v1326_v26 = vmul.f32 0.70710677, %v1083_v52  ;;  %v1740_v51 = vpack.c.bf16 %v4304_v58, %v4281_v12 }
 0x306   :  { %v2999_v43 = vpop.eup %2998  ;;  %v1742_v31 = vpack.c.bf16 %v4311_v28, %v4285_v3  ;;  %v902_v29 = vadd.f32 %v4291_v39, %v3591_v33  ;;  %3018 = verf.f32 %v1324_v2  ;;  %v1085_v0 = vadd.f32 %v4293_v37, %v3593_v16 }
 0x307   :  { %v3001_v21 = vpop.eup %3000  ;;  %v1555_v5 = vadd.f32 1.0, %v2999_v43  ;;  %v1739_v24 = vpack.c.bf16 %v4287_v60, %v4273_v6  ;;  %v1202_v1 = vmul.f32 0.5, %v1077_v20  ;;  %v1203_v32 = vmul.f32 0.5, %v898_v57  ;;  %2134 = vmatprep.mubr.bf16.mxu0 %v1740_v51 }
 0x308   :  { %v3003_v47 = vpop.eup %3002  ;;  %v1557_v50 = vadd.f32 1.0, %v3001_v21  ;;  %2287 = vmatprep.mubr.bf16.mxu1 %v1742_v31  ;;  %v1327_v12 = vmul.f32 0.70710677, %v902_v29  ;;  %v1741_v3 = vpack.c.bf16 %v4289_v55, %v4279_v11  ;;  %v4381_v39 = vmul.f32 0.5, %v1081_v35 }
 0x309   :  { %v3005_v38 = vpop.eup %3004  ;;  %v1556_v49 = vadd.f32 1.0, %v3003_v47  ;;  %3020 = verf.f32 %v1326_v26  ;;  %v1329_v28 = vmul.f32 0.70710677, %v1085_v0  ;;  %2135 = vmatmul.mubr.bf16.gmra.mrb[100].mxu0 %v1739_v24  ;;  %v904_v37 = vadd.f32 %v4297_v62, %v3595_v44 }
 0x30a   :  { %v3007_v30 = vpop.eup %3006  ;;  %v4386_v6 = vmul.f32 %v1555_v5, %v4306_v42  ;;  %v4388_v60 = vmul.f32 0.5, %v900_v19  ;;  %3022 = verf.f32 %v1327_v12  ;;  %2288 = vmatmul.mubr.bf16.gmra.mrb[100].mxu1 %v1741_v3  ;;  %v1087_v11 = vadd.f32 %v4299_v45, %v3597_v59 }
 0x30b   :  { %v3009_v58 = vpop.eup %3008  ;;  %v4393_v55 = vmul.f32 %v1557_v50, %v4308_v9  ;;  %v4396_v20 = vmul.f32 %v1556_v49, %v4316_v15  ;;  %v4398_v57 = vmul.f32 0.5, %v1083_v52  ;;  %3024 = verf.f32 %v1329_v28 }
 0x30c   :  { %v3011_v63 = vpop.eup %3010  ;;  %v1558_v62 = vadd.f32 1.0, %v3005_v38  ;;  %v1559_v35 = vadd.f32 1.0, %v3007_v30  ;;  %v1328_v42 = vmul.f32 0.70710677, %v904_v37  ;;  %v1330_v43 = vmul.f32 0.70710677, %v1087_v11 }
 0x30d   :  { %v3013_v19 = vpop.eup %3012  ;;  %v1561_v34 = vadd.f32 1.0, %v3009_v58  ;;  %v1560_v21 = vadd.f32 1.0, %v3011_v63  ;;  %v4402_v14 = vadd.f32 %v4324_v41, %v3591_v33  ;;  %v4406_v45 = vadd.f32 %v4326_v36, %v3593_v16 }
 0x30e   :  { %v3015_v9 = vpop.eup %3014  ;;  %v1562_v15 = vadd.f32 1.0, %v3013_v19  ;;  %3026 = verf.f32 %v1328_v42  ;;  %v4410_v52 = vadd.f32 %v4330_v54, %v3595_v44  ;;  %v1744_v47 = vpack.c.bf16 %v4362_v8, %v4322_v17 }
 0x30f   :  { %v3017_v2 = vpop.eup %3016  ;;  %v1563_v5 = vadd.f32 1.0, %v3015_v9  ;;  %3028 = verf.f32 %v1330_v43  ;;  %v1331_v41 = vmul.f32 0.70710677, %v4402_v14  ;;  %v4417_v26 = vadd.f32 %v4332_v48, %v3597_v59 }
 0x310   :  { %v1678_v36 = vmul.f32 %v1558_v62, %v4349_v61  ;;  %v1207_v50 = vmul.f32 0.5, %v902_v29  ;;  %v1209_v51 = vmul.f32 0.5, %v1085_v0  ;;  %v1333_v31 = vmul.f32 0.70710677, %v4406_v45  ;;  %2142 = vmatprep.mubr.bf16.mxu0 %v1744_v47  ;;  %v3019_v54 = vpop.eup %3018 }
 0x311   :  { %v4422_v38 = vmul.f32 %v1559_v35, %v4351_v13  ;;  %v4425_v17 = vmul.f32 %v1561_v34, %v4353_v40  ;;  %v1208_v8 = vmul.f32 0.5, %v904_v37  ;;  %v1210_v49 = vmul.f32 0.5, %v1087_v11 }
 0x312   :  { %v1680_v24 = vmul.f32 %v1560_v21, %v4364_v23  ;;  %v1682_v48 = vmul.f32 %v1562_v15, %v1202_v1  ;;  %v1565_v30 = vadd.f32 1.0, %v3017_v2  ;;  %v1332_v61 = vmul.f32 0.70710677, %v4410_v52 }
 0x313   :  { %v3021_v29 = vpop.eup %3020  ;;  %v4429_v0 = vmul.f32 %v1563_v5, %v1203_v32  ;;  %3030 = verf.f32 %v1331_v41  ;;  %v1334_v12 = vmul.f32 0.70710677, %v4417_v26  ;;  %v1746_v13 = vpack.c.bf16 %v4367_v25, %v4342_v53 }
 0x314   :  { %v3023_v3 = vpop.eup %3022  ;;  %v1564_v40 = vadd.f32 1.0, %v3019_v54  ;;  %3032 = verf.f32 %v1333_v31  ;;  %v912_v58 = vadd.f32 %v4337_v46, %v3591_v33  ;;  %v1095_v23 = vadd.f32 %v4339_v4, %v3593_v16 }
 0x315   :  { %v3025_v1 = vpop.eup %3024  ;;  %v1567_v28 = vadd.f32 1.0, %v3023_v3  ;;  %3034 = verf.f32 %v1332_v61  ;;  %2295 = vmatprep.mubr.bf16.mxu1 %v1746_v13  ;;  %v1743_v32 = vpack.c.bf16 %v4356_v10, %v4314_v27  ;;  %v1745_v37 = vpack.c.bf16 %v4359_v7, %v4319_v56 }
 0x316   :  { %v1566_v53 = vadd.f32 1.0, %v3021_v29  ;;  %v1569_v25 = vadd.f32 1.0, %v3025_v1  ;;  %3036 = verf.f32 %v1334_v12  ;;  %v1335_v63 = vmul.f32 0.70710677, %v912_v58 }
 0x317   :  { %v4442_v11 = vmul.f32 %v1567_v28, %v1207_v50  ;;  %v1337_v33 = vmul.f32 0.70710677, %v1095_v23  ;;  %2143 = vmatmul.mubr.bf16.gmra.mrb[104].mxu0 %v1743_v32  ;;  %2296 = vmatmul.mubr.bf16.gmra.mrb[104].mxu1 %v1745_v37  ;;  %v914_v16 = vadd.f32 %v4345_v22, %v3595_v44  ;;  %v1097_v46 = vadd.f32 %v4347_v18, %v3597_v59 }
 0x318   :  { %v3027_v4 = vpop.eup %3026  ;;  %v1689_v27 = vmul.f32 %v1569_v25, %v1209_v51  ;;  %3038 = verf.f32 %v1335_v63  ;;  %v1748_v56 = vpack.c.bf16 %v1680_v24, %v4396_v20  ;;  %v1750_v10 = vpack.c.bf16 %v1682_v48, %v1678_v36 }
 0x319   :  { %v3029_v7 = vpop.eup %3028  ;;  %v1685_v62 = vmul.f32 %v1565_v30, %v4381_v39  ;;  %v1568_v35 = vadd.f32 1.0, %v3027_v4  ;;  %3040 = verf.f32 %v1337_v33  ;;  %v1336_v42 = vmul.f32 0.70710677, %v914_v16 }
 0x31a   :  { %v1684_v43 = vmul.f32 %v1564_v40, %v4388_v60  ;;  %v1570_v19 = vadd.f32 1.0, %v3029_v7  ;;  %v1338_v34 = vmul.f32 0.70710677, %v1097_v46  ;;  %2150 = vmatprep.mubr.bf16.mxu0 %v1748_v56  ;;  %2303 = vmatprep.mubr.bf16.mxu1 %v1750_v10  ;;  %v1747_v44 = vpack.c.bf16 %v4422_v38, %v4386_v6 }
 0x31b   :  { %v1688_v59 = vmul.f32 %v1568_v35, %v1208_v8  ;;  %3042 = verf.f32 %v1336_v42  ;;  %v1749_v22 = vpack.c.bf16 %v4425_v17, %v4393_v55  ;;  %v1751_v18 = vpack.c.bf16 %v4442_v11, %v4429_v0 }
 0x31c   :  { %v1686_v39 = vmul.f32 %v1566_v53, %v4398_v57  ;;  %v1690_v20 = vmul.f32 %v1570_v19, %v1210_v49  ;;  %3044 = verf.f32 %v1338_v34  ;;  %v1753_v60 = vpack.c.bf16 %v1689_v27, %v1685_v62 }
 0x31d   :  { %v3031_v21 = vpop.eup %3030  ;;  %v1752_v9 = vpack.c.bf16 %v1688_v59, %v1684_v43  ;;  %v1211_v50 = vmul.f32 0.5, %v4402_v14  ;;  %v1215_v57 = vmul.f32 0.5, %v912_v58  ;;  %v1213_v31 = vmul.f32 0.5, %v4406_v45 }
 0x31e   :  { %v3033_v15 = vpop.eup %3032  ;;  %v1754_v47 = vpack.c.bf16 %v1690_v20, %v1686_v39  ;;  %v1571_v5 = vadd.f32 1.0, %v3031_v21  ;;  %v1217_v38 = vmul.f32 0.5, %v1095_v23  ;;  %v1212_v24 = vmul.f32 0.5, %v4410_v52 }
 0x31f   :  { %v3035_v2 = vpop.eup %3034  ;;  %2151 = vmatmul.mubr.bf16.gmra.mrb[108].mxu0 %v1747_v44  ;;  %2304 = vmatmul.mubr.bf16.gmra.mrb[108].mxu1 %v1749_v22  ;;  %v1573_v41 = vadd.f32 1.0, %v3033_v15  ;;  %v1216_v12 = vmul.f32 0.5, %v914_v16  ;;  %v1214_v14 = vmul.f32 0.5, %v4417_v26  ;;  %v1218_v3 = vmul.f32 0.5, %v1097_v46  ;;  %v4465_v26 = vld [vmem:[%s4518_s6] ss:$0 sm:$0xff] }
 0x320   :  { %v3037_v6 = vpop.eup %3036  ;;  %2158 = vmatprep.mubr.bf16.mxu0 %v1752_v9  ;;  %2311 = vmatprep.mubr.bf16.mxu1 %v1754_v47  ;;  %v1572_v54 = vadd.f32 1.0, %v3035_v2  ;;  %v1691_v49 = vmul.f32 %v1571_v5, %v1211_v50  ;;  %s3150_s6 = smov [#allocation8]  }
 0x321   :  { %v1574_v48 = vadd.f32 1.0, %v3037_v6  ;;  %v1693_v29 = vmul.f32 %v1573_v41, %v1213_v31  ;;  %s2363_s22 = sshll.u32 %s3150_s6, 4  ;;  %s2364_s22 = int_to_ptr.vmem [resolvable:$true] %s2363_s22 }
 0x322   :  { %v3039_v55 = vpop.eup %3038  ;;  %v1692_v58 = vmul.f32 %v1572_v54, %v1212_v24  ;;  %s3112_s23 = scalar_lea.vmem %s2364_s22, 3840  ;;  %p3117_p11 = scmp.lt.s32.totalorder %s2364_s22, %s2364_s22 }
 0x323   :  { %v3041_v36 = vpop.eup %3040  ;;  %v1575_v51 = vadd.f32 1.0, %v3039_v55  ;;  %v1694_v28 = vmul.f32 %v1574_v48, %v1214_v14  ;;  %p3113_p10 = scmp.ne.s32.totalorder %s2364_s22, %s3112_s23  ;;  %p3118_p12 = scmp.lt.s32.totalorder %s3112_s23, %s3112_s23 }
 0x324   :  { %v1577_v17 = vadd.f32 1.0, %v3041_v36 }
 0x325   :  { %v3043_v8 = vpop.eup %3042  ;;  %v1695_v30 = vmul.f32 %v1575_v51, %v1215_v57  ;;  %p3119_p13 = por %p3118_p12, %p3117_p11 }
 0x326   :  { %v3045_v61 = vpop.eup %3044  ;;  %v1697_v0 = vmul.f32 %v1577_v17, %v1217_v38  ;;  %v1576_v13 = vadd.f32 1.0, %v3043_v8 }
 0x327   :  { %v1578_v40 = vadd.f32 1.0, %v3045_v61  ;;  %2159 = vmatmul.mubr.bf16.gmra.mrb[112].mxu0 %v1751_v18  ;;  %2312 = vmatmul.mubr.bf16.gmra.mrb[112].mxu1 %v1753_v60  ;;  %v1755_v45 = vpack.c.bf16 %v1695_v30, %v1691_v49  ;;  %p3120_p0 = pnand %p3119_p13, %p3113_p10 }
 0x328   :  { %v1696_v23 = vmul.f32 %v1576_v13, %v1216_v12  ;;  %v1757_v1 = vpack.c.bf16 %v1697_v0, %v1693_v29 }
 0x329   :  { %v1698_v32 = vmul.f32 %v1578_v40, %v1218_v3 }
 0x32a   :  { %v1756_v52 = vpack.c.bf16 %v1696_v23, %v1692_v58 }
 0x32b   :  { %v1758_v37 = vpack.c.bf16 %v1698_v32, %v1694_v28 }
 0x32c   :  { %2166 = vmatprep.mubr.bf16.mxu0 %v1756_v52 }
 0x32d   :  { %2319 = vmatprep.mubr.bf16.mxu1 %v1758_v37 }
 0x32f   :  { %2167 = vmatmul.mubr.bf16.gmra.mrb[116].mxu0 %v1755_v45  ;;  %2320 = vmatmul.mubr.bf16.gmra.mrb[116].mxu1 %v1757_v1 }
 0x341   :  { %v2459_v53 = vpop.f32.mrb[60].mxu0  ;;  %v2565_v25 = vpop.f32.mrb[60].mxu1 }
 0x342   :  { %v2460_v63 = vpop.f32.mrb[61].mxu0  ;;  %v2566_v11 = vpop.f32.mrb[61].mxu1 }
 0x343   :  { %v2461_v33 = vadd.f32 %v2460_v63, %v2459_v53  ;;  %v2567_v16 = vadd.f32 %v2566_v11, %v2565_v25  ;;  %v2462_v46 = vpop.f32.mrb[62].mxu0  ;;  %v2568_v4 = vpop.f32.mrb[62].mxu1 }
 0x344   :  { %v2463_v27 = vpop.f32.mrb[63].mxu0  ;;  %v2569_v56 = vpop.f32.mrb[63].mxu1 }
 0x345   :  { %v2057_v10 = vadd.f32 %v2461_v33, %v4465_v26  ;;  %v2464_v7 = vadd.f32 %v2463_v27, %v2462_v46  ;;  %v2570_v62 = vadd.f32 %v2569_v56, %v2568_v4 }
 0x347   :  { %v2210_v35 = vadd.f32 %v2567_v16, %v2057_v10  ;;  %v2060_v42 = vadd.f32 %v2464_v7, %v4465_v26 }
 0x349   :  { %2328 = vst [vmem:[#allocation8] sm:$0xff] %v2210_v35  ;;  %v2213_v43 = vadd.f32 %v2570_v62, %v2060_v42 }
 0x34b   :  { %2329 = vst [vmem:[#allocation8 + $0x8] sm:$0xff] %v2213_v43 }
 0x350   :  { %v2465_v19 = vpop.f32.mrb[64].mxu0 }
 0x351   :  { %v2571_v34 = vpop.f32.mrb[64].mxu1  ;;  %v2466_v44 = vpop.f32.mrb[65].mxu0 }
 0x352   :  { %v2572_v59 = vpop.f32.mrb[65].mxu1  ;;  %v2467_v22 = vadd.f32 %v2466_v44, %v2465_v19  ;;  %v2468_v39 = vpop.f32.mrb[66].mxu0 }
 0x353   :  { %v2573_v18 = vadd.f32 %v2572_v59, %v2571_v34  ;;  %v2574_v20 = vpop.f32.mrb[66].mxu1  ;;  %v2469_v60 = vpop.f32.mrb[67].mxu0 }
 0x354   :  { %v2575_v21 = vpop.f32.mrb[67].mxu1  ;;  %v2065_v9 = vadd.f32 %v2467_v22, %v4465_v26  ;;  %v2470_v15 = vadd.f32 %v2469_v60, %v2468_v39 }
 0x355   :  { %v2576_v47 = vadd.f32 %v2575_v21, %v2574_v20 }
 0x356   :  { %v2218_v2 = vadd.f32 %v2573_v18, %v2065_v9  ;;  %v2068_v6 = vadd.f32 %v2470_v15, %v4465_v26 }
 0x358   :  { %2330 = vst [vmem:[#allocation8 + $0x10] sm:$0xff] %v2218_v2  ;;  %v2221_v5 = vadd.f32 %v2576_v47, %v2068_v6 }
 0x35a   :  { %2331 = vst [vmem:[#allocation8 + $0x18] sm:$0xff] %v2221_v5 }
 0x35e   :  { %v2577_v41 = vpop.f32.mrb[68].mxu1 }
 0x35f   :  { %v2578_v50 = vpop.f32.mrb[69].mxu1 }
 0x360   :  { %v2471_v55 = vpop.f32.mrb[68].mxu0  ;;  %v2579_v51 = vadd.f32 %v2578_v50, %v2577_v41  ;;  %v2580_v54 = vpop.f32.mrb[70].mxu1 }
 0x361   :  { %v2472_v36 = vpop.f32.mrb[69].mxu0  ;;  %v2581_v17 = vpop.f32.mrb[71].mxu1 }
 0x362   :  { %v2473_v57 = vadd.f32 %v2472_v36, %v2471_v55  ;;  %v2474_v31 = vpop.f32.mrb[70].mxu0  ;;  %v2582_v24 = vadd.f32 %v2581_v17, %v2580_v54 }
 0x363   :  { %v2475_v38 = vpop.f32.mrb[71].mxu0 }
 0x364   :  { %v2073_v8 = vadd.f32 %v2473_v57, %v4465_v26  ;;  %v2476_v49 = vadd.f32 %v2475_v38, %v2474_v31 }
 0x366   :  { %v2226_v48 = vadd.f32 %v2579_v51, %v2073_v8  ;;  %v2076_v30 = vadd.f32 %v2476_v49, %v4465_v26 }
 0x368   :  { %2332 = vst [vmem:[#allocation8 + $0x20] sm:$0xff] %v2226_v48  ;;  %v2229_v61 = vadd.f32 %v2582_v24, %v2076_v30 }
 0x36a   :  { %2333 = vst [vmem:[#allocation8 + $0x28] sm:$0xff] %v2229_v61 }
 0x36b   :  { %v2477_v29 = vpop.f32.mrb[72].mxu0 }
 0x36c   :  { %v2583_v0 = vpop.f32.mrb[72].mxu1  ;;  %v2478_v12 = vpop.f32.mrb[73].mxu0 }
 0x36d   :  { %v2479_v13 = vadd.f32 %v2478_v12, %v2477_v29  ;;  %v2584_v14 = vpop.f32.mrb[73].mxu1  ;;  %v2480_v3 = vpop.f32.mrb[74].mxu0 }
 0x36e   :  { %v2585_v40 = vadd.f32 %v2584_v14, %v2583_v0  ;;  %v2586_v45 = vpop.f32.mrb[74].mxu1  ;;  %v2481_v58 = vpop.f32.mrb[75].mxu0 }
 0x36f   :  { %v2081_v23 = vadd.f32 %v2479_v13, %v4465_v26  ;;  %v2482_v1 = vadd.f32 %v2481_v58, %v2480_v3  ;;  %v2587_v28 = vpop.f32.mrb[75].mxu1 }
 0x370   :  { %v2588_v32 = vadd.f32 %v2587_v28, %v2586_v45 }
 0x371   :  { %v2234_v52 = vadd.f32 %v2585_v40, %v2081_v23  ;;  %v2084_v37 = vadd.f32 %v2482_v1, %v4465_v26 }
 0x373   :  { %2334 = vst [vmem:[#allocation8 + $0x30] sm:$0xff] %v2234_v52  ;;  %v2237_v53 = vadd.f32 %v2588_v32, %v2084_v37 }
 0x375   :  { %2335 = vst [vmem:[#allocation8 + $0x38] sm:$0xff] %v2237_v53 }
 0x378   :  { %v2483_v25 = vpop.f32.mrb[76].mxu0 }
 0x379   :  { %v2484_v63 = vpop.f32.mrb[77].mxu0 }
 0x37a   :  { %v2485_v11 = vadd.f32 %v2484_v63, %v2483_v25  ;;  %v2486_v33 = vpop.f32.mrb[78].mxu0 }
 0x37b   :  { %v2589_v16 = vpop.f32.mrb[76].mxu1  ;;  %v2487_v46 = vpop.f32.mrb[79].mxu0 }
 0x37c   :  { %v2089_v4 = vadd.f32 %v2485_v11, %v4465_v26  ;;  %v2590_v27 = vpop.f32.mrb[77].mxu1  ;;  %v2488_v56 = vadd.f32 %v2487_v46, %v2486_v33 }
 0x37d   :  { %v2591_v10 = vadd.f32 %v2590_v27, %v2589_v16  ;;  %v2592_v7 = vpop.f32.mrb[78].mxu1 }
 0x37e   :  { %v2092_v62 = vadd.f32 %v2488_v56, %v4465_v26  ;;  %v2593_v35 = vpop.f32.mrb[79].mxu1 }
 0x37f   :  { %v2242_v42 = vadd.f32 %v2591_v10, %v2089_v4  ;;  %v2594_v43 = vadd.f32 %v2593_v35, %v2592_v7 }
 0x381   :  { %2336 = vst [vmem:[#allocation8 + $0x40] sm:$0xff] %v2242_v42  ;;  %v2245_v19 = vadd.f32 %v2594_v43, %v2092_v62 }
 0x383   :  { %2337 = vst [vmem:[#allocation8 + $0x48] sm:$0xff] %v2245_v19 }
 0x385   :  { %v2489_v34 = vpop.f32.mrb[80].mxu0 }
 0x386   :  { %v2490_v44 = vpop.f32.mrb[81].mxu0 }
 0x387   :  { %v2491_v59 = vadd.f32 %v2490_v44, %v2489_v34  ;;  %v2492_v22 = vpop.f32.mrb[82].mxu0 }
 0x388   :  { %v2595_v18 = vpop.f32.mrb[80].mxu1  ;;  %v2493_v39 = vpop.f32.mrb[83].mxu0 }
 0x389   :  { %v2097_v20 = vadd.f32 %v2491_v59, %v4465_v26  ;;  %v2596_v60 = vpop.f32.mrb[81].mxu1  ;;  %v2494_v21 = vadd.f32 %v2493_v39, %v2492_v22 }
 0x38a   :  { %v2597_v9 = vadd.f32 %v2596_v60, %v2595_v18  ;;  %v2598_v15 = vpop.f32.mrb[82].mxu1 }
 0x38b   :  { %v2100_v47 = vadd.f32 %v2494_v21, %v4465_v26  ;;  %v2599_v2 = vpop.f32.mrb[83].mxu1 }
 0x38c   :  { %v2250_v6 = vadd.f32 %v2597_v9, %v2097_v20  ;;  %v2600_v5 = vadd.f32 %v2599_v2, %v2598_v15 }
 0x38e   :  { %2338 = vst [vmem:[#allocation8 + $0x50] sm:$0xff] %v2250_v6  ;;  %v2253_v55 = vadd.f32 %v2600_v5, %v2100_v47 }
 0x390   :  { %2339 = vst [vmem:[#allocation8 + $0x58] sm:$0xff] %v2253_v55 }
 0x392   :  { %v2495_v41 = vpop.f32.mrb[84].mxu0 }
 0x393   :  { %v2496_v36 = vpop.f32.mrb[85].mxu0 }
 0x394   :  { %v2497_v50 = vadd.f32 %v2496_v36, %v2495_v41  ;;  %v2498_v57 = vpop.f32.mrb[86].mxu0 }
 0x395   :  { %v2601_v51 = vpop.f32.mrb[84].mxu1  ;;  %v2499_v31 = vpop.f32.mrb[87].mxu0 }
 0x396   :  { %v2105_v54 = vadd.f32 %v2497_v50, %v4465_v26  ;;  %v2602_v38 = vpop.f32.mrb[85].mxu1  ;;  %v2500_v17 = vadd.f32 %v2499_v31, %v2498_v57 }
 0x397   :  { %v2603_v8 = vadd.f32 %v2602_v38, %v2601_v51  ;;  %v2604_v49 = vpop.f32.mrb[86].mxu1 }
 0x398   :  { %v2108_v24 = vadd.f32 %v2500_v17, %v4465_v26  ;;  %v2605_v48 = vpop.f32.mrb[87].mxu1 }
 0x399   :  { %v2258_v30 = vadd.f32 %v2603_v8, %v2105_v54  ;;  %v2606_v61 = vadd.f32 %v2605_v48, %v2604_v49 }
 0x39a   :  { %v2501_v29 = vpop.f32.mrb[88].mxu0 }
 0x39b   :  { %2340 = vst [vmem:[#allocation8 + $0x60] sm:$0xff] %v2258_v30  ;;  %v2261_v0 = vadd.f32 %v2606_v61, %v2108_v24  ;;  %v2502_v12 = vpop.f32.mrb[89].mxu0 }
 0x39c   :  { %v2503_v13 = vadd.f32 %v2502_v12, %v2501_v29  ;;  %v2504_v14 = vpop.f32.mrb[90].mxu0 }
 0x39d   :  { %2341 = vst [vmem:[#allocation8 + $0x68] sm:$0xff] %v2261_v0  ;;  %v2607_v3 = vpop.f32.mrb[88].mxu1  ;;  %v2505_v40 = vpop.f32.mrb[91].mxu0 }
 0x39e   :  { %v2113_v45 = vadd.f32 %v2503_v13, %v4465_v26  ;;  %v2608_v58 = vpop.f32.mrb[89].mxu1  ;;  %v2506_v23 = vadd.f32 %v2505_v40, %v2504_v14 }
 0x39f   :  { %v2609_v1 = vadd.f32 %v2608_v58, %v2607_v3  ;;  %v2610_v28 = vpop.f32.mrb[90].mxu1 }
 0x3a0   :  { %v2116_v32 = vadd.f32 %v2506_v23, %v4465_v26  ;;  %v2611_v52 = vpop.f32.mrb[91].mxu1 }
 0x3a1   :  { %v2266_v37 = vadd.f32 %v2609_v1, %v2113_v45  ;;  %v2612_v53 = vadd.f32 %v2611_v52, %v2610_v28 }
 0x3a2   :  { %v2507_v25 = vpop.f32.mrb[92].mxu0 }
 0x3a3   :  { %2342 = vst [vmem:[#allocation8 + $0x70] sm:$0xff] %v2266_v37  ;;  %v2269_v63 = vadd.f32 %v2612_v53, %v2116_v32  ;;  %v2508_v11 = vpop.f32.mrb[93].mxu0 }
 0x3a4   :  { %v2509_v33 = vadd.f32 %v2508_v11, %v2507_v25  ;;  %v2510_v16 = vpop.f32.mrb[94].mxu0 }
 0x3a5   :  { %2343 = vst [vmem:[#allocation8 + $0x78] sm:$0xff] %v2269_v63  ;;  %v2613_v46 = vpop.f32.mrb[92].mxu1  ;;  %v2511_v4 = vpop.f32.mrb[95].mxu0 }
 0x3a6   :  { %v2121_v27 = vadd.f32 %v2509_v33, %v4465_v26  ;;  %v2614_v56 = vpop.f32.mrb[93].mxu1  ;;  %v2512_v10 = vadd.f32 %v2511_v4, %v2510_v16 }
 0x3a7   :  { %v2615_v7 = vadd.f32 %v2614_v56, %v2613_v46  ;;  %v2616_v62 = vpop.f32.mrb[94].mxu1 }
 0x3a8   :  { %v2124_v35 = vadd.f32 %v2512_v10, %v4465_v26  ;;  %v2617_v42 = vpop.f32.mrb[95].mxu1 }
 0x3a9   :  { %v2274_v43 = vadd.f32 %v2615_v7, %v2121_v27  ;;  %v2618_v19 = vadd.f32 %v2617_v42, %v2616_v62 }
 0x3aa   :  { %v2513_v34 = vpop.f32.mrb[96].mxu0 }
 0x3ab   :  { %2344 = vst [vmem:[#allocation8 + $0x80] sm:$0xff] %v2274_v43  ;;  %v2277_v44 = vadd.f32 %v2618_v19, %v2124_v35  ;;  %v2514_v59 = vpop.f32.mrb[97].mxu0 }
 0x3ac   :  { %v2515_v22 = vadd.f32 %v2514_v59, %v2513_v34  ;;  %v2516_v18 = vpop.f32.mrb[98].mxu0 }
 0x3ad   :  { %2345 = vst [vmem:[#allocation8 + $0x88] sm:$0xff] %v2277_v44  ;;  %v2619_v39 = vpop.f32.mrb[96].mxu1  ;;  %v2517_v20 = vpop.f32.mrb[99].mxu0 }
 0x3ae   :  { %v2129_v60 = vadd.f32 %v2515_v22, %v4465_v26  ;;  %v2620_v21 = vpop.f32.mrb[97].mxu1  ;;  %v2518_v9 = vadd.f32 %v2517_v20, %v2516_v18 }
 0x3af   :  { %v2621_v15 = vadd.f32 %v2620_v21, %v2619_v39  ;;  %v2622_v47 = vpop.f32.mrb[98].mxu1 }
 0x3b0   :  { %v2132_v2 = vadd.f32 %v2518_v9, %v4465_v26  ;;  %v2623_v6 = vpop.f32.mrb[99].mxu1 }
 0x3b1   :  { %v2282_v5 = vadd.f32 %v2621_v15, %v2129_v60  ;;  %v2624_v55 = vadd.f32 %v2623_v6, %v2622_v47 }
 0x3b3   :  { %2346 = vst [vmem:[#allocation8 + $0x90] sm:$0xff] %v2282_v5  ;;  %v2285_v41 = vadd.f32 %v2624_v55, %v2132_v2 }
 0x3b5   :  { %2347 = vst [vmem:[#allocation8 + $0x98] sm:$0xff] %v2285_v41 }
 0x3dc   :  { %v2519_v36 = vpop.f32.mrb[100].mxu0 }
 0x3dd   :  { %v2625_v50 = vpop.f32.mrb[100].mxu1  ;;  %v2520_v57 = vpop.f32.mrb[101].mxu0 }
 0x3de   :  { %v2521_v51 = vadd.f32 %v2520_v57, %v2519_v36  ;;  %v2626_v31 = vpop.f32.mrb[101].mxu1  ;;  %v2522_v54 = vpop.f32.mrb[102].mxu0 }
 0x3df   :  { %v2627_v38 = vadd.f32 %v2626_v31, %v2625_v50  ;;  %v2628_v17 = vpop.f32.mrb[102].mxu1  ;;  %v2523_v8 = vpop.f32.mrb[103].mxu0 }
 0x3e0   :  { %v2137_v49 = vadd.f32 %v2521_v51, %v4465_v26  ;;  %v2524_v24 = vadd.f32 %v2523_v8, %v2522_v54  ;;  %v2629_v48 = vpop.f32.mrb[103].mxu1 }
 0x3e1   :  { %v2630_v30 = vadd.f32 %v2629_v48, %v2628_v17 }
 0x3e2   :  { %v2290_v61 = vadd.f32 %v2627_v38, %v2137_v49  ;;  %v2140_v29 = vadd.f32 %v2524_v24, %v4465_v26 }
 0x3e4   :  { %2348 = vst [vmem:[#allocation8 + $0xa0] sm:$0xff] %v2290_v61  ;;  %v2293_v0 = vadd.f32 %v2630_v30, %v2140_v29 }
 0x3e6   :  { %2349 = vst [vmem:[#allocation8 + $0xa8] sm:$0xff] %v2293_v0 }
 0x3ea   :  { %v2525_v12 = vpop.f32.mrb[104].mxu0  ;;  %v2631_v13 = vpop.f32.mrb[104].mxu1 }
 0x3eb   :  { %v2526_v14 = vpop.f32.mrb[105].mxu0  ;;  %v2632_v3 = vpop.f32.mrb[105].mxu1 }
 0x3ec   :  { %v2527_v40 = vadd.f32 %v2526_v14, %v2525_v12  ;;  %v2633_v45 = vadd.f32 %v2632_v3, %v2631_v13  ;;  %v2528_v58 = vpop.f32.mrb[106].mxu0  ;;  %v2634_v23 = vpop.f32.mrb[106].mxu1 }
 0x3ed   :  { %v2529_v1 = vpop.f32.mrb[107].mxu0  ;;  %v2635_v28 = vpop.f32.mrb[107].mxu1 }
 0x3ee   :  { %v2145_v32 = vadd.f32 %v2527_v40, %v4465_v26  ;;  %v2530_v52 = vadd.f32 %v2529_v1, %v2528_v58  ;;  %v2636_v37 = vadd.f32 %v2635_v28, %v2634_v23 }
 0x3f0   :  { %v2298_v53 = vadd.f32 %v2633_v45, %v2145_v32  ;;  %v2148_v25 = vadd.f32 %v2530_v52, %v4465_v26 }
 0x3f2   :  { %2350 = vst [vmem:[#allocation8 + $0xb0] sm:$0xff] %v2298_v53  ;;  %v2301_v63 = vadd.f32 %v2636_v37, %v2148_v25  ;;  %v2531_v11 = vpop.f32.mrb[108].mxu0  ;;  %v2637_v33 = vpop.f32.mrb[108].mxu1 }
 0x3f3   :  { %v2532_v16 = vpop.f32.mrb[109].mxu0  ;;  %v2638_v46 = vpop.f32.mrb[109].mxu1 }
 0x3f4   :  { %2351 = vst [vmem:[#allocation8 + $0xb8] sm:$0xff] %v2301_v63  ;;  %v2533_v4 = vadd.f32 %v2532_v16, %v2531_v11  ;;  %v2639_v27 = vadd.f32 %v2638_v46, %v2637_v33  ;;  %v2534_v56 = vpop.f32.mrb[110].mxu0  ;;  %v2640_v10 = vpop.f32.mrb[110].mxu1 }
 0x3f5   :  { %v2535_v7 = vpop.f32.mrb[111].mxu0  ;;  %v2641_v62 = vpop.f32.mrb[111].mxu1 }
 0x3f6   :  { %v2153_v35 = vadd.f32 %v2533_v4, %v4465_v26  ;;  %v2536_v42 = vadd.f32 %v2535_v7, %v2534_v56  ;;  %v2642_v43 = vadd.f32 %v2641_v62, %v2640_v10 }
 0x3f8   :  { %v2306_v19 = vadd.f32 %v2639_v27, %v2153_v35  ;;  %v2156_v34 = vadd.f32 %v2536_v42, %v4465_v26 }
 0x3fa   :  { %2352 = vst [vmem:[#allocation8 + $0xc0] sm:$0xff] %v2306_v19  ;;  %v2309_v44 = vadd.f32 %v2642_v43, %v2156_v34  ;;  %v2537_v59 = vpop.f32.mrb[112].mxu0  ;;  %v2643_v22 = vpop.f32.mrb[112].mxu1 }
 0x3fb   :  { %v2538_v18 = vpop.f32.mrb[113].mxu0  ;;  %v2644_v39 = vpop.f32.mrb[113].mxu1 }
 0x3fc   :  { %2353 = vst [vmem:[#allocation8 + $0xc8] sm:$0xff] %v2309_v44  ;;  %v2539_v20 = vadd.f32 %v2538_v18, %v2537_v59  ;;  %v2645_v60 = vadd.f32 %v2644_v39, %v2643_v22  ;;  %v2540_v21 = vpop.f32.mrb[114].mxu0  ;;  %v2646_v9 = vpop.f32.mrb[114].mxu1 }
 0x3fd   :  { %v2541_v15 = vpop.f32.mrb[115].mxu0  ;;  %v2647_v47 = vpop.f32.mrb[115].mxu1 }
 0x3fe   :  { %v2161_v2 = vadd.f32 %v2539_v20, %v4465_v26  ;;  %v2542_v6 = vadd.f32 %v2541_v15, %v2540_v21  ;;  %v2648_v5 = vadd.f32 %v2647_v47, %v2646_v9 }
 0x400   :  { %v2314_v55 = vadd.f32 %v2645_v60, %v2161_v2  ;;  %v2164_v41 = vadd.f32 %v2542_v6, %v4465_v26 }
 0x402   :  { %2354 = vst [vmem:[#allocation8 + $0xd0] sm:$0xff] %v2314_v55  ;;  %v2317_v36 = vadd.f32 %v2648_v5, %v2164_v41  ;;  %v2543_v50 = vpop.f32.mrb[116].mxu0  ;;  %v2649_v57 = vpop.f32.mrb[116].mxu1 }
 0x403   :  { %v2544_v51 = vpop.f32.mrb[117].mxu0  ;;  %v2650_v31 = vpop.f32.mrb[117].mxu1 }
 0x404   :  { %2355 = vst [vmem:[#allocation8 + $0xd8] sm:$0xff] %v2317_v36  ;;  %v2545_v54 = vadd.f32 %v2544_v51, %v2543_v50  ;;  %v2651_v38 = vadd.f32 %v2650_v31, %v2649_v57  ;;  %v2546_v17 = vpop.f32.mrb[118].mxu0  ;;  %v2652_v8 = vpop.f32.mrb[118].mxu1 }
 0x405   :  { %v2547_v49 = vpop.f32.mrb[119].mxu0  ;;  %v2653_v24 = vpop.f32.mrb[119].mxu1 }
 0x406   :  { %v2169_v48 = vadd.f32 %v2545_v54, %v4465_v26  ;;  %v2548_v30 = vadd.f32 %v2547_v49, %v2546_v17  ;;  %v2654_v61 = vadd.f32 %v2653_v24, %v2652_v8 }
 0x408   :  { %v2322_v29 = vadd.f32 %v2651_v38, %v2169_v48  ;;  %v2172_v0 = vadd.f32 %v2548_v30, %v4465_v26 }
 0x40a   :  { %2356 = vst [vmem:[#allocation8 + $0xe0] sm:$0xff] %v2322_v29  ;;  %v2325_v12 = vadd.f32 %v2654_v61, %v2172_v0 }
 0x40c   :  { %2357 = vst [vmem:[#allocation8 + $0xe8] sm:$0xff] %v2325_v12 }
 0x40d   :  { %3123 = shalt.err (!%p3120_p0)
}
 0x40e   :  { %s3124_s27 = scalar_lea.hbm %s4519_s7, 3840 }
 0x40f   :  { %p3125_p1 = scmp.ne.s32.totalorder %s4519_s7, %s3124_s27  ;;  %p3128_p2 = scmp.lt.u32.totalorder %s3124_s27, %s4519_s7 }
 0x411   :  { %p3130_p3 = pnand %p3128_p2, %p3125_p1 }
 0x413   :  { %3133 = shalt.err (!%p3130_p3)
}
 0x414   :  { %2369 = dma.vmem_to_hbm [thread:$0]  %s2364_s22, 3840, %s4519_s7, [#allocation4], %s3144_s3, %s3144_s3, %s3145_s25  }
 0x415   :  { %3138 = dma.done.wait [#allocation4], 3840  }
 0x416   :  { %3139 = vsyncadd [#allocation4], 4294963456 }
 0x417   :  { %2373 = vsyncpa [#allocation3], 1 }
 0x418   :  { %2374 = vsyncpa [#allocation6], 1 }
 0x419   :  { %2375 = vsyncpa [#allocation4], 1 }

</bundles_post_ra>
